<compile_context>
chip_gen: v6e
topology: v6e:2x2x1
jax: 0.10.0
libtpu: 0.0.40
codegen_flags: <defaults>
</compile_context>

<pallas_src>
import functools

import jax
import jax.numpy as jnp
from jax.experimental import pallas as pl
from jax.experimental.pallas import tpu as pltpu


# ----------------------------- shared helpers ------------------------------

def _layernorm(x, gamma, beta, eps=1e-6):
    # matches nn.LayerNorm(hidden, eps=1e-6)
    mu = jnp.mean(x, axis=-1, keepdims=True)
    var = jnp.mean((x - mu) ** 2, axis=-1, keepdims=True)
    return (x - mu) * jax.lax.rsqrt(var + eps) * gamma + beta


def _round_up(n, m):
    return ((n + m - 1) // m) * m


def _pick_batch_tile(B, cap=8):
    """Largest divisor of B that is <= cap (amortizes weight DMA)."""
    for d in range(min(B, cap), 0, -1):
        if B % d == 0:
            return d
    return 1


# --------------------------- embeddings kernel ------------------------------
# patches_padded: [B, S_pad, K] bf16  (row 0 of each image is a zero "patch"
#   standing in for the [cls] token; rows >= S_real are zero padding).
# w: [K, D] bf16 patch-embedding weight.
# add: [S_pad, D] f32 additive table: row 0 = cls + pos[0],
#   rows 1..P = conv_bias + pos[1..P], pad rows = 0.
# out: [B, S_pad, D] f32.

def embed_kernel(p_ref, w_ref, add_ref, o_ref):
    Bt, S, K = p_ref.shape
    D = w_ref.shape[1]
    pe = jnp.dot(p_ref[...].reshape(Bt * S, K), w_ref[...],
                 preferred_element_type=jnp.float32)
    o_ref[...] = pe.reshape(Bt, S, D) + add_ref[...][None, :, :]


def run_embed(patches_padded, w, embed_add, *, bt):
    B, S, K = patches_padded.shape
    D = w.shape[1]

    flops = 2 * B * S * K * D
    bytes_acc = (B * S * K * 2 + K * D * 2 + S * D * 4 + B * S * D * 4)

    return pl.pallas_call(
        embed_kernel,
        out_shape=jax.ShapeDtypeStruct((B, S, D), jnp.float32),
        grid_spec=pltpu.PrefetchScalarGridSpec(
            num_scalar_prefetch=0,
            grid=(B // bt,),
            in_specs=[
                pl.BlockSpec((bt, S, K), lambda b: (b, 0, 0)),   # patch tiles
                pl.BlockSpec((K, D), lambda b: (0, 0)),          # weight (resident)
                pl.BlockSpec((S, D), lambda b: (0, 0)),          # additive table
            ],
            out_specs=pl.BlockSpec((bt, S, D), lambda b: (b, 0, 0)),
        ),
        compiler_params=pltpu.CompilerParams(
            dimension_semantics=("parallel",),
            vmem_limit_bytes=64 * 1024 * 1024),
        cost_estimate=pl.CostEstimate(flops=int(flops), transcendentals=0,
                                      bytes_accessed=int(bytes_acc)),
    )(patches_padded, w, embed_add)


# ------------------------- fused encoder kernel -----------------------------
# grid = (B // Bt, L).  Per-layer weights are stacked along a leading L axis
# and selected by the layer grid index (prefetched while the previous layer
# computes).  The activation carry lives in the resident output block.

def encoder_kernel(x_ref, pvec_ref, wqkv_ref, bqkv_ref, wo_ref,
                   w1_ref, b1_ref, w2_ref, encln_ref, o_ref,
                   *, num_heads, seq_real):
    layer = pl.program_id(1)
    n_layers = pl.num_programs(1)

    @pl.when(layer == 0)
    def _():                       # load this batch tile's embeddings once
        o_ref[...] = x_ref[...]

    Bt, S, D = o_ref.shape
    H = num_heads
    dh = D // H
    scale = 1.0 / jnp.sqrt(jnp.float32(dh))

    x = o_ref[...].reshape(Bt * S, D)          # [Bt*S, D] f32 carry

    pv = pvec_ref[0]               # [6, D]: ln1_g, ln1_b, ln2_g, ln2_b, bo, b2
    ln1_g, ln1_b = pv[0:1], pv[1:2]
    ln2_g, ln2_b = pv[2:3], pv[3:4]
    bo, b2 = pv[4:5], pv[5:6]

    # ---- attention branch (pre-norm), fused QKV matmul over Bt*S rows ----
    h = _layernorm(x, ln1_g, ln1_b)
    qkv = jnp.dot(h.astype(wqkv_ref.dtype), wqkv_ref[0],
                  preferred_element_type=jnp.float32) + bqkv_ref[0]     # [Bt*S, 3D]

    def heads(t):                  # [Bt*S, D] -> [Bt*H, S, dh] (bf16 for the MXU)
        return (t.reshape(Bt, S, H, dh).transpose(0, 2, 1, 3)
                 .reshape(Bt * H, S, dh).astype(jnp.bfloat16))

    q = heads(qkv[:, 0 * D:1 * D])
    k = heads(qkv[:, 1 * D:2 * D])
    v = heads(qkv[:, 2 * D:3 * D])

    s = jnp.einsum('hqd,hkd->hqk', q, k,
                   preferred_element_type=jnp.float32) * scale          # [Bt*H,S,S]
    if S > seq_real:               # mask padded key positions (static pad)
        kidx = jax.lax.broadcasted_iota(jnp.int32, (1, 1, S), 2)
        s = jnp.where(kidx >= seq_real, jnp.float32(-1e30), s)
    s = s - jnp.max(s, axis=-1, keepdims=True)
    p = jnp.exp(s)
    p = p * pl.reciprocal(jnp.sum(p, axis=-1, keepdims=True), approx=True)

    ctx = jnp.einsum('hqk,hkd->hqd', p.astype(jnp.bfloat16), v,
                     preferred_element_type=jnp.float32)                # [Bt*H,S,dh]
    ctx = (ctx.reshape(Bt, H, S, dh).transpose(0, 2, 1, 3)
              .reshape(Bt * S, D))

    attn_out = jnp.dot(ctx.astype(wo_ref.dtype), wo_ref[0],
                       preferred_element_type=jnp.float32) + bo
    x = x + attn_out

    # ---- MLP branch (pre-norm) ----
    h2 = _layernorm(x, ln2_g, ln2_b)
    f = jnp.dot(h2.astype(w1_ref.dtype), w1_ref[0],
                preferred_element_type=jnp.float32) + b1_ref[0]
    # exact GELU (erf form, matches F.gelu default)
    f = 0.5 * f * (1.0 + jax.lax.erf(f * (1.0 / jnp.sqrt(jnp.float32(2.0)))))
    f = jnp.dot(f.astype(w2_ref.dtype), w2_ref[0],
                preferred_element_type=jnp.float32) + b2
    x = x + f

    o_ref[...] = x.reshape(Bt, S, D)           # carry to next layer (resident block)

    # final encoder LayerNorm folded into the last layer iteration
    @pl.when(layer == n_layers - 1)
    def _():
        el = encln_ref[...]
        o_ref[...] = _layernorm(x, el[0:1], el[1:2]).reshape(Bt, S, D)


def run_encoder(x, pk, num_heads, seq_real, *, bt):
    B, S, D = x.shape
    L, _, M = pk["w1"].shape
    H = num_heads
    dh = D // H

    # --- advisory cost estimate for XLA scheduling around the custom call ---
    wbytes_layer = (D * 3 * D + D * D + 2 * D * M) * 2 + (9 * D + M + 2 * D) * 4
    flops = L * (2 * B * S * D * (4 * D + 2 * M) + 4 * B * H * S * S * dh)
    transc = L * (B * H * S * S + B * S * M)
    bytes_acc = (B // bt) * L * wbytes_layer + 2 * B * S * D * 4

    # --- explicit VMEM limit: double-buffered weights + activations + slack ---
    # TODO(synk): for real ViT-Large on v7x (64 MiB VMEM) also tile the MLP
    # matmuls over M instead of only raising the limit.
    est = (2 * wbytes_layer
           + 4 * bt * S * D * 4
           + bt * S * (3 * D + M) * 4
           + 2 * bt * H * S * S * 4)
    vmem_limit = int(min(100 * 1024 * 1024, max(32 * 1024 * 1024, 2 * est)))

    kern = functools.partial(encoder_kernel, num_heads=num_heads, seq_real=seq_real)
    return pl.pallas_call(
        kern,
        out_shape=jax.ShapeDtypeStruct((B, S, D), jnp.float32),
        grid_spec=pltpu.PrefetchScalarGridSpec(
            num_scalar_prefetch=0,
            grid=(B // bt, L),
            in_specs=[
                pl.BlockSpec((bt, S, D), lambda b, l: (b, 0, 0)),     # embeddings
                pl.BlockSpec((1, 6, D), lambda b, l: (l, 0, 0)),      # packed LN/bias vecs
                pl.BlockSpec((1, D, 3 * D), lambda b, l: (l, 0, 0)),  # fused Wqkv (bf16)
                pl.BlockSpec((1, 1, 3 * D), lambda b, l: (l, 0, 0)),  # fused bqkv
                pl.BlockSpec((1, D, D), lambda b, l: (l, 0, 0)),      # Wo (bf16)
                pl.BlockSpec((1, D, M), lambda b, l: (l, 0, 0)),      # fc1 W (bf16)
                pl.BlockSpec((1, 1, M), lambda b, l: (l, 0, 0)),      # fc1 b
                pl.BlockSpec((1, M, D), lambda b, l: (l, 0, 0)),      # fc2 W (bf16)
                pl.BlockSpec((2, D), lambda b, l: (0, 0)),            # final LN g/b
            ],
            out_specs=pl.BlockSpec((bt, S, D), lambda b, l: (b, 0, 0)),
        ),
        compiler_params=pltpu.CompilerParams(
            dimension_semantics=("parallel", "arbitrary"),
            vmem_limit_bytes=vmem_limit),
        cost_estimate=pl.CostEstimate(flops=int(flops), transcendentals=int(transc),
                                      bytes_accessed=int(bytes_acc)),
    )(x, pk["pvec"], pk["wqkv"], pk["bqkv"], pk["wo"],
      pk["w1"], pk["b1"], pk["w2"], pk["enc_ln"])


# ------------------------------ parameters ----------------------------------

def init_params(key, img_size, patch, hidden, num_layers, mlp_dim, num_heads,
                in_channels=3):
    """PyTorch-structured params. Linear weights stored [in, out] (transposed
    from torch's [out, in]); conv weight kept in torch's [D, C, ph, pw]."""
    ph = pw = patch
    n_patches = (img_size // ph) * (img_size // pw)
    keys = iter(jax.random.split(key, 8 + 16 * num_layers))

    def nrm(k, shape, std=0.02):
        return (std * jax.random.normal(k, shape)).astype(jnp.float32)

    params = {
        "conv_w": nrm(next(keys), (hidden, in_channels, ph, pw)),
        "conv_b": nrm(next(keys), (1, hidden)),
        "cls_token": nrm(next(keys), (1, 1, hidden)),
        "pos_emb": nrm(next(keys), (1, n_patches + 1, hidden)),
        "enc_ln_g": jnp.ones((1, hidden), jnp.float32),
        "enc_ln_b": jnp.zeros((1, hidden), jnp.float32),
        "blocks": [],
    }
    for _ in range(num_layers):
        blk = {
            "ln1_g": jnp.ones((1, hidden), jnp.float32),
            "ln1_b": jnp.zeros((1, hidden), jnp.float32),
            "wq": nrm(next(keys), (hidden, hidden)), "bq": nrm(next(keys), (1, hidden)),
            "wk": nrm(next(keys), (hidden, hidden)), "bk": nrm(next(keys), (1, hidden)),
            "wv": nrm(next(keys), (hidden, hidden)), "bv": nrm(next(keys), (1, hidden)),
            "wo": nrm(next(keys), (hidden, hidden)), "bo": nrm(next(keys), (1, hidden)),
            "ln2_g": jnp.ones((1, hidden), jnp.float32),
            "ln2_b": jnp.zeros((1, hidden), jnp.float32),
            "w1": nrm(next(keys), (hidden, mlp_dim)), "b1": nrm(next(keys), (1, mlp_dim)),
            "w2": nrm(next(keys), (mlp_dim, hidden)), "b2": nrm(next(keys), (1, hidden)),
        }
        params["blocks"].append(blk)
    return params


def pack_params(params, patch, in_channels=3):
    """Fuse QKV, stack layers along a leading L axis, cast matmul weights to
    bf16, pack tiny per-layer vectors, and precompute the embedding add table
    (cls+pos / conv_bias+pos) padded to a sublane-aligned sequence length."""
    D = params["conv_w"].shape[0]
    K = in_channels * patch * patch
    S_real = params["pos_emb"].shape[1]
    S_pad = _round_up(S_real, 8)

    w_patch = params["conv_w"].reshape(D, K).T.astype(jnp.bfloat16)       # [K, D]

    pos = params["pos_emb"][0]                                            # [S_real, D]
    embed_add = jnp.concatenate([
        params["cls_token"][0] + pos[0:1],                                # cls row
        params["conv_b"] + pos[1:],                                       # patch rows
        jnp.zeros((S_pad - S_real, D), jnp.float32),                      # pad rows
    ], axis=0).astype(jnp.float32)                                        # [S_pad, D]

    def stack(fn):
        return jnp.stack([fn(b) for b in params["blocks"]], axis=0)

    wqkv = stack(lambda b: jnp.concatenate([b["wq"], b["wk"], b["wv"]], axis=1)
                 ).astype(jnp.bfloat16)                                    # [L, D, 3D]
    bqkv = stack(lambda b: jnp.concatenate([b["bq"], b["bk"], b["bv"]], axis=1))  # [L,1,3D]
    wo = stack(lambda b: b["wo"]).astype(jnp.bfloat16)                     # [L, D, D]
    w1 = stack(lambda b: b["w1"]).astype(jnp.bfloat16)                     # [L, D, M]
    b1 = stack(lambda b: b["b1"])                                          # [L, 1, M]
    w2 = stack(lambda b: b["w2"]).astype(jnp.bfloat16)                     # [L, M, D]
    pvec = stack(lambda b: jnp.concatenate(
        [b["ln1_g"], b["ln1_b"], b["ln2_g"], b["ln2_b"], b["bo"], b["b2"]],
        axis=0))                                                           # [L, 6, D]
    enc_ln = jnp.concatenate([params["enc_ln_g"], params["enc_ln_b"]], axis=0)  # [2, D]

    return {"w_patch": w_patch, "embed_add": embed_add,
            "wqkv": wqkv, "bqkv": bqkv, "wo": wo,
            "w1": w1, "b1": b1, "w2": w2, "pvec": pvec, "enc_ln": enc_ln}


# ------------------------------ full forward ---------------------------------

def transformer_forward(x_nchw, packed, patch, num_heads):
    B, C, Himg, Wimg = x_nchw.shape
    ph = pw = patch
    nh, nw = Himg // ph, Wimg // pw
    P = nh * nw
    K = C * ph * pw
    S_real = P + 1
    S_pad = packed["embed_add"].shape[0]

    # im2col unfold (c, i, j order matches the flattened conv weight), bf16
    patches = (x_nchw.reshape(B, C, nh, ph, nw, pw)
                     .transpose(0, 2, 4, 1, 3, 5)
                     .reshape(B, P, K)).astype(jnp.bfloat16)
    # prepend a zero "patch" for the [cls] slot and zero rows up to S_pad
    patches = jnp.pad(patches, ((0, 0), (1, S_pad - S_real), (0, 0)))

    bt = _pick_batch_tile(B)
    x = run_embed(patches, packed["w_patch"], packed["embed_add"], bt=bt)   # [B,S_pad,D]
    # dropout layers are identity at inference
    encoded = run_encoder(x, packed, num_heads, S_real, bt=bt)              # [B,S_pad,D]
    encoded = encoded[:, :S_real, :]                                        # drop pads
    attn_weights = []   # vis=False -> never populated (matches PyTorch module)
    return encoded, attn_weights


# ---------------------------------- main -------------------------------------

if __name__ == "__main__":
    # small ViT config: img 16x16, patch 4 -> 16 patches (+1 cls = 17 tokens)
    B, C, IMG, PATCH = 2, 3, 16, 4
    HIDDEN, LAYERS, MLP_DIM, HEADS = 32, 2, 64, 4

    key = jax.random.PRNGKey(0)
    k_x, k_p = jax.random.split(key)
    x = jax.random.normal(k_x, (B, C, IMG, IMG), dtype=jnp.float32)   # NCHW, like PyTorch

    params = init_params(k_p, IMG, PATCH, HIDDEN, LAYERS, MLP_DIM, HEADS, in_channels=C)
    packed = pack_params(params, PATCH, in_channels=C)

    fwd = jax.jit(functools.partial(transformer_forward, patch=PATCH, num_heads=HEADS))
    encoded, attn_weights = fwd(x, packed)
    encoded = jax.block_until_ready(encoded)

    assert encoded.shape == (B, (IMG // PATCH) ** 2 + 1, HIDDEN)
    assert attn_weights == []
    assert bool(jnp.all(jnp.isfinite(encoded)))
    print("KERNEL_OK")
</pallas_src>

<mosaic_0001>
module attributes {stable_mosaic.version = 11 : i64} {
  func.func @embed_kernel(%arg0: i32, %arg1: memref<2x24x48xbf16, #tpu.memory_space<vmem>>, %arg2: memref<48x32xbf16, #tpu.memory_space<vmem>>, %arg3: memref<24x32xf32, #tpu.memory_space<vmem>>, %arg4: memref<2x24x32xf32, #tpu.memory_space<vmem>>) attributes {dimension_semantics = [#tpu.dimension_semantics<parallel>], iteration_bounds = array<i64: 1>, scalar_prefetch = 0 : i64, scratch_operands = 0 : i64, tpu.core_type = #tpu.core_type<tc>, window_params = [{transform_indices = @transform_0, window_bounds = array<i64: 2, 24, 48>}, {pipeline_mode = #tpu.pipeline_mode<synchronous>, transform_indices = @transform_1, window_bounds = array<i64: 48, 32>}, {pipeline_mode = #tpu.pipeline_mode<synchronous>, transform_indices = @transform_2, window_bounds = array<i64: 24, 32>}, {transform_indices = @transform_3, window_bounds = array<i64: 2, 24, 32>}]} {
    %c0 = arith.constant 0 : index
    %c0_0 = arith.constant 0 : index
    %c0_1 = arith.constant 0 : index
    %0 = vector.load %arg1[%c0, %c0_0, %c0_1] : memref<2x24x48xbf16, #tpu.memory_space<vmem>>, vector<2x24x48xbf16>
    %1 = vector.shape_cast %0 : vector<2x24x48xbf16> to vector<48x48xbf16>
    %c0_2 = arith.constant 0 : index
    %c0_3 = arith.constant 0 : index
    %2 = vector.load %arg2[%c0_2, %c0_3] : memref<48x32xbf16, #tpu.memory_space<vmem>>, vector<48x32xbf16>
    %cst = arith.constant dense<0.000000e+00> : vector<48x32xf32>
    %3 = tpu.matmul %1, %2, %cst {dimension_numbers = #tpu.dot_dimension_numbers<[1], [0], [0], [1], [0, 0, 1, 1], [], []>} : vector<48x48xbf16>, vector<48x32xbf16>, vector<48x32xf32> -> vector<48x32xf32>
    %4 = vector.shape_cast %3 : vector<48x32xf32> to vector<2x24x32xf32>
    %c0_4 = arith.constant 0 : index
    %c0_5 = arith.constant 0 : index
    %5 = vector.load %arg3[%c0_4, %c0_5] : memref<24x32xf32, #tpu.memory_space<vmem>>, vector<24x32xf32>
    %6 = vector.shape_cast %5 : vector<24x32xf32> to vector<1x24x32xf32>
    %7 = vector.broadcast %6 : vector<1x24x32xf32> to vector<2x24x32xf32>
    %8 = arith.addf %4, %7 : vector<2x24x32xf32>
    %c0_6 = arith.constant 0 : index
    %c0_7 = arith.constant 0 : index
    %c0_8 = arith.constant 0 : index
    %9 = vector.load %arg4[%c0_6, %c0_7, %c0_8] : memref<2x24x32xf32, #tpu.memory_space<vmem>>, vector<2x24x32xf32>
    tpu.vector_store %arg4[%c0_6, %c0_7, %c0_8], %8 {strides = array<i32>} : memref<2x24x32xf32, #tpu.memory_space<vmem>>, vector<2x24x32xf32>,
    return
  }
  func.func @transform_0(%arg0: i32) -> (i32, i32, i32) {
    %c0_i32 = arith.constant 0 : i32
    %c0_i32_0 = arith.constant 0 : i32
    %c0_i32_1 = arith.constant 0 : i32
    return %arg0, %c0_i32, %c0_i32_0 : i32, i32, i32
  }
  func.func @transform_1(%arg0: i32) -> (i32, i32) {
    %c0_i32 = arith.constant 0 : i32
    %c0_i32_0 = arith.constant 0 : i32
    %c0_i32_1 = arith.constant 0 : i32
    return %c0_i32, %c0_i32_0 : i32, i32
  }
  func.func @transform_2(%arg0: i32) -> (i32, i32) {
    %c0_i32 = arith.constant 0 : i32
    %c0_i32_0 = arith.constant 0 : i32
    %c0_i32_1 = arith.constant 0 : i32
    return %c0_i32, %c0_i32_0 : i32, i32
  }
  func.func @transform_3(%arg0: i32) -> (i32, i32, i32) {
    %c0_i32 = arith.constant 0 : i32
    %c0_i32_0 = arith.constant 0 : i32
    %c0_i32_1 = arith.constant 0 : i32
    return %arg0, %c0_i32, %c0_i32_0 : i32, i32, i32
  }
}

module attributes {stable_mosaic.version = 11 : i64} {
  func.func @encoder_kernel(%arg0: i32, %arg1: i32, %arg2: memref<2x24x32xf32, #tpu.memory_space<vmem>>, %arg3: memref<1x6x32xf32, #tpu.memory_space<vmem>>, %arg4: memref<1x32x96xbf16, #tpu.memory_space<vmem>>, %arg5: memref<1x1x96xf32, #tpu.memory_space<vmem>>, %arg6: memref<1x32x32xbf16, #tpu.memory_space<vmem>>, %arg7: memref<1x32x64xbf16, #tpu.memory_space<vmem>>, %arg8: memref<1x1x64xf32, #tpu.memory_space<vmem>>, %arg9: memref<1x64x32xbf16, #tpu.memory_space<vmem>>, %arg10: memref<2x32xf32, #tpu.memory_space<vmem>>, %arg11: memref<2x24x32xf32, #tpu.memory_space<vmem>>) attributes {dimension_semantics = [#tpu.dimension_semantics<parallel>, #tpu.dimension_semantics<arbitrary>], iteration_bounds = array<i64: 1, 2>, scalar_prefetch = 0 : i64, scratch_operands = 0 : i64, tpu.core_type = #tpu.core_type<tc>, window_params = [{transform_indices = @transform_0, window_bounds = array<i64: 2, 24, 32>}, {transform_indices = @transform_1, window_bounds = array<i64: 1, 6, 32>}, {transform_indices = @transform_2, window_bounds = array<i64: 1, 32, 96>}, {transform_indices = @transform_3, window_bounds = array<i64: 1, 1, 96>}, {transform_indices = @transform_4, window_bounds = array<i64: 1, 32, 32>}, {transform_indices = @transform_5, window_bounds = array<i64: 1, 32, 64>}, {transform_indices = @transform_6, window_bounds = array<i64: 1, 1, 64>}, {transform_indices = @transform_7, window_bounds = array<i64: 1, 64, 32>}, {pipeline_mode = #tpu.pipeline_mode<synchronous>, transform_indices = @transform_8, window_bounds = array<i64: 2, 32>}, {transform_indices = @transform_9, window_bounds = array<i64: 2, 24, 32>}]} {
    %c0_i32 = arith.constant 0 : i32
    %0 = arith.cmpi eq, %arg1, %c0_i32 : i32
    %1 = arith.extui %0 : i1 to i32
    %c0_i32_0 = arith.constant 0 : i32
    %2 = arith.cmpi ne, %1, %c0_i32_0 : i32
    scf.if %2 {
      %c0_52 = arith.constant 0 : index
      %c0_53 = arith.constant 0 : index
      %c0_54 = arith.constant 0 : index
      %144 = vector.load %arg2[%c0_52, %c0_53, %c0_54] : memref<2x24x32xf32, #tpu.memory_space<vmem>>, vector<2x24x32xf32>
      %c0_55 = arith.constant 0 : index
      %c0_56 = arith.constant 0 : index
      %c0_57 = arith.constant 0 : index
      %145 = vector.load %arg11[%c0_55, %c0_56, %c0_57] : memref<2x24x32xf32, #tpu.memory_space<vmem>>, vector<2x24x32xf32>
      tpu.vector_store %arg11[%c0_55, %c0_56, %c0_57], %144 {strides = array<i32>} : memref<2x24x32xf32, #tpu.memory_space<vmem>>, vector<2x24x32xf32>,
    } else {
    }
    %cst = arith.constant 8.000000e+00 : f32
    %3 = math.sqrt %cst : f32
    %cst_1 = arith.constant 1.000000e+00 : f32
    %4 = arith.divf %cst_1, %3 : f32
    %c0 = arith.constant 0 : index
    %c0_2 = arith.constant 0 : index
    %c0_3 = arith.constant 0 : index
    %5 = vector.load %arg11[%c0, %c0_2, %c0_3] : memref<2x24x32xf32, #tpu.memory_space<vmem>>, vector<2x24x32xf32>
    %6 = vector.shape_cast %5 : vector<2x24x32xf32> to vector<48x32xf32>
    %c0_4 = arith.constant 0 : index
    %c0_5 = arith.constant 0 : index
    %c0_6 = arith.constant 0 : index
    %7 = vector.load %arg3[%c0_4, %c0_5, %c0_6] : memref<1x6x32xf32, #tpu.memory_space<vmem>>, vector<1x6x32xf32>
    %8 = vector.shape_cast %7 : vector<1x6x32xf32> to vector<6x32xf32>
    %9 = vector.extract_strided_slice %8 {offsets = [0, 0], sizes = [1, 32], strides = [1, 1]} : vector<6x32xf32> to vector<1x32xf32>
    %10 = vector.extract_strided_slice %8 {offsets = [1, 0], sizes = [1, 32], strides = [1, 1]} : vector<6x32xf32> to vector<1x32xf32>
    %11 = vector.extract_strided_slice %8 {offsets = [2, 0], sizes = [1, 32], strides = [1, 1]} : vector<6x32xf32> to vector<1x32xf32>
    %12 = vector.extract_strided_slice %8 {offsets = [3, 0], sizes = [1, 32], strides = [1, 1]} : vector<6x32xf32> to vector<1x32xf32>
    %13 = vector.extract_strided_slice %8 {offsets = [4, 0], sizes = [1, 32], strides = [1, 1]} : vector<6x32xf32> to vector<1x32xf32>
    %14 = vector.extract_strided_slice %8 {offsets = [5, 0], sizes = [1, 32], strides = [1, 1]} : vector<6x32xf32> to vector<1x32xf32>
    %cst_7 = arith.constant dense<0.000000e+00> : vector<48xf32>
    %15 = vector.multi_reduction <add>, %6, %cst_7 [1] : vector<48x32xf32> to vector<48xf32>
    %16 = vector.shape_cast %15 : vector<48xf32> to vector<48x1xf32>
    %cst_8 = arith.constant 3.200000e+01 : f32
    %17 = vector.broadcast %cst_8 : f32 to vector<48x1xf32>
    %18 = arith.divf %16, %17 : vector<48x1xf32>
    %19 = vector.broadcast %18 : vector<48x1xf32> to vector<48x32xf32>
    %20 = arith.subf %6, %19 : vector<48x32xf32>
    %21 = arith.mulf %20, %20 : vector<48x32xf32>
    %cst_9 = arith.constant dense<0.000000e+00> : vector<48xf32>
    %22 = vector.multi_reduction <add>, %21, %cst_9 [1] : vector<48x32xf32> to vector<48xf32>
    %23 = vector.shape_cast %22 : vector<48xf32> to vector<48x1xf32>
    %cst_10 = arith.constant 3.200000e+01 : f32
    %24 = vector.broadcast %cst_10 : f32 to vector<48x1xf32>
    %25 = arith.divf %23, %24 : vector<48x1xf32>
    %26 = vector.broadcast %18 : vector<48x1xf32> to vector<48x32xf32>
    %27 = arith.subf %6, %26 : vector<48x32xf32>
    %cst_11 = arith.constant 9.99999997E-7 : f32
    %28 = vector.broadcast %cst_11 : f32 to vector<48x1xf32>
    %29 = arith.addf %25, %28 : vector<48x1xf32>
    %30 = math.rsqrt %29 : vector<48x1xf32>
    %31 = vector.broadcast %30 : vector<48x1xf32> to vector<48x32xf32>
    %32 = arith.mulf %27, %31 : vector<48x32xf32>
    %33 = vector.broadcast %9 : vector<1x32xf32> to vector<48x32xf32>
    %34 = arith.mulf %32, %33 : vector<48x32xf32>
    %35 = vector.broadcast %10 : vector<1x32xf32> to vector<48x32xf32>
    %36 = arith.addf %34, %35 : vector<48x32xf32>
    %37 = arith.truncf %36 : vector<48x32xf32> to vector<48x32xbf16>
    %c0_12 = arith.constant 0 : index
    %c0_13 = arith.constant 0 : index
    %c0_14 = arith.constant 0 : index
    %38 = vector.load %arg4[%c0_12, %c0_13, %c0_14] : memref<1x32x96xbf16, #tpu.memory_space<vmem>>, vector<1x32x96xbf16>
    %39 = vector.shape_cast %38 : vector<1x32x96xbf16> to vector<32x96xbf16>
    %cst_15 = arith.constant dense<0.000000e+00> : vector<48x96xf32>
    %40 = tpu.matmul %37, %39, %cst_15 {dimension_numbers = #tpu.dot_dimension_numbers<[1], [0], [0], [1], [0, 0, 1, 1], [], []>} : vector<48x32xbf16>, vector<32x96xbf16>, vector<48x96xf32> -> vector<48x96xf32>
    %c0_16 = arith.constant 0 : index
    %c0_17 = arith.constant 0 : index
    %c0_18 = arith.constant 0 : index
    %41 = vector.load %arg5[%c0_16, %c0_17, %c0_18] : memref<1x1x96xf32, #tpu.memory_space<vmem>>, vector<1x1x96xf32>
    %42 = vector.shape_cast %41 : vector<1x1x96xf32> to vector<1x96xf32>
    %43 = vector.broadcast %42 : vector<1x96xf32> to vector<48x96xf32>
    %44 = arith.addf %40, %43 : vector<48x96xf32>
    %45 = vector.extract_strided_slice %44 {offsets = [0, 0], sizes = [48, 32], strides = [1, 1]} : vector<48x96xf32> to vector<48x32xf32>
    %46 = vector.shape_cast %45 : vector<48x32xf32> to vector<2x24x4x8xf32>
    %47 = tpu.transpose %46, [0, 2, 1, 3] : vector<2x24x4x8xf32> -> vector<2x4x24x8xf32>
    %48 = vector.shape_cast %47 : vector<2x4x24x8xf32> to vector<8x24x8xf32>
    %49 = arith.truncf %48 : vector<8x24x8xf32> to vector<8x24x8xbf16>
    %50 = vector.extract_strided_slice %44 {offsets = [0, 32], sizes = [48, 32], strides = [1, 1]} : vector<48x96xf32> to vector<48x32xf32>
    %51 = vector.shape_cast %50 : vector<48x32xf32> to vector<2x24x4x8xf32>
    %52 = tpu.transpose %51, [0, 2, 1, 3] : vector<2x24x4x8xf32> -> vector<2x4x24x8xf32>
    %53 = vector.shape_cast %52 : vector<2x4x24x8xf32> to vector<8x24x8xf32>
    %54 = arith.truncf %53 : vector<8x24x8xf32> to vector<8x24x8xbf16>
    %55 = vector.extract_strided_slice %44 {offsets = [0, 64], sizes = [48, 32], strides = [1, 1]} : vector<48x96xf32> to vector<48x32xf32>
    %56 = vector.shape_cast %55 : vector<48x32xf32> to vector<2x24x4x8xf32>
    %57 = tpu.transpose %56, [0, 2, 1, 3] : vector<2x24x4x8xf32> -> vector<2x4x24x8xf32>
    %58 = vector.shape_cast %57 : vector<2x4x24x8xf32> to vector<8x24x8xf32>
    %59 = arith.truncf %58 : vector<8x24x8xf32> to vector<8x24x8xbf16>
    "tpu.trace_start"() <{level = 10 : i32, message = "hqd,hkd->hqk"}> : () -> ()
    %cst_19 = arith.constant dense<0.000000e+00> : vector<8x24x24xf32>
    %60 = tpu.matmul %49, %54, %cst_19 {dimension_numbers = #tpu.dot_dimension_numbers<[2], [2], [1], [1], [0, 0, 0, 1, 1, 1], [0], [0]>} : vector<8x24x8xbf16>, vector<8x24x8xbf16>, vector<8x24x24xf32> -> vector<8x24x24xf32>
    "tpu.trace_stop"() : () -> ()
    %61 = vector.broadcast %4 : f32 to vector<8x24x24xf32>
    %62 = arith.mulf %60, %61 : vector<8x24x24xf32>
    %63 = tpu.iota {dimensions = array<i32: 2>} : vector<1x1x24xi32>
    %c17_i32 = arith.constant 17 : i32
    %64 = vector.broadcast %c17_i32 : i32 to vector<1x1x24xi32>
    %65 = arith.cmpi sge, %63, %64 : vector<1x1x24xi32>
    %cst_20 = arith.constant -1.000000e+30 : f32
    %66 = vector.shape_cast %65 : vector<1x1x24xi1> to vector<1x1x24xi1>
    %67 = vector.broadcast %66 : vector<1x1x24xi1> to vector<8x24x24xi1>
    %68 = vector.broadcast %cst_20 : f32 to vector<8x24x24xf32>
    %69 = arith.select %67, %68, %62 : vector<8x24x24xi1>, vector<8x24x24xf32>
    %cst_21 = arith.constant dense<0xFF800000> : vector<8x24xf32>
    %70 = vector.multi_reduction <maximumf>, %69, %cst_21 [2] : vector<8x24x24xf32> to vector<8x24xf32>
    %71 = vector.shape_cast %70 : vector<8x24xf32> to vector<8x24x1xf32>
    %72 = vector.broadcast %71 : vector<8x24x1xf32> to vector<8x24x24xf32>
    %73 = arith.subf %69, %72 : vector<8x24x24xf32>
    %74 = math.exp %73 : vector<8x24x24xf32>
    %cst_22 = arith.constant dense<0.000000e+00> : vector<8x24xf32>
    %75 = vector.multi_reduction <add>, %74, %cst_22 [2] : vector<8x24x24xf32> to vector<8x24xf32>
    %76 = vector.shape_cast %75 : vector<8x24xf32> to vector<8x24x1xf32>
    %77 = tpu.reciprocal %76 {approx = true} : vector<8x24x1xf32> -> vector<8x24x1xf32>
    %78 = vector.broadcast %77 : vector<8x24x1xf32> to vector<8x24x24xf32>
    %79 = arith.mulf %74, %78 : vector<8x24x24xf32>
    %80 = arith.truncf %79 : vector<8x24x24xf32> to vector<8x24x24xbf16>
    "tpu.trace_start"() <{level = 10 : i32, message = "hqk,hkd->hqd"}> : () -> ()
    %cst_23 = arith.constant dense<0.000000e+00> : vector<8x24x8xf32>
    %81 = tpu.matmul %80, %59, %cst_23 {dimension_numbers = #tpu.dot_dimension_numbers<[2], [1], [1], [2], [0, 0, 0, 1, 1, 2], [0], [0]>} : vector<8x24x24xbf16>, vector<8x24x8xbf16>, vector<8x24x8xf32> -> vector<8x24x8xf32>
    "tpu.trace_stop"() : () -> ()
    %82 = vector.shape_cast %81 : vector<8x24x8xf32> to vector<2x4x24x8xf32>
    %83 = tpu.transpose %82, [0, 2, 1, 3] : vector<2x4x24x8xf32> -> vector<2x24x4x8xf32>
    %84 = vector.shape_cast %83 : vector<2x24x4x8xf32> to vector<48x32xf32>
    %85 = arith.truncf %84 : vector<48x32xf32> to vector<48x32xbf16>
    %c0_24 = arith.constant 0 : index
    %c0_25 = arith.constant 0 : index
    %c0_26 = arith.constant 0 : index
    %86 = vector.load %arg6[%c0_24, %c0_25, %c0_26] : memref<1x32x32xbf16, #tpu.memory_space<vmem>>, vector<1x32x32xbf16>
    %87 = vector.shape_cast %86 : vector<1x32x32xbf16> to vector<32x32xbf16>
    %cst_27 = arith.constant dense<0.000000e+00> : vector<48x32xf32>
    %88 = tpu.matmul %85, %87, %cst_27 {dimension_numbers = #tpu.dot_dimension_numbers<[1], [0], [0], [1], [0, 0, 1, 1], [], []>} : vector<48x32xbf16>, vector<32x32xbf16>, vector<48x32xf32> -> vector<48x32xf32>
    %89 = vector.broadcast %13 : vector<1x32xf32> to vector<48x32xf32>
    %90 = arith.addf %88, %89 : vector<48x32xf32>
    %91 = arith.addf %6, %90 : vector<48x32xf32>
    %cst_28 = arith.constant dense<0.000000e+00> : vector<48xf32>
    %92 = vector.multi_reduction <add>, %91, %cst_28 [1] : vector<48x32xf32> to vector<48xf32>
    %93 = vector.shape_cast %92 : vector<48xf32> to vector<48x1xf32>
    %cst_29 = arith.constant 3.200000e+01 : f32
    %94 = vector.broadcast %cst_29 : f32 to vector<48x1xf32>
    %95 = arith.divf %93, %94 : vector<48x1xf32>
    %96 = vector.broadcast %95 : vector<48x1xf32> to vector<48x32xf32>
    %97 = arith.subf %91, %96 : vector<48x32xf32>
    %98 = arith.mulf %97, %97 : vector<48x32xf32>
    %cst_30 = arith.constant dense<0.000000e+00> : vector<48xf32>
    %99 = vector.multi_reduction <add>, %98, %cst_30 [1] : vector<48x32xf32> to vector<48xf32>
    %100 = vector.shape_cast %99 : vector<48xf32> to vector<48x1xf32>
    %cst_31 = arith.constant 3.200000e+01 : f32
    %101 = vector.broadcast %cst_31 : f32 to vector<48x1xf32>
    %102 = arith.divf %100, %101 : vector<48x1xf32>
    %103 = vector.broadcast %95 : vector<48x1xf32> to vector<48x32xf32>
    %104 = arith.subf %91, %103 : vector<48x32xf32>
    %cst_32 = arith.constant 9.99999997E-7 : f32
    %105 = vector.broadcast %cst_32 : f32 to vector<48x1xf32>
    %106 = arith.addf %102, %105 : vector<48x1xf32>
    %107 = math.rsqrt %106 : vector<48x1xf32>
    %108 = vector.broadcast %107 : vector<48x1xf32> to vector<48x32xf32>
    %109 = arith.mulf %104, %108 : vector<48x32xf32>
    %110 = vector.broadcast %11 : vector<1x32xf32> to vector<48x32xf32>
    %111 = arith.mulf %109, %110 : vector<48x32xf32>
    %112 = vector.broadcast %12 : vector<1x32xf32> to vector<48x32xf32>
    %113 = arith.addf %111, %112 : vector<48x32xf32>
    %114 = arith.truncf %113 : vector<48x32xf32> to vector<48x32xbf16>
    %c0_33 = arith.constant 0 : index
    %c0_34 = arith.constant 0 : index
    %c0_35 = arith.constant 0 : index
    %115 = vector.load %arg7[%c0_33, %c0_34, %c0_35] : memref<1x32x64xbf16, #tpu.memory_space<vmem>>, vector<1x32x64xbf16>
    %116 = vector.shape_cast %115 : vector<1x32x64xbf16> to vector<32x64xbf16>
    %cst_36 = arith.constant dense<0.000000e+00> : vector<48x64xf32>
    %117 = tpu.matmul %114, %116, %cst_36 {dimension_numbers = #tpu.dot_dimension_numbers<[1], [0], [0], [1], [0, 0, 1, 1], [], []>} : vector<48x32xbf16>, vector<32x64xbf16>, vector<48x64xf32> -> vector<48x64xf32>
    %c0_37 = arith.constant 0 : index
    %c0_38 = arith.constant 0 : index
    %c0_39 = arith.constant 0 : index
    %118 = vector.load %arg8[%c0_37, %c0_38, %c0_39] : memref<1x1x64xf32, #tpu.memory_space<vmem>>, vector<1x1x64xf32>
    %119 = vector.shape_cast %118 : vector<1x1x64xf32> to vector<1x64xf32>
    %120 = vector.broadcast %119 : vector<1x64xf32> to vector<48x64xf32>
    %121 = arith.addf %117, %120 : vector<48x64xf32>
    %cst_40 = arith.constant 5.000000e-01 : f32
    %122 = vector.broadcast %cst_40 : f32 to vector<48x64xf32>
    %123 = arith.mulf %122, %121 : vector<48x64xf32>
    %cst_41 = arith.constant 2.000000e+00 : f32
    %124 = math.sqrt %cst_41 : f32
    %cst_42 = arith.constant 1.000000e+00 : f32
    %125 = arith.divf %cst_42, %124 : f32
    %126 = vector.broadcast %125 : f32 to vector<48x64xf32>
    %127 = arith.mulf %121, %126 : vector<48x64xf32>
    %128 = math.erf %127 : vector<48x64xf32>
    %cst_43 = arith.constant 1.000000e+00 : f32
    %129 = vector.broadcast %cst_43 : f32 to vector<48x64xf32>
    %130 = arith.addf %129, %128 : vector<48x64xf32>
    %131 = arith.mulf %123, %130 : vector<48x64xf32>
    %132 = arith.truncf %131 : vector<48x64xf32> to vector<48x64xbf16>
    %c0_44 = arith.constant 0 : index
    %c0_45 = arith.constant 0 : index
    %c0_46 = arith.constant 0 : index
    %133 = vector.load %arg9[%c0_44, %c0_45, %c0_46] : memref<1x64x32xbf16, #tpu.memory_space<vmem>>, vector<1x64x32xbf16>
    %134 = vector.shape_cast %133 : vector<1x64x32xbf16> to vector<64x32xbf16>
    %cst_47 = arith.constant dense<0.000000e+00> : vector<48x32xf32>
    %135 = tpu.matmul %132, %134, %cst_47 {dimension_numbers = #tpu.dot_dimension_numbers<[1], [0], [0], [1], [0, 0, 1, 1], [], []>} : vector<48x64xbf16>, vector<64x32xbf16>, vector<48x32xf32> -> vector<48x32xf32>
    %136 = vector.broadcast %14 : vector<1x32xf32> to vector<48x32xf32>
    %137 = arith.addf %135, %136 : vector<48x32xf32>
    %138 = arith.addf %91, %137 : vector<48x32xf32>
    %139 = vector.shape_cast %138 : vector<48x32xf32> to vector<2x24x32xf32>
    %c0_48 = arith.constant 0 : index
    %c0_49 = arith.constant 0 : index
    %c0_50 = arith.constant 0 : index
    %140 = vector.load %arg11[%c0_48, %c0_49, %c0_50] : memref<2x24x32xf32, #tpu.memory_space<vmem>>, vector<2x24x32xf32>
    tpu.vector_store %arg11[%c0_48, %c0_49, %c0_50], %139 {strides = array<i32>} : memref<2x24x32xf32, #tpu.memory_space<vmem>>, vector<2x24x32xf32>,
    %c1_i32 = arith.constant 1 : i32
    %141 = arith.cmpi eq, %arg1, %c1_i32 : i32
    %142 = arith.extui %141 : i1 to i32
    %c0_i32_51 = arith.constant 0 : i32
    %143 = arith.cmpi ne, %142, %c0_i32_51 : i32
    scf.if %143 {
      %c0_52 = arith.constant 0 : index
      %c0_53 = arith.constant 0 : index
      %144 = vector.load %arg10[%c0_52, %c0_53] : memref<2x32xf32, #tpu.memory_space<vmem>>, vector<2x32xf32>
      %145 = vector.extract_strided_slice %144 {offsets = [0, 0], sizes = [1, 32], strides = [1, 1]} : vector<2x32xf32> to vector<1x32xf32>
      %146 = vector.extract_strided_slice %144 {offsets = [1, 0], sizes = [1, 32], strides = [1, 1]} : vector<2x32xf32> to vector<1x32xf32>
      %cst_54 = arith.constant dense<0.000000e+00> : vector<48xf32>
      %147 = vector.multi_reduction <add>, %138, %cst_54 [1] : vector<48x32xf32> to vector<48xf32>
      %148 = vector.shape_cast %147 : vector<48xf32> to vector<48x1xf32>
      %cst_55 = arith.constant 3.200000e+01 : f32
      %149 = vector.broadcast %cst_55 : f32 to vector<48x1xf32>
      %150 = arith.divf %148, %149 : vector<48x1xf32>
      %151 = vector.broadcast %150 : vector<48x1xf32> to vector<48x32xf32>
      %152 = arith.subf %138, %151 : vector<48x32xf32>
      %153 = arith.mulf %152, %152 : vector<48x32xf32>
      %cst_56 = arith.constant dense<0.000000e+00> : vector<48xf32>
      %154 = vector.multi_reduction <add>, %153, %cst_56 [1] : vector<48x32xf32> to vector<48xf32>
      %155 = vector.shape_cast %154 : vector<48xf32> to vector<48x1xf32>
      %cst_57 = arith.constant 3.200000e+01 : f32
      %156 = vector.broadcast %cst_57 : f32 to vector<48x1xf32>
      %157 = arith.divf %155, %156 : vector<48x1xf32>
      %158 = vector.broadcast %150 : vector<48x1xf32> to vector<48x32xf32>
      %159 = arith.subf %138, %158 : vector<48x32xf32>
      %cst_58 = arith.constant 9.99999997E-7 : f32
      %160 = vector.broadcast %cst_58 : f32 to vector<48x1xf32>
      %161 = arith.addf %157, %160 : vector<48x1xf32>
      %162 = math.rsqrt %161 : vector<48x1xf32>
      %163 = vector.broadcast %162 : vector<48x1xf32> to vector<48x32xf32>
      %164 = arith.mulf %159, %163 : vector<48x32xf32>
      %165 = vector.broadcast %145 : vector<1x32xf32> to vector<48x32xf32>
      %166 = arith.mulf %164, %165 : vector<48x32xf32>
      %167 = vector.broadcast %146 : vector<1x32xf32> to vector<48x32xf32>
      %168 = arith.addf %166, %167 : vector<48x32xf32>
      %169 = vector.shape_cast %168 : vector<48x32xf32> to vector<2x24x32xf32>
      %c0_59 = arith.constant 0 : index
      %c0_60 = arith.constant 0 : index
      %c0_61 = arith.constant 0 : index
      %170 = vector.load %arg11[%c0_59, %c0_60, %c0_61] : memref<2x24x32xf32, #tpu.memory_space<vmem>>, vector<2x24x32xf32>
      tpu.vector_store %arg11[%c0_59, %c0_60, %c0_61], %169 {strides = array<i32>} : memref<2x24x32xf32, #tpu.memory_space<vmem>>, vector<2x24x32xf32>,
    } else {
    }
    return
  }
  func.func @transform_0(%arg0: i32, %arg1: i32) -> (i32, i32, i32) {
    %c0_i32 = arith.constant 0 : i32
    %c0_i32_0 = arith.constant 0 : i32
    %c0_i32_1 = arith.constant 0 : i32
    return %arg0, %c0_i32, %c0_i32_0 : i32, i32, i32
  }
  func.func @transform_1(%arg0: i32, %arg1: i32) -> (i32, i32, i32) {
    %c0_i32 = arith.constant 0 : i32
    %c0_i32_0 = arith.constant 0 : i32
    %c0_i32_1 = arith.constant 0 : i32
    return %arg1, %c0_i32, %c0_i32_0 : i32, i32, i32
  }
  func.func @transform_2(%arg0: i32, %arg1: i32) -> (i32, i32, i32) {
    %c0_i32 = arith.constant 0 : i32
    %c0_i32_0 = arith.constant 0 : i32
    %c0_i32_1 = arith.constant 0 : i32
    return %arg1, %c0_i32, %c0_i32_0 : i32, i32, i32
  }
  func.func @transform_3(%arg0: i32, %arg1: i32) -> (i32, i32, i32) {
    %c0_i32 = arith.constant 0 : i32
    %c0_i32_0 = arith.constant 0 : i32
    %c0_i32_1 = arith.constant 0 : i32
    return %arg1, %c0_i32, %c0_i32_0 : i32, i32, i32
  }
  func.func @transform_4(%arg0: i32, %arg1: i32) -> (i32, i32, i32) {
    %c0_i32 = arith.constant 0 : i32
    %c0_i32_0 = arith.constant 0 : i32
    %c0_i32_1 = arith.constant 0 : i32
    return %arg1, %c0_i32, %c0_i32_0 : i32, i32, i32
  }
  func.func @transform_5(%arg0: i32, %arg1: i32) -> (i32, i32, i32) {
    %c0_i32 = arith.constant 0 : i32
    %c0_i32_0 = arith.constant 0 : i32
    %c0_i32_1 = arith.constant 0 : i32
    return %arg1, %c0_i32, %c0_i32_0 : i32, i32, i32
  }
  func.func @transform_6(%arg0: i32, %arg1: i32) -> (i32, i32, i32) {
    %c0_i32 = arith.constant 0 : i32
    %c0_i32_0 = arith.constant 0 : i32
    %c0_i32_1 = arith.constant 0 : i32
    return %arg1, %c0_i32, %c0_i32_0 : i32, i32, i32
  }
  func.func @transform_7(%arg0: i32, %arg1: i32) -> (i32, i32, i32) {
    %c0_i32 = arith.constant 0 : i32
    %c0_i32_0 = arith.constant 0 : i32
    %c0_i32_1 = arith.constant 0 : i32
    return %arg1, %c0_i32, %c0_i32_0 : i32, i32, i32
  }
  func.func @transform_8(%arg0: i32, %arg1: i32) -> (i32, i32) {
    %c0_i32 = arith.constant 0 : i32
    %c0_i32_0 = arith.constant 0 : i32
    %c0_i32_1 = arith.constant 0 : i32
    return %c0_i32, %c0_i32_0 : i32, i32
  }
  func.func @transform_9(%arg0: i32, %arg1: i32) -> (i32, i32, i32) {
    %c0_i32 = arith.constant 0 : i32
    %c0_i32_0 = arith.constant 0 : i32
    %c0_i32_1 = arith.constant 0 : i32
    return %arg0, %c0_i32, %c0_i32_0 : i32, i32, i32
  }
}

</mosaic_0001>

<bundles_post_ra>
// kernel: transformer_forward.2
= control target key start
LH: loop header
LB: loop body
LE: loop exit
PB: predicated region body
PF: predicated region fallthrough
CT: control target
= control target key end

     0   :  { %v194_v0 = vmov 0.0   ;;  %vm195_vm0 = vmmov 0   ;;  %vm60_vm1 = vcmask 392192   ;;  %vm136_vm2 = vcmask 261120   ;;  %s270_s1 = inlined_call_operand.vmem [shape: bf16[48,32], index: 1, kind: input, shape index: {}]   ;;  %s271_s0 = inlined_call_operand.vmem [shape: bf16[2,24,48], index: 0, kind: input, shape index: {}]   ;;  %s272_s2 = inlined_call_operand.vmem [shape: f32[24,32], index: 2, kind: input, shape index: {}]   ;;  %s273_s3 = inlined_call_operand.vmem [shape: f32[2,24,32], index: 3, kind: output, shape index: {}]  }
   0x1   :  { %180 = vmatprep.subr.bf16.mxu1 %v194_v0  ;;  %v188_v1 = vld [vmem:[%s270_s1 + $0x10] sm:$0xff]   ;;  %162 = vmatprep.subr.bf16.mxu0 %v194_v0  ;;  %v189_v2 = vld [vmem:[%s270_s1 + $0x8] sm:$0xff]   ;;  %v190_v3 = vld [vmem:[%s270_s1] sm:$0xff]  }
   0x2   :  { %172 = vmatprep.mubr.msk.bf16.mxu1 %vm195_vm0, %v194_v0  ;;  %168 = vmatprep.mubr.msk.bf16.mxu0 %vm195_vm0, %v194_v0  ;;  %v191_v4 = vld [vmem:[%s271_s0 + $0x8] sm:$0xff]   ;;  %v192_v5 = vld [vmem:[%s271_s0] sm:$0xff]   ;;  %v193_v6 = vld [vmem:[%s271_s0 + $0x10] sm:$0xff]  }
   0x3   :  { %183 = vmatpush3.bf16.msra.mxu1 %v188_v1  ;;  %163 = vmatpush3.bf16.msra.mxu0 %v188_v1  ;;  %v129_v7 = vld [vmem:[%s272_s2 + $0x10] sm:$0xff]  ;;  %v127_v10 = vld [vmem:[%s272_s2] sm:$0xff]  ;;  %v128_v15 = vld [vmem:[%s272_s2 + $0x8] sm:$0xff] }
   0x4   :  { %181 = vmatprep.subr.bf16.mxu1 %v194_v0  ;;  %164 = vmatprep.subr.bf16.mxu0 %v194_v0 }
   0x7   :  { %184 = vmatpush3.bf16.msra.mxu1 %v189_v2  ;;  %165 = vmatpush3.bf16.msra.mxu0 %v189_v2 }
   0x8   :  { %182 = vmatprep.subr.bf16.mxu1 %v194_v0  ;;  %166 = vmatprep.subr.bf16.mxu0 %v194_v0 }
   0xb   :  { %185 = vmatpush3.bf16.msra.mxu1 %v190_v3  ;;  %167 = vmatpush3.bf16.msra.mxu0 %v190_v3 }
   0xe   :  { %173 = vmatmul.mubr.msk.bf16.vlgmr.msra.gmra.mxu1 %vm60_vm1, %v191_v4  ;;  %169 = vmatmul.mubr.msk.bf16.vlgmr.msra.gmra.mxu0 %vm60_vm1, %v192_v5 }
   0xf   :  { %176 = vmatprep.mubr.msk.bf16.mxu1 %vm195_vm0, %v194_v0 }
  0x16   :  { %177 = vmatmul.mubr.msk.bf16.gmra.mxu1 %vm60_vm1, %v193_v6 }
  0xce   :  { %v112_v8 = vpop.f32.mrf.mxu1  ;;  %v104_v9 = vpop.f32.mrf.mxu0 }
  0xcf   :  { %v132_v11 = vadd.f32 %v129_v7, %v112_v8  ;;  %v130_v12 = vadd.f32 %v127_v10, %v104_v9 }
  0xd0   :  { %v174_v13 = vpop.f32.mrf.mxu1  ;;  %v170_v14 = vpop.f32.mrf.mxu0 }
  0xd1   :  { %139 = vst.msk [vmem:[%s273_s3 + $0x10] sm:$0xff] %vm136_vm2, %v132_v11  ;;  %137 = vst.msk [vmem:[%s273_s3] sm:$0xff] %vm136_vm2, %v130_v12 }
  0xd2   :  { %v115_v16 = vpop.f32.mrf.mxu1  ;;  %v107_v17 = vpop.f32.mrf.mxu0 }
  0xd3   :  { %v133_v18 = vadd.f32 %v127_v10, %v115_v16  ;;  %v131_v19 = vadd.f32 %v128_v15, %v107_v17 }
  0xd4   :  { %v175_v20 = vpop.f32.mrf.mxu1  ;;  %v171_v21 = vpop.f32.mrf.mxu0 }
  0xd5   :  { %140 = vst.msk [vmem:[%s273_s3 + $0x18] sm:$0xff] %vm136_vm2, %v133_v18  ;;  %138 = vst.msk [vmem:[%s273_s3 + $0x8] sm:$0xff] %vm136_vm2, %v131_v19 }
  0xd6   :  { %v120_v22 = vpop.f32.mrf.mxu1 }
  0xd7   :  { %v134_v23 = vadd.f32 %v128_v15, %v120_v22 }
  0xd8   :  { %v178_v24 = vpop.f32.mrf.mxu1 }
  0xd9   :  { %141 = vst.msk [vmem:[%s273_s3 + $0x20] sm:$0xff] %vm136_vm2, %v134_v23 }
  0xda   :  { %v123_v25 = vpop.f32.mrf.mxu1 }
  0xdb   :  { %v135_v26 = vadd.f32 %v129_v7, %v123_v25 }
  0xdc   :  { %v179_v27 = vpop.f32.mrf.mxu1 }
  0xdd   :  { %142 = vst.msk [vmem:[%s273_s3 + $0x28] sm:$0xff] %vm136_vm2, %v135_v26 }

// kernel: transformer_forward.3
= control target key start
LH: loop header
LB: loop body
LE: loop exit
PB: predicated region body
PF: predicated region fallthrough
CT: control target
= control target key end

     0   :  { %s7023_s30 = smov 0   ;;  %s7025_s10 = smov 0   ;;  %s8939_s0 = inlined_call_operand.vmem [shape: f32[2,24,32], index: 0, kind: input, shape index: {}]   ;;  %s8940_s1 = inlined_call_operand.vmem [shape: f32[2,6,32], index: 1, kind: input, shape index: {}]   ;;  %s8941_s2 = inlined_call_operand.vmem [shape: bf16[2,32,96], index: 2, kind: input, shape index: {}]   ;;  %s8942_s3 = inlined_call_operand.vmem [shape: f32[2,1,96], index: 3, kind: input, shape index: {}]   ;;  %s8943_s4 = inlined_call_operand.vmem [shape: bf16[2,32,32], index: 4, kind: input, shape index: {}]   ;;  %s8944_s5 = inlined_call_operand.vmem [shape: bf16[2,32,64], index: 5, kind: input, shape index: {}]   ;;  %s8945_s6 = inlined_call_operand.vmem [shape: f32[2,1,64], index: 6, kind: input, shape index: {}]   ;;  %s8946_s7 = inlined_call_operand.vmem [shape: bf16[2,64,32], index: 7, kind: input, shape index: {}]   ;;  %s8947_s8 = inlined_call_operand.vmem [shape: f32[2,32], index: 8, kind: input, shape index: {}]   ;;  %s8948_s9 = inlined_call_operand.vmem [shape: f32[2,24,32], index: 9, kind: output, shape index: {}]  }
   0x1   :  { %8954 = sst [smem:[#allocation2_spill]] %s8940_s1  ;;  %s7027_s11 = smov 0  }
   0x2   :  { %8955 = sst [smem:[#allocation3_spill]] %s8941_s2 }
   0x3 LB: > { %s28_s12 = sadd.s32 1, %s6955_s10  ;;  %p6265_p0 = scmp.ge.s32.totalorder %s6959_s11, 1  ;;  %s6959_s11 = sphi %s7027_s11, %s19_s11   ;;  %s6955_s10 = sphi %s7025_s10, %s8967_s10   ;;  %s6951_s30 = sphi %s7023_s30, %s8966_s30  }
   0x4   : > { %p29_p1 = scmp.ge.s32.totalorder %s28_s12, 2  ;;  %p366_p2 = scmp.lt.s32.totalorder %s6959_s11, 3 }
   0x6   : > { %s8969_s12 = smov (%p29_p1, %s28_s12), 0  ;;  %p367_p3 = pnand %p6265_p0, %p366_p2 }
   0x7   : > { %p441_p4 = scmp.lt.s32.totalorder (!%p367_p3), %s6951_s30, 1  ;;  %s8956_s1 = sld [smem:[#allocation2_spill]] (!%p367_p3) }
   0x8   : > { %370 = sbr.rel (%p367_p3) target bundleno = 3047 (0xbe7), region = 56  ;;  %s8957_s2 = sld [smem:[#allocation3_spill]] (!%p367_p3) }
   0x9   : > { %p6275_p5 = scmp.ne.s32.totalorder (!%p367_p3), %s6951_s30, 0 }
   0xd   : > { %s7045_s13 = scalar_select %p441_p4, %s6951_s30, 1 }
   0xf   : > { %s6266_s14 = sshll.u32 %s7045_s13, 3  ;;  %s6385_s15 = sshll.u32 %s7045_s13, 4 }
  0x10   : > { %s7052_s18 = scalar_lea.vmem %s8956_s1, %s6266_s14  ;;  %s7057_s21 = scalar_lea.vmem %s8957_s2, %s6385_s15 }
  0x11   : > { %s452_s24 = scalar_lea.vmem %s8942_s3, %s7045_s13  ;;  %s7066_s27 = scalar_lea.vmem %s8943_s4, %s6385_s15 }
  0x12   : > { %s7071_s16 = scalar_lea.vmem %s8944_s5, %s6385_s15  ;;  %s6388_s20 = sshll.u32 %s7045_s13, 5 }
  0x13   : > { %s7081_s22 = scalar_lea.vmem %s8946_s7, %s6388_s20  ;;  %482 = sbr.rel (%p6275_p5) target bundleno = 28 (0x1c), region = 60 }
  0x18   : > { %v483_v0 = vld [vmem:[%s8939_s0] sm:$0xff]  ;;  %vm489_vm0 = vcmask 261120   ;;  %v484_v1 = vld [vmem:[%s8939_s0 + $0x8] sm:$0xff]  ;;  %v485_v2 = vld [vmem:[%s8939_s0 + $0x10] sm:$0xff] }
  0x19   : > { %490 = vst.msk [vmem:[%s8948_s9] sm:$0xff] %vm489_vm0, %v483_v0  ;;  %491 = vst.msk [vmem:[%s8948_s9 + $0x8] sm:$0xff] %vm489_vm0, %v484_v1  ;;  %v486_v3 = vld [vmem:[%s8939_s0 + $0x18] sm:$0xff]  ;;  %v487_v4 = vld [vmem:[%s8939_s0 + $0x20] sm:$0xff] }
  0x1a   : > { %492 = vst.msk [vmem:[%s8948_s9 + $0x10] sm:$0xff] %vm489_vm0, %v485_v2  ;;  %v488_v5 = vld [vmem:[%s8939_s0 + $0x28] sm:$0xff]  ;;  %493 = vst.msk [vmem:[%s8948_s9 + $0x18] sm:$0xff] %vm489_vm0, %v486_v3 }
  0x1b   : > { %494 = vst.msk [vmem:[%s8948_s9 + $0x20] sm:$0xff] %vm489_vm0, %v487_v4  ;;  %495 = vst.msk [vmem:[%s8948_s9 + $0x28] sm:$0xff] %vm489_vm0, %v488_v5 }
  0x1c PF: > { %vm503_vm1 = vcmask 261120   ;;  %v6776_v48 = vld [vmem:[%s7057_s21 + $0x8] sm:$0xff]   ;;  %v8951_v49 = vmov 0.0   ;;  %vm6962_vm2 = vmmov 0   ;;  %v6777_v50 = vld [vmem:[%s7057_s21] sm:$0xff]   ;;  %v8953_v60 = vlaneseq  ;;  %s6963_s25 = smov 120  }
  0x1d   : > { %6475 = vmatprep.subr.bf16.mxu1 %v8951_v49  ;;  %6479 = vmatprep.mubr.msk.bf16.mxu1 %vm6962_vm2, %v8951_v49  ;;  %s6965_s15 = smov 104   ;;  %s6966_s26 = smov 96   ;;  %vm3395_vm3 = vcmask 64512   ;;  %vm4216_vm4 = vcmask 1043456   ;;  %vm3929_vm6 = vcmask 195584   ;;  %vm5561_vm7 = vcmask 130048  }
  0x1e   : > { %6476 = vmatpush3.bf16.msra.mxu1 %v6776_v48  ;;  %v7181_v2 = vshrl.u32 %v8953_v60, 7  ;;  %s6969_s28 = smov 64   ;;  %s6971_s29 = smov 8   ;;  %vm5928_vm8 = vcmask 523264  }
  0x1f   : > { %6477 = vmatprep.subr.bf16.mxu1 %v8951_v49  ;;  %s6972_s14 = smov 24   ;;  %p6380_p6 = scmp.ne.s32.totalorder %s6951_s30, 1 }
  0x20   : > { %v496_v6 = vld [vmem:[%s8948_s9] sm:$0xff]  ;;  %v497_v8 = vld [vmem:[%s8948_s9 + $0x8] sm:$0xff] }
  0x21   : > { %v498_v7 = vld [vmem:[%s8948_s9 + $0x10] sm:$0xff]  ;;  %v504_v9 = vsel %vm503_vm1, %v496_v6, 0.0  ;;  %v499_v11 = vld [vmem:[%s8948_s9 + $0x18] sm:$0xff]  ;;  %v507_v14 = vsel %vm503_vm1, %v497_v8, 0.0 }
  0x22   : > { %v510_v10 = vsel %vm503_vm1, %v498_v7, 0.0  ;;  %v500_v12 = vld [vmem:[%s8948_s9 + $0x20] sm:$0xff]  ;;  %v501_v13 = vld [vmem:[%s8948_s9 + $0x28] sm:$0xff]  ;;  %505 = vadd.xlane.f32.xlu0 %v504_v9  ;;  %v513_v15 = vsel %vm503_vm1, %v499_v11, 0.0  ;;  %6478 = vmatpush3.bf16.msra.mxu1 %v6777_v50 }
  0x23   : > { %511 = vadd.xlane.f32.xlu1 %v510_v10  ;;  %v516_v16 = vsel %vm503_vm1, %v500_v12, 0.0  ;;  %v519_v17 = vsel %vm503_vm1, %v501_v13, 0.0 }
  0x26   : > { %508 = vadd.xlane.f32.xlu0 %v507_v14 }
  0x27   : > { %514 = vadd.xlane.f32.xlu1 %v513_v15 }
  0x2a   : > { %517 = vadd.xlane.f32.xlu0 %v516_v16 }
  0x2b   : > { %520 = vadd.xlane.f32.xlu1 %v519_v17 }
  0xab   : > { %v506_v18 = vpop.xlane.xlu0 %505 }
  0xac   : > { %v512_v19 = vpop.xlane.xlu1 %511  ;;  %v523_v20 = vmul.f32 0.03125, %v506_v18 }
  0xad   : > { %v525_v21 = vmul.f32 0.03125, %v512_v19 }
  0xae   : > { %v7144_v22 = vsub.f32 %v496_v6, %v523_v20 }
  0xaf   : > { %v7146_v23 = vsub.f32 %v498_v7, %v525_v21  ;;  %v509_v24 = vpop.xlane.xlu0 %508  ;;  %v8950_v7 = vsub.s32 0, %v7181_v2 }
  0xb0   : > { %v515_v25 = vpop.xlane.xlu1 %514  ;;  %v524_v26 = vmul.f32 0.03125, %v509_v24  ;;  %v535_v28 = vmul.f32 %v7144_v22, %v7144_v22 }
  0xb1   : > { %v526_v27 = vmul.f32 0.03125, %v515_v25  ;;  %v537_v29 = vmul.f32 %v7146_v23, %v7146_v23 }
  0xb2   : > { %v7152_v30 = vsub.f32 %v497_v8, %v524_v26  ;;  %v541_v32 = vsel %vm503_vm1, %v535_v28, 0.0  ;;  %v502_v8 = vld [vmem:[%s7052_s18] sm:$0x3f] }
  0xb3   : > { %v7154_v31 = vsub.f32 %v499_v11, %v526_v27  ;;  %542 = vadd.xlane.f32.xlu0 %v541_v32  ;;  %v518_v33 = vpop.xlane.xlu0 %517  ;;  %v547_v35 = vsel %vm503_vm1, %v537_v29, 0.0  ;;  %v586_v11 = vrot.slane %v502_v8, %v8950_v7 }
  0xb4   : > { %v521_v34 = vpop.xlane.xlu1 %520  ;;  %v527_v36 = vmul.f32 0.03125, %v518_v33  ;;  %v536_v38 = vmul.f32 %v7152_v30, %v7152_v30 }
  0xb5   : > { %v528_v37 = vmul.f32 0.03125, %v521_v34  ;;  %v538_v39 = vmul.f32 %v7154_v31, %v7154_v31 }
  0xb6   : > { %v7162_v40 = vsub.f32 %v500_v12, %v527_v36  ;;  %v544_v42 = vsel %vm503_vm1, %v536_v38, 0.0  ;;  %v8949_v12 = vsub.s32 1, %v7181_v2 }
  0xb7   : > { %v7164_v41 = vsub.f32 %v501_v13, %v528_v37  ;;  %548 = vadd.xlane.f32.xlu0 %v547_v35  ;;  %545 = vadd.xlane.f32.xlu1 %v544_v42  ;;  %v550_v43 = vsel %vm503_vm1, %v538_v39, 0.0  ;;  %v6276_v39 = vld [vmem:[%s452_s24] ss:$0 sm:$0xff]  ;;  %s6964_s24 = smov 112  }
  0xb8   : > { %v539_v44 = vmul.f32 %v7162_v40, %v7162_v40  ;;  %v596_v16 = vrot.slane %v502_v8, %v8949_v12 }
  0xb9   : > { %v540_v45 = vmul.f32 %v7164_v41, %v7164_v41 }
  0xba   : > { %v553_v46 = vsel %vm503_vm1, %v539_v44, 0.0 }
  0xbb   : > { %551 = vadd.xlane.f32.xlu1 %v550_v43  ;;  %554 = vadd.xlane.f32.xlu0 %v553_v46  ;;  %v556_v47 = vsel %vm503_vm1, %v540_v45, 0.0 }
  0xbf   : > { %557 = vadd.xlane.f32.xlu1 %v556_v47 }
 0x13c   : > { %v543_v51 = vpop.xlane.xlu0 %542 }
 0x13d   : > { %v559_v52 = vmul.f32 0.03125, %v543_v51 }
 0x13f   : > { %v565_v53 = vadd.f32 1e-06, %v559_v52 }
 0x140   : > { %v546_v54 = vpop.xlane.xlu1 %545  ;;  %v549_v55 = vpop.xlane.xlu0 %548 }
 0x141   : > { %6786 = vrsqrt.f32 %v565_v53  ;;  %v560_v56 = vmul.f32 0.03125, %v546_v54  ;;  %v561_v57 = vmul.f32 0.03125, %v549_v55 }
 0x143   : > { %v566_v58 = vadd.f32 1e-06, %v560_v56  ;;  %v567_v59 = vadd.f32 1e-06, %v561_v57 }
 0x144   : > { %v552_v61 = vpop.xlane.xlu1 %551  ;;  %v555_v62 = vpop.xlane.xlu0 %554 }
 0x145   : > { %6788 = vrsqrt.f32 %v566_v58  ;;  %v562_v63 = vmul.f32 0.03125, %v552_v61  ;;  %v563_v1 = vmul.f32 0.03125, %v555_v62 }
 0x146   : > { %6790 = vrsqrt.f32 %v567_v59 }
 0x147   : > { %v568_v0 = vadd.f32 1e-06, %v562_v63  ;;  %v569_v5 = vadd.f32 1e-06, %v563_v1 }
 0x148   : > { %v558_v3 = vpop.xlane.xlu1 %557 }
 0x149   : > { %6792 = vrsqrt.f32 %v568_v0  ;;  %v564_v4 = vmul.f32 0.03125, %v558_v3  ;;  %v6967_v0 = vmov 1983009808  }
 0x14a   : > { %v758_v1 = vunpack.c.l.s4 %v6967_v0 }
 0x14b   : > { %v570_v6 = vadd.f32 1e-06, %v564_v4 }
 0x14d   : > { %6794 = vrsqrt.f32 %v570_v6 }
 0x14e   : > { %v6787_v9 = vpop.eup %6786  ;;  %6796 = vrsqrt.f32 %v569_v5  ;;  %v759_v5 = vunpack.c.0.s8 %v758_v1 }
 0x14f   : > { %v577_v10 = vmul.f32 %v6787_v9, %v7144_v22 }
 0x150   : > { %v7277_v9 = vsub.s32 %v759_v5, %v7181_v2 }
 0x151   : > { %v587_v15 = vmul.f32 %v586_v11, %v577_v10  ;;  %v6968_v10 = vmov 1934713408  }
 0x152   : > { %v6789_v13 = vpop.eup %6788 }
 0x153   : > { %v578_v14 = vmul.f32 %v6789_v13, %v7152_v30  ;;  %v6791_v17 = vpop.eup %6790  ;;  %v597_v20 = vadd.f32 %v596_v16, %v587_v15 }
 0x154   : > { %v579_v24 = vmul.f32 %v6791_v17, %v7146_v23 }
 0x155   : > { %v588_v18 = vmul.f32 %v586_v11, %v578_v14 }
 0x156   : > { %v6793_v19 = vpop.eup %6792  ;;  %v589_v28 = vmul.f32 %v586_v11, %v579_v24 }
 0x157   : > { %v598_v21 = vadd.f32 %v596_v16, %v588_v18  ;;  %v580_v22 = vmul.f32 %v6793_v19, %v7154_v31 }
 0x158   : > { %v599_v33 = vadd.f32 %v596_v16, %v589_v28 }
 0x159   : > { %v603_v25 = vpack.c.bf16 %v598_v21, %v597_v20  ;;  %v590_v26 = vmul.f32 %v586_v11, %v580_v22 }
 0x15a   : > { %v6795_v27 = vpop.eup %6794 }
 0x15b   : > { %6480 = vmatmul.mubr.msk.bf16.vlgmr.msra.gmra.mxu1 %vm503_vm1, %v603_v25  ;;  %v6797_v29 = vpop.eup %6796  ;;  %v600_v30 = vadd.f32 %v596_v16, %v590_v26  ;;  %v582_v32 = vmul.f32 %v6795_v27, %v7164_v41 }
 0x15c   : > { %6483 = vmatprep.mubr.msk.bf16.mxu1 %vm6962_vm2, %v8951_v49  ;;  %v581_v34 = vmul.f32 %v6797_v29, %v7162_v40 }
 0x15d   : > { %v604_v23 = vpack.c.bf16 %v600_v30, %v599_v33  ;;  %v592_v35 = vmul.f32 %v586_v11, %v582_v32 }
 0x15e   : > { %v591_v31 = vmul.f32 %v586_v11, %v581_v34  ;;  %v790_v11 = vunpack.c.l.s4 %v6968_v10 }
 0x15f   : > { %v602_v36 = vadd.f32 %v596_v16, %v592_v35 }
 0x160   : > { %v601_v37 = vadd.f32 %v596_v16, %v591_v31  ;;  %v791_v20 = vunpack.c.0.s8 %v790_v11 }
 0x162   : > { %v605_v38 = vpack.c.bf16 %v602_v36, %v601_v37  ;;  %v7314_v34 = vsub.s32 %v791_v20, %v7181_v2 }
 0x163   : > { %6484 = vmatmul.mubr.msk.bf16.gmra.mxu1 %vm503_vm1, %v604_v23 }
 0x164   : > { %6487 = vmatprep.mubr.msk.bf16.mxu1 %vm6962_vm2, %v8951_v49 }
 0x16b   : > { %6488 = vmatmul.mubr.msk.bf16.gmra.mxu1 %vm503_vm1, %v605_v38 }
 0x21b   : > { %v672_v41 = vpop.f32.mrf.mxu1 }
 0x21c   : > { %v7208_v40 = vadd.f32 %v6276_v39, %v672_v41 }
 0x21d   : > { %v6481_v42 = vpop.f32.mrf.mxu1 }
 0x21e   : > { %701 = vrot.lane.b32.xlu1 %v7208_v40, %s6963_s25 }
 0x21f   : > { %v675_v43 = vpop.f32.mrf.mxu1 }
 0x220   : > { %v7212_v44 = vadd.f32 %v6276_v39, %v675_v43 }
 0x221   : > { %v6482_v45 = vpop.f32.mrf.mxu1 }
 0x222   : > { %703 = vrot.lane.b32.xlu0 %v7212_v44, %s6963_s25 }
 0x223   : > { %v680_v46 = vpop.f32.mrf.mxu1 }
 0x224   : > { %v7216_v47 = vadd.f32 %v6276_v39, %v680_v46 }
 0x225   : > { %v6485_v48 = vpop.f32.mrf.mxu1 }
 0x226   : > { %723 = vrot.lane.b32.xlu1 %v7216_v47, %s6964_s24  ;;  %705 = vrot.lane.b32.xlu0 %v7216_v47, %s6963_s25 }
 0x227   : > { %v683_v50 = vpop.f32.mrf.mxu1 }
 0x228   : > { %v7225_v55 = vadd.f32 %v6276_v39, %v683_v50 }
 0x229   : > { %v6486_v51 = vpop.f32.mrf.mxu1 }
 0x22a   : > { %741 = vrot.lane.b32.xlu1 %v7216_v47, %s6965_s15  ;;  %721 = vrot.lane.b32.xlu0 %v7212_v44, %s6964_s24 }
 0x22b   : > { %v688_v52 = vpop.f32.mrf.mxu1 }
 0x22c   : > { %v7230_v57 = vadd.f32 %v6276_v39, %v688_v52 }
 0x22d   : > { %v6489_v53 = vpop.f32.mrf.mxu1 }
 0x22e   : > { %719 = vrot.lane.b32.xlu1 %v7208_v40, %s6964_s24  ;;  %739 = vrot.lane.b32.xlu0 %v7212_v44, %s6965_s15 }
 0x22f   : > { %v691_v54 = vpop.f32.mrf.mxu1 }
 0x230   : > { %v7232_v58 = vadd.f32 %v6276_v39, %v691_v54 }
 0x231   : > { %v6490_v56 = vpop.f32.mrf.mxu1 }
 0x232   : > { %737 = vrot.lane.b32.xlu1 %v7208_v40, %s6965_s15  ;;  %707 = vrot.lane.b32.xlu0 %v7225_v55, %s6963_s25 }
 0x236   : > { %709 = vrot.lane.b32.xlu1 %v7230_v57, %s6963_s25  ;;  %729 = vrot.lane.b32.xlu0 %v7232_v58, %s6964_s24 }
 0x23a   : > { %725 = vrot.lane.b32.xlu0 %v7225_v55, %s6964_s24  ;;  %711 = vrot.lane.b32.xlu1 %v7232_v58, %s6963_s25 }
 0x23e   : > { %743 = vrot.lane.b32.xlu0 %v7225_v55, %s6965_s15  ;;  %747 = vrot.lane.b32.xlu1 %v7232_v58, %s6965_s15 }
 0x242   : > { %1591 = vrot.lane.b32.xlu0 %v7216_v47, %s6966_s26  ;;  %727 = vrot.lane.b32.xlu1 %v7230_v57, %s6964_s24 }
 0x246   : > { %1587 = vrot.lane.b32.xlu0 %v7208_v40, %s6966_s26  ;;  %745 = vrot.lane.b32.xlu1 %v7230_v57, %s6965_s15 }
 0x24a   : > { %1589 = vrot.lane.b32.xlu1 %v7212_v44, %s6966_s26 }
 0x290   : > { %v7250_v59 = vpop.permute.xlu1 %701 }
 0x291   : > { %1599 = vrot.lane.b32.xlu0 %v7250_v59, %s6966_s26 }
 0x294   : > { %v7254_v61 = vpop.permute.xlu0 %703 }
 0x295   : > { %1601 = vrot.lane.b32.xlu1 %v7254_v61, %s6966_s26 }
 0x298   : > { %v7258_v62 = vpop.permute.xlu1 %723  ;;  %v7260_v63 = vpop.permute.xlu0 %705 }
 0x299   : > { %1615 = vrot.lane.b32.xlu0 %v7258_v62, %s6966_s26  ;;  %1603 = vrot.lane.b32.xlu1 %v7260_v63, %s6966_s26 }
 0x29c   : > { %v7266_v3 = vpop.permute.xlu1 %741  ;;  %v7268_v4 = vpop.permute.xlu0 %721 }
 0x29d   : > { %1627 = vrot.lane.b32.xlu1 %v7266_v3, %s6966_s26  ;;  %v823_v13 = vcombine.low %v7212_v44, %v7268_v4  ;;  %v824_v14 = vcombine.high %v7212_v44, %v7268_v4 }
 0x29f   : > { %v831_v21 = vrot.slane %v823_v13, %v7277_v9  ;;  %v838_v24 = vrot.slane %v824_v14, %v7277_v9 }
 0x2a0   : > { %v7272_v6 = vpop.permute.xlu1 %719  ;;  %v7274_v8 = vpop.permute.xlu0 %739 }
 0x2a1   : > { %1611 = vrot.lane.b32.xlu0 %v7272_v6, %s6966_s26  ;;  %v839_v15 = vcombine.low %v7254_v61, %v7274_v8  ;;  %v840_v16 = vcombine.high %v7254_v61, %v7274_v8  ;;  %1613 = vrot.lane.b32.xlu1 %v7268_v4, %s6966_s26  ;;  %v755_v22 = vcombine.low %v7208_v40, %v7272_v6 }
 0x2a2   : > { %v756_v25 = vcombine.high %v7208_v40, %v7272_v6 }
 0x2a3   : > { %v847_v17 = vrot.slane %v839_v15, %v7277_v9  ;;  %v854_v18 = vrot.slane %v840_v16, %v7277_v9  ;;  %v763_v35 = vrot.slane %v755_v22, %v7277_v9 }
 0x2a4   : > { %v7293_v19 = vpop.permute.xlu1 %737  ;;  %v7316_v23 = vpop.permute.xlu0 %707  ;;  %v770_v31 = vrot.slane %v756_v25, %v7277_v9 }
 0x2a5   : > { %1623 = vrot.lane.b32.xlu0 %v7293_v19, %s6966_s26  ;;  %1625 = vrot.lane.b32.xlu1 %v7274_v8, %s6966_s26  ;;  %v855_v26 = vcombine.low %v831_v21, %v847_v17  ;;  %v856_v27 = vcombine.high %v831_v21, %v847_v17  ;;  %v871_v28 = vcombine.low %v838_v24, %v854_v18 }
 0x2a6   : > { %v872_v29 = vcombine.high %v838_v24, %v854_v18  ;;  %v771_v32 = vcombine.low %v7250_v59, %v7293_v19  ;;  %v772_v33 = vcombine.high %v7250_v59, %v7293_v19 }
 0x2a7   : > { %v863_v38 = vrot.slane %v855_v26, %v7314_v34  ;;  %v870_v39 = vrot.slane %v856_v27, %v7314_v34  ;;  %v879_v41 = vrot.slane %v871_v28, %v7314_v34 }
 0x2a8   : > { %v7305_v30 = vpop.permute.xlu1 %709  ;;  %v779_v36 = vrot.slane %v771_v32, %v7277_v9  ;;  %v786_v37 = vrot.slane %v772_v33, %v7277_v9  ;;  %v886_v42 = vrot.slane %v872_v29, %v7314_v34  ;;  %v7338_v10 = vpop.permute.xlu0 %729 }
 0x2a9   : > { %1597 = vrot.lane.b32.xlu0 %v7232_v58, %s6966_s26  ;;  %1595 = vrot.lane.b32.xlu1 %v7230_v57, %s6966_s26  ;;  %v1231_v56 = vcombine.low %v863_v38, %v870_v39  ;;  %v6284_v0 = vcombine.high %v863_v38, %v870_v39 }
 0x2aa   : > { %v787_v45 = vcombine.low %v763_v35, %v779_v36  ;;  %v788_v46 = vcombine.high %v763_v35, %v779_v36  ;;  %v803_v48 = vcombine.low %v770_v31, %v786_v37  ;;  %v804_v50 = vcombine.high %v770_v31, %v786_v37 }
 0x2ab   : > { %v1247_v1 = vcombine.low %v879_v41, %v886_v42  ;;  %v6285_v5 = vcombine.high %v879_v41, %v886_v42  ;;  %v1238_v17 = vrot.slane %v1231_v56, %v7277_v9  ;;  %v1246_v18 = vrot.slane %v6284_v0, %v7277_v9 }
 0x2ac   : > { %v7328_v43 = vpop.permute.xlu1 %711  ;;  %v795_v51 = vrot.slane %v787_v45, %v7314_v34  ;;  %v802_v52 = vrot.slane %v788_v46, %v7314_v34  ;;  %v811_v53 = vrot.slane %v803_v48, %v7314_v34  ;;  %v818_v54 = vrot.slane %v804_v50, %v7314_v34  ;;  %v7356_v27 = vpop.permute.xlu0 %725 }
 0x2ad   : > { %1593 = vrot.lane.b32.xlu0 %v7225_v55, %s6966_s26  ;;  %1607 = vrot.lane.b32.xlu1 %v7305_v30, %s6966_s26  ;;  %v1254_v20 = vrot.slane %v1247_v1, %v7277_v9  ;;  %v1262_v21 = vrot.slane %v6285_v5, %v7277_v9  ;;  %v1263_v33 = vcombine.low %v1238_v17, %v1246_v18 }
 0x2ae   : > { %v1163_v11 = vcombine.low %v795_v51, %v802_v52  ;;  %v6282_v13 = vcombine.high %v795_v51, %v802_v52  ;;  %v1179_v14 = vcombine.low %v811_v53, %v818_v54  ;;  %v6283_v15 = vcombine.high %v811_v53, %v818_v54 }
 0x2af   : > { %v1279_v35 = vcombine.low %v1254_v20, %v1262_v21  ;;  %v1271_v39 = vrot.slane %v1263_v33, %v7314_v34  ;;  %v1264_v56 = vcombine.high %v1238_v17, %v1246_v18  ;;  %v1280_v0 = vcombine.high %v1254_v20, %v1262_v21 }
 0x2b0   : > { %v7340_v16 = vpop.permute.xlu1 %747  ;;  %v1170_v24 = vrot.slane %v1163_v11, %v7277_v9  ;;  %v1178_v22 = vrot.slane %v6282_v13, %v7277_v9  ;;  %v1186_v25 = vrot.slane %v1179_v14, %v7277_v9  ;;  %v1194_v26 = vrot.slane %v6283_v15, %v7277_v9  ;;  %v7366_v31 = vpop.permute.xlu0 %743 }
 0x2b1   : > { %1605 = vrot.lane.b32.xlu0 %v7316_v23, %s6966_s26  ;;  %1609 = vrot.lane.b32.xlu1 %v7328_v43, %s6966_s26  ;;  %v1287_v41 = vrot.slane %v1279_v35, %v7314_v34  ;;  %v1278_v5 = vrot.slane %v1264_v56, %v7314_v34  ;;  %v1294_v11 = vrot.slane %v1280_v0, %v7314_v34 }
 0x2b2   : > { %v1195_v29 = vcombine.low %v1170_v24, %v1178_v22  ;;  %v1211_v32 = vcombine.low %v1186_v25, %v1194_v26  ;;  %v1196_v52 = vcombine.high %v1170_v24, %v1178_v22  ;;  %v1212_v54 = vcombine.high %v1186_v25, %v1194_v26 }
 0x2b3   : > { %v1295_v45 = vcombine.low %v1271_v39, %v1287_v41  ;;  %v1296_v48 = vcombine.high %v1271_v39, %v1287_v41  ;;  %v1297_v14 = vcombine.low %v1278_v5, %v1294_v11  ;;  %v1298_v15 = vcombine.high %v1278_v5, %v1294_v11 }
 0x2b4   : > { %v7360_v28 = vpop.permute.xlu1 %727  ;;  %v1203_v37 = vrot.slane %v1195_v29, %v7314_v34  ;;  %v1219_v38 = vrot.slane %v1211_v32, %v7314_v34  ;;  %v1210_v53 = vrot.slane %v1196_v52, %v7314_v34  ;;  %v1226_v1 = vrot.slane %v1212_v54, %v7314_v34 }
 0x2b5   : > { %1621 = vrot.lane.b32.xlu0 %v7338_v10, %s6966_s26  ;;  %1633 = vrot.lane.b32.xlu1 %v7340_v16, %s6966_s26  ;;  %v975_v32 = vcombine.low %v7316_v23, %v7366_v31  ;;  %v976_v33 = vcombine.high %v7316_v23, %v7366_v31  ;;  %v1111_v35 = vcombine.low %v7328_v43, %v7340_v16 }
 0x2b6   : > { %v1227_v42 = vcombine.low %v1203_v37, %v1219_v38  ;;  %v1228_v46 = vcombine.high %v1203_v37, %v1219_v38  ;;  %v1229_v13 = vcombine.low %v1210_v53, %v1226_v1  ;;  %v1112_v37 = vcombine.high %v7328_v43, %v7340_v16 }
 0x2b7   : > { %v1028_v38 = vcombine.high %v7230_v57, %v7360_v28  ;;  %v1095_v39 = vcombine.low %v7232_v58, %v7338_v10  ;;  %v959_v41 = vcombine.low %v7225_v55, %v7356_v27 }
 0x2b8   : > { %v7368_v36 = vpop.permute.xlu1 %745  ;;  %v1571_v50 = vpack.c.bf16 %v1295_v45, %v1227_v42  ;;  %v1573_v51 = vpack.c.bf16 %v1296_v48, %v1228_v46  ;;  %v7396_v17 = vpack.c.bf16 %v1297_v14, %v1229_v13  ;;  %v960_v42 = vcombine.high %v7225_v55, %v7356_v27 }
 0x2b9   : > { %1617 = vrot.lane.b32.xlu0 %v7356_v27, %s6966_s26  ;;  %1619 = vrot.lane.b32.xlu1 %v7360_v28, %s6966_s26  ;;  %v1043_v22 = vcombine.low %v7305_v30, %v7368_v36  ;;  %v1044_v25 = vcombine.high %v7305_v30, %v7368_v36  ;;  %v967_v54 = vrot.slane %v959_v41, %v7277_v9 }
 0x2ba   : > { %6495 = vmatprep.mubr.msk.bf16.mxu1 %vm3395_vm3, %v1571_v50  ;;  %6503 = vmatprep.mubr.msk.bf16.mxu0 %vm3395_vm3, %v1573_v51  ;;  %v983_v50 = vrot.slane %v975_v32, %v7277_v9  ;;  %v990_v51 = vrot.slane %v976_v33, %v7277_v9  ;;  %v974_v56 = vrot.slane %v960_v42, %v7277_v9 }
 0x2bb   : > { %v1058_v46 = vrot.slane %v1044_v25, %v7277_v9 }
 0x2bc   : > { %v991_v13 = vcombine.low %v967_v54, %v983_v50  ;;  %v992_v14 = vcombine.high %v967_v54, %v983_v50 }
 0x2bd   : > { %1629 = vrot.lane.b32.xlu0 %v7366_v31, %s6966_s26  ;;  %1631 = vrot.lane.b32.xlu1 %v7368_v36, %s6966_s26 }
 0x2c1   : > { %2507 = vrot.lane.b32.xlu0 %v7260_v63, %s6969_s28  ;;  %2495 = vrot.lane.b32.xlu1 %v7216_v47, %s6969_s28 }
 0x2c5   : > { %2493 = vrot.lane.b32.xlu0 %v7212_v44, %s6969_s28  ;;  %2519 = vrot.lane.b32.xlu1 %v7258_v62, %s6969_s28  ;;  %v1230_v44 = vcombine.high %v1210_v53, %v1226_v1 }
 0x2c7   : > { %v7398_v18 = vpack.c.bf16 %v1298_v15, %v1230_v44  ;;  %v1007_v44 = vcombine.low %v974_v56, %v990_v51  ;;  %v1008_v15 = vcombine.high %v974_v56, %v990_v51 }
 0x2c9   : > { %2505 = vrot.lane.b32.xlu0 %v7254_v61, %s6969_s28  ;;  %2531 = vrot.lane.b32.xlu1 %v7266_v3, %s6969_s28  ;;  %v891_v61 = vcombine.low %v7216_v47, %v7258_v62  ;;  %v1022_v25 = vrot.slane %v1008_v15, %v7314_v34 }
 0x2cd   : > { %2517 = vrot.lane.b32.xlu0 %v7268_v4, %s6969_s28  ;;  %2491 = vrot.lane.b32.xlu1 %v7208_v40, %s6969_s28  ;;  %v907_v40 = vcombine.low %v7260_v63, %v7266_v3  ;;  %v892_v4 = vcombine.high %v7216_v47, %v7258_v62 }
 0x2d1   : > { %2529 = vrot.lane.b32.xlu0 %v7274_v8, %s6969_s28  ;;  %2503 = vrot.lane.b32.xlu1 %v7250_v59, %s6969_s28  ;;  %v908_v59 = vcombine.high %v7260_v63, %v7266_v3  ;;  %v906_v63 = vrot.slane %v892_v4, %v7277_v9 }
 0x2d3   : > { %v922_v8 = vrot.slane %v908_v59, %v7277_v9 }
 0x2d5   : > { %2501 = vrot.lane.b32.xlu0 %v7232_v58, %s6969_s28  ;;  %2515 = vrot.lane.b32.xlu1 %v7272_v6, %s6969_s28  ;;  %v915_v6 = vrot.slane %v907_v40, %v7277_v9  ;;  %v939_v21 = vcombine.low %v906_v63, %v922_v8  ;;  %v940_v24 = vcombine.high %v906_v63, %v922_v8 }
 0x2d7   : > { %v947_v26 = vrot.slane %v939_v21, %v7314_v34  ;;  %v954_v29 = vrot.slane %v940_v24, %v7314_v34 }
 0x2d9   : > { %2497 = vrot.lane.b32.xlu0 %v7225_v55, %s6969_s28  ;;  %2527 = vrot.lane.b32.xlu1 %v7293_v19, %s6969_s28  ;;  %v899_v19 = vrot.slane %v891_v61, %v7277_v9  ;;  %v1315_v48 = vcombine.low %v947_v26, %v954_v29  ;;  %v1042_v55 = vrot.slane %v1028_v38, %v7277_v9 }
 0x2db   : > { %v923_v3 = vcombine.low %v899_v19, %v915_v6  ;;  %v924_v20 = vcombine.high %v899_v19, %v915_v6  ;;  %v1075_v5 = vcombine.low %v1042_v55, %v1058_v46  ;;  %v1076_v11 = vcombine.high %v1042_v55, %v1058_v46 }
 0x2dc   : > { %v1322_v19 = vrot.slane %v1315_v48, %v7277_v9 }
 0x2dd   : > { %2509 = vrot.lane.b32.xlu0 %v7316_v23, %s6969_s28  ;;  %2499 = vrot.lane.b32.xlu1 %v7230_v57, %s6969_s28  ;;  %v931_v47 = vrot.slane %v923_v3, %v7314_v34  ;;  %v938_v62 = vrot.slane %v924_v20, %v7314_v34  ;;  %v1096_v23 = vcombine.high %v7232_v58, %v7338_v10 }
 0x2de   : > { %v1119_v58 = vrot.slane %v1111_v35, %v7277_v9  ;;  %v1083_v21 = vrot.slane %v1075_v5, %v7314_v34  ;;  %v1090_v24 = vrot.slane %v1076_v11, %v7314_v34 }
 0x2df   : > { %v1299_v45 = vcombine.low %v931_v47, %v938_v62  ;;  %v1110_v53 = vrot.slane %v1096_v23, %v7277_v9 }
 0x2e0   : > { %v1451_v23 = vcombine.low %v1083_v21, %v1090_v24  ;;  %v6291_v41 = vcombine.high %v1083_v21, %v1090_v24 }
 0x2e1   : > { %2521 = vrot.lane.b32.xlu0 %v7356_v27, %s6969_s28  ;;  %2511 = vrot.lane.b32.xlu1 %v7305_v30, %s6969_s28  ;;  %v1027_v30 = vcombine.low %v7230_v57, %v7360_v28  ;;  %v6287_v57 = vcombine.high %v947_v26, %v954_v29  ;;  %v1103_v27 = vrot.slane %v1095_v39, %v7277_v9 }
 0x2e2   : > { %v1306_v6 = vrot.slane %v1299_v45, %v7277_v9  ;;  %v1466_v54 = vrot.slane %v6291_v41, %v7277_v9 }
 0x2e3   : > { %v1035_v52 = vrot.slane %v1027_v30, %v7277_v9  ;;  %v1127_v40 = vcombine.low %v1103_v27, %v1119_v58  ;;  %v1128_v59 = vcombine.high %v1103_v27, %v1119_v58  ;;  %v1330_v63 = vrot.slane %v6287_v57, %v7277_v9  ;;  %v7498_v30 = vpop.permute.xlu0 %1591 }
 0x2e5   : > { %2513 = vrot.lane.b32.xlu1 %v7328_v43, %s6969_s28  ;;  %v6286_v43 = vcombine.high %v931_v47, %v938_v62  ;;  %v999_v47 = vrot.slane %v991_v13, %v7314_v34  ;;  %v1006_v62 = vrot.slane %v992_v14, %v7314_v34  ;;  %v1135_v26 = vrot.slane %v1127_v40, %v7314_v34  ;;  %v7512_v13 = vpop.permute.xlu1 %1589 }
 0x2e6   : > { %v1142_v29 = vrot.slane %v1128_v59, %v7314_v34 }
 0x2e7   : > { %v1314_v8 = vrot.slane %v6286_v43, %v7277_v9  ;;  %v1367_v42 = vcombine.low %v999_v47, %v1006_v62  ;;  %v6288_v45 = vcombine.high %v999_v47, %v1006_v62  ;;  %v7510_v11 = vpop.permute.xlu0 %1587 }
 0x2e8   : > { %v1503_v46 = vcombine.low %v1135_v26, %v1142_v29  ;;  %v6292_v48 = vcombine.high %v1135_v26, %v1142_v29 }
 0x2e9   : > { %2525 = vrot.lane.b32.xlu1 %v7338_v10, %s6969_s28  ;;  %v1126_v10 = vrot.slane %v1112_v37, %v7277_v9  ;;  %v1331_v35 = vcombine.low %v1306_v6, %v1314_v8  ;;  %v1347_v37 = vcombine.low %v1322_v19, %v1330_v63  ;;  %v1374_v56 = vrot.slane %v1367_v42, %v7277_v9 }
 0x2ea   : > { %v1510_v14 = vrot.slane %v1503_v46, %v7277_v9 }
 0x2eb   : > { %v1143_v61 = vcombine.low %v1110_v53, %v1126_v10  ;;  %v1144_v4 = vcombine.high %v1110_v53, %v1126_v10  ;;  %v1339_v51 = vrot.slane %v1331_v35, %v7314_v34  ;;  %v1355_v58 = vrot.slane %v1347_v37, %v7314_v34 }
 0x2ec   : > { %v1332_v10 = vcombine.high %v1306_v6, %v1314_v8  ;;  %v1458_v53 = vrot.slane %v1451_v23, %v7277_v9 }
 0x2ed   : > { %2537 = vrot.lane.b32.xlu1 %v7340_v16, %s6969_s28  ;;  %v1051_v16 = vrot.slane %v1043_v22, %v7277_v9  ;;  %v1015_v22 = vrot.slane %v1007_v44, %v7314_v34  ;;  %v1151_v32 = vrot.slane %v1143_v61, %v7314_v34  ;;  %v1158_v33 = vrot.slane %v1144_v4, %v7314_v34 }
 0x2ee   : > { %v1518_v44 = vrot.slane %v6292_v48, %v7277_v9  ;;  %v1346_v59 = vrot.slane %v1332_v10, %v7314_v34  ;;  %v1483_v6 = vcombine.low %v1458_v53, %v1466_v54  ;;  %v7520_v8 = vcombine.low %v1339_v51, %v1355_v58 }
 0x2ef   : > { %v1059_v0 = vcombine.low %v1035_v52, %v1051_v16  ;;  %v1060_v1 = vcombine.high %v1035_v52, %v1051_v16  ;;  %v1383_v43 = vcombine.low %v1015_v22, %v1022_v25  ;;  %v6289_v16 = vcombine.high %v1015_v22, %v1022_v25 }
 0x2f0   : > { %v1519_v57 = vcombine.low %v1151_v32, %v1158_v33  ;;  %v6293_v50 = vcombine.high %v1151_v32, %v1158_v33  ;;  %v1348_v52 = vcombine.high %v1322_v19, %v1330_v63  ;;  %v7522_v19 = vcombine.high %v1339_v51, %v1355_v58 }
 0x2f1   : > { %v1067_v3 = vrot.slane %v1059_v0, %v7314_v34  ;;  %v1074_v20 = vrot.slane %v1060_v1, %v7314_v34  ;;  %v1382_v0 = vrot.slane %v6288_v45, %v7277_v9  ;;  %v1390_v1 = vrot.slane %v1383_v43, %v7277_v9 }
 0x2f2   : > { %v1398_v5 = vrot.slane %v6289_v16, %v7277_v9  ;;  %v1526_v15 = vrot.slane %v1519_v57, %v7277_v9  ;;  %v1534_v40 = vrot.slane %v6293_v50, %v7277_v9  ;;  %v1362_v61 = vrot.slane %v1348_v52, %v7314_v34 }
 0x2f3   : > { %v1435_v38 = vcombine.low %v1067_v3, %v1074_v20  ;;  %v6290_v39 = vcombine.high %v1067_v3, %v1074_v20  ;;  %v1399_v63 = vcombine.low %v1374_v56, %v1382_v0  ;;  %v1535_v24 = vcombine.low %v1510_v14, %v1518_v44 }
 0x2f4   : > { %v1415_v3 = vcombine.low %v1390_v1, %v1398_v5  ;;  %v1551_v47 = vcombine.low %v1526_v15, %v1534_v40  ;;  %v1484_v22 = vcombine.high %v1458_v53, %v1466_v54  ;;  %v7528_v25 = vcombine.low %v1346_v59, %v1362_v61 }
 0x2f5   : > { %v1442_v55 = vrot.slane %v1435_v38, %v7277_v9  ;;  %v1450_v27 = vrot.slane %v6290_v39, %v7277_v9  ;;  %v1400_v26 = vcombine.high %v1374_v56, %v1382_v0  ;;  %v1416_v29 = vcombine.high %v1390_v1, %v1398_v5 }
 0x2f6   : > { %v1491_v33 = vrot.slane %v1483_v6, %v7314_v34  ;;  %v1536_v35 = vcombine.high %v1510_v14, %v1518_v44  ;;  %v1552_v37 = vcombine.high %v1526_v15, %v1534_v40  ;;  %v1572_v38 = vpack.c.bf16 %v7520_v8, %v7520_v8 }
 0x2f7   : > { %v1467_v4 = vcombine.low %v1442_v55, %v1450_v27  ;;  %v1468_v62 = vcombine.high %v1442_v55, %v1450_v27  ;;  %v1574_v39 = vpack.c.bf16 %v7522_v19, %v7522_v19  ;;  %v1407_v23 = vrot.slane %v1399_v63, %v7314_v34 }
 0x2f8   : > { %v1423_v41 = vrot.slane %v1415_v3, %v7314_v34  ;;  %v1543_v43 = vrot.slane %v1535_v24, %v7314_v34  ;;  %v1559_v16 = vrot.slane %v1551_v47, %v7314_v34  ;;  %v1498_v48 = vrot.slane %v1484_v22, %v7314_v34 }
 0x2f9   : > { %v1475_v32 = vrot.slane %v1467_v4, %v7314_v34  ;;  %v1482_v46 = vrot.slane %v1468_v62, %v7314_v34  ;;  %v1576_v57 = vpack.c.bf16 %v7528_v25, %v7528_v25  ;;  %v7544_v50 = vcombine.high %v1346_v59, %v1362_v61 }
 0x2fa   : > { %v1414_v51 = vrot.slane %v1400_v26, %v7314_v34  ;;  %v1430_v58 = vrot.slane %v1416_v29, %v7314_v34  ;;  %v1550_v55 = vrot.slane %v1536_v35, %v7314_v34  ;;  %v1566_v27 = vrot.slane %v1552_v37, %v7314_v34 }
 0x2fb   : > { %v1499_v10 = vcombine.low %v1475_v32, %v1491_v33  ;;  %v1500_v52 = vcombine.high %v1475_v32, %v1491_v33  ;;  %v1431_v56 = vcombine.low %v1407_v23, %v1423_v41  ;;  %v1432_v0 = vcombine.high %v1407_v23, %v1423_v41 }
 0x2fc   : > { %v7552_v5 = vcombine.low %v1543_v43, %v1559_v16  ;;  %v7554_v14 = vcombine.high %v1543_v43, %v1559_v16  ;;  %v1501_v44 = vcombine.low %v1482_v46, %v1498_v48  ;;  %v1502_v15 = vcombine.high %v1482_v46, %v1498_v48 }
 0x2fd   : > { %v1578_v61 = vpack.c.bf16 %v7544_v50, %v7544_v50  ;;  %v1433_v4 = vcombine.low %v1414_v51, %v1430_v58  ;;  %v7558_v6 = vpack.c.bf16 %v1499_v10, %v1431_v56  ;;  %v7560_v63 = vpack.c.bf16 %v1500_v52, %v1432_v0 }
 0x2fe   : > { %v7562_v3 = vcombine.low %v1550_v55, %v1566_v27  ;;  %v7580_v48 = vcombine.high %v1550_v55, %v1566_v27 }
 0x2ff   : > { %v7572_v33 = vpack.c.bf16 %v1501_v44, %v1433_v4 }
 0x303   : > { %v7524_v20 = vpop.permute.xlu0 %1599 }
 0x307   : > { %v7526_v21 = vpop.permute.xlu1 %1601 }
 0x30b   : > { %v1604_v42 = vpop.permute.xlu1 %1603  ;;  %v1616_v45 = vpop.permute.xlu0 %1615 }
 0x30c   : > { %v1795_v53 = vcombine.low %v7498_v30, %v1616_v45  ;;  %v1796_v54 = vcombine.high %v7498_v30, %v1616_v45  ;;  %v1434_v30 = vcombine.high %v1414_v51, %v1430_v58 }
 0x30e   : > { %v1803_v24 = vrot.slane %v1795_v53, %v7277_v9  ;;  %v1810_v47 = vrot.slane %v1796_v54, %v7277_v9  ;;  %v7574_v35 = vpack.c.bf16 %v1502_v15, %v1434_v30 }
 0x30f   : > { %v1628_v1 = vpop.permute.xlu1 %1627 }
 0x310   : > { %v1811_v40 = vcombine.low %v1604_v42, %v1628_v1  ;;  %v1812_v59 = vcombine.high %v1604_v42, %v1628_v1 }
 0x312   : > { %v1819_v62 = vrot.slane %v1811_v40, %v7277_v9  ;;  %v1826_v22 = vrot.slane %v1812_v59, %v7277_v9 }
 0x313   : > { %v1612_v26 = vpop.permute.xlu0 %1611  ;;  %v1614_v45 = vpop.permute.xlu1 %1613 }
 0x314   : > { %v1827_v37 = vcombine.low %v1803_v24, %v1819_v62  ;;  %v1828_v23 = vcombine.high %v1803_v24, %v1819_v62  ;;  %v1843_v41 = vcombine.low %v1810_v47, %v1826_v22  ;;  %v1844_v42 = vcombine.high %v1810_v47, %v1826_v22 }
 0x315   : > { %v1727_v43 = vcombine.low %v7512_v13, %v1614_v45  ;;  %v1728_v16 = vcombine.high %v7512_v13, %v1614_v45  ;;  %v1659_v56 = vcombine.low %v7510_v11, %v1612_v26  ;;  %v1660_v13 = vcombine.high %v7510_v11, %v1612_v26 }
 0x316   : > { %v1835_v51 = vrot.slane %v1827_v37, %v7314_v34  ;;  %v1842_v58 = vrot.slane %v1828_v23, %v7314_v34  ;;  %v1851_v10 = vrot.slane %v1843_v41, %v7314_v34  ;;  %v1858_v52 = vrot.slane %v1844_v42, %v7314_v34 }
 0x317   : > { %v1735_v53 = vrot.slane %v1727_v43, %v7277_v9  ;;  %v1742_v54 = vrot.slane %v1728_v16, %v7277_v9  ;;  %v1624_v0 = vpop.permute.xlu0 %1623  ;;  %v1626_v15 = vpop.permute.xlu1 %1625  ;;  %v1667_v23 = vrot.slane %v1659_v56, %v7277_v9  ;;  %v1674_v41 = vrot.slane %v1660_v13, %v7277_v9 }
 0x318   : > { %v2203_v1 = vcombine.low %v1835_v51, %v1842_v58  ;;  %v6298_v55 = vcombine.high %v1835_v51, %v1842_v58  ;;  %v2219_v27 = vcombine.low %v1851_v10, %v1858_v52  ;;  %v6299_v44 = vcombine.high %v1851_v10, %v1858_v52 }
 0x319   : > { %v1743_v40 = vcombine.low %v7526_v21, %v1626_v15  ;;  %v1744_v59 = vcombine.high %v7526_v21, %v1626_v15  ;;  %v1675_v4 = vcombine.low %v7524_v20, %v1624_v0  ;;  %v1676_v30 = vcombine.high %v7524_v20, %v1624_v0 }
 0x31a   : > { %v7595_v24 = vrot.slane %v2203_v1, %v7277_v9  ;;  %v7598_v47 = vrot.slane %v6298_v55, %v7277_v9  ;;  %v7601_v11 = vrot.slane %v2219_v27, %v7277_v9  ;;  %v7604_v62 = vrot.slane %v6299_v44, %v7277_v9 }
 0x31b   : > { %v1751_v22 = vrot.slane %v1743_v40, %v7277_v9  ;;  %v1758_v21 = vrot.slane %v1744_v59, %v7277_v9  ;;  %v1683_v26 = vrot.slane %v1675_v4, %v7277_v9  ;;  %v1690_v20 = vrot.slane %v1676_v30, %v7277_v9  ;;  %v7610_v37 = vpop.permute.xlu0 %1597  ;;  %v7614_v42 = vpop.permute.xlu1 %1595 }
 0x31c   : > { %v2235_v45 = vcombine.low %v7595_v24, %v7598_v47  ;;  %v2251_v43 = vcombine.low %v7601_v11, %v7604_v62 }
 0x31d   : > { %v1759_v16 = vcombine.low %v1735_v53, %v1751_v22  ;;  %v1760_v51 = vcombine.high %v1735_v53, %v1751_v22  ;;  %v1775_v58 = vcombine.low %v1742_v54, %v1758_v21  ;;  %v1776_v10 = vcombine.high %v1742_v54, %v1758_v21 }
 0x31e   : > { %v1691_v52 = vcombine.low %v1667_v23, %v1683_v26  ;;  %v1692_v0 = vcombine.high %v1667_v23, %v1683_v26  ;;  %v1707_v1 = vcombine.low %v1674_v41, %v1690_v20  ;;  %v1708_v55 = vcombine.high %v1674_v41, %v1690_v20 }
 0x31f   : > { %v1767_v56 = vrot.slane %v1759_v16, %v7314_v34  ;;  %v1774_v13 = vrot.slane %v1760_v51, %v7314_v34  ;;  %v1783_v27 = vrot.slane %v1775_v58, %v7314_v34  ;;  %v1790_v44 = vrot.slane %v1776_v10, %v7314_v34  ;;  %v7624_v15 = vpop.permute.xlu0 %1593  ;;  %v7630_v4 = vpop.permute.xlu1 %1607 }
 0x320   : > { %v1699_v40 = vrot.slane %v1691_v52, %v7314_v34  ;;  %v1706_v53 = vrot.slane %v1692_v0, %v7314_v34  ;;  %v1715_v54 = vrot.slane %v1707_v1, %v7314_v34  ;;  %v1722_v59 = vrot.slane %v1708_v55, %v7314_v34 }
 0x321   : > { %v2135_v30 = vcombine.low %v1767_v56, %v1774_v13  ;;  %v6296_v22 = vcombine.high %v1767_v56, %v1774_v13  ;;  %v2151_v21 = vcombine.low %v1783_v27, %v1790_v44  ;;  %v6297_v26 = vcombine.high %v1783_v27, %v1790_v44 }
 0x322   : > { %v2067_v20 = vcombine.low %v1699_v40, %v1706_v53  ;;  %v6294_v23 = vcombine.high %v1699_v40, %v1706_v53  ;;  %v2083_v41 = vcombine.low %v1715_v54, %v1722_v59  ;;  %v6295_v16 = vcombine.high %v1715_v54, %v1722_v59 }
 0x323   : > { %v7633_v51 = vrot.slane %v2135_v30, %v7277_v9  ;;  %v7636_v58 = vrot.slane %v6296_v22, %v7277_v9  ;;  %v7639_v10 = vrot.slane %v2151_v21, %v7277_v9  ;;  %v7642_v52 = vrot.slane %v6297_v26, %v7277_v9  ;;  %v7644_v0 = vpop.permute.xlu0 %1605  ;;  %v1610_v27 = vpop.permute.xlu1 %1609 }
 0x324   : > { %v7647_v1 = vrot.slane %v2067_v20, %v7277_v9  ;;  %v7650_v55 = vrot.slane %v6294_v23, %v7277_v9  ;;  %v7653_v56 = vrot.slane %v2083_v41, %v7277_v9  ;;  %v7656_v13 = vrot.slane %v6295_v16, %v7277_v9 }
 0x325   : > { %v2243_v44 = vrot.slane %v2235_v45, %v7314_v34  ;;  %v2259_v40 = vrot.slane %v2251_v43, %v7314_v34  ;;  %v2167_v53 = vcombine.low %v7633_v51, %v7636_v58  ;;  %v2183_v54 = vcombine.low %v7639_v10, %v7642_v52 }
 0x326   : > { %v2099_v59 = vcombine.low %v7647_v1, %v7650_v55  ;;  %v2115_v30 = vcombine.low %v7653_v56, %v7656_v13  ;;  %v2236_v22 = vcombine.high %v7595_v24, %v7598_v47  ;;  %v2252_v45 = vcombine.high %v7601_v11, %v7604_v62 }
 0x327   : > { %v2267_v21 = vcombine.low %v2243_v44, %v2259_v40  ;;  %v2268_v43 = vcombine.high %v2243_v44, %v2259_v40  ;;  %v1622_v26 = vpop.permute.xlu0 %1621  ;;  %v2175_v20 = vrot.slane %v2167_v53, %v7314_v34  ;;  %v2191_v23 = vrot.slane %v2183_v54, %v7314_v34  ;;  %v1634_v41 = vpop.permute.xlu1 %1633 }
 0x328   : > { %v1999_v16 = vcombine.low %v7610_v37, %v1622_v26  ;;  %v2000_v12 = vcombine.high %v7610_v37, %v1622_v26  ;;  %v2107_v7 = vrot.slane %v2099_v59, %v7314_v34  ;;  %v2123_v49 = vrot.slane %v2115_v30, %v7314_v34 }
 0x329   : > { %v2476_v24 = vpack.c.bf16 %v2267_v21, %v2267_v21  ;;  %v2478_v47 = vpack.c.bf16 %v2268_v43, %v2268_v43  ;;  %v2015_v60 = vcombine.low %v1610_v27, %v1634_v41  ;;  %v2016_v11 = vcombine.high %v1610_v27, %v1634_v41 }
 0x32a   : > { %v2007_v62 = vrot.slane %v1999_v16, %v7277_v9  ;;  %v2014_v44 = vrot.slane %v2000_v12, %v7277_v9  ;;  %v2131_v40 = vcombine.low %v2107_v7, %v2123_v49  ;;  %v2199_v53 = vcombine.low %v2175_v20, %v2191_v23 }
 0x32b   : > { %6671 = vmatprep.subr.msk.bf16.mxu1 %vm3395_vm3, %v2476_v24  ;;  %6673 = vmatprep.subr.msk.bf16.mxu0 %vm3395_vm3, %v2478_v47  ;;  %v3406_v37 = vsel %vm3395_vm3, %v2476_v24, 0  ;;  %v3466_v54 = vsel %vm3395_vm3, %v2478_v47, 0  ;;  %v2023_v59 = vrot.slane %v2015_v60, %v7277_v9  ;;  %v2030_v30 = vrot.slane %v2016_v11, %v7277_v9  ;;  %v1618_v21 = vpop.permute.xlu0 %1617  ;;  %v1620_v27 = vpop.permute.xlu1 %1619 }
 0x32c   : > { %6492 = vmatpush3.bf16.xpose.msra.mxu1 %v3406_v37  ;;  %6500 = vmatpush3.bf16.xpose.msra.mxu0 %v3466_v54  ;;  %v1863_v12 = vcombine.low %v7624_v15, %v1618_v21  ;;  %v1864_v43 = vcombine.high %v7624_v15, %v1618_v21  ;;  %v2475_v26 = vpack.c.bf16 %v2199_v53, %v2131_v40 }
 0x32d   : > { %v2031_v41 = vcombine.low %v2007_v62, %v2023_v59  ;;  %v2032_v16 = vcombine.high %v2007_v62, %v2023_v59  ;;  %v2047_v46 = vcombine.low %v2014_v44, %v2030_v30  ;;  %v2048_v32 = vcombine.high %v2014_v44, %v2030_v30 }
 0x32e   : > { %v1931_v24 = vcombine.low %v7614_v42, %v1620_v27  ;;  %v1932_v47 = vcombine.high %v7614_v42, %v1620_v27  ;;  %6672 = vmatprep.subr.msk.bf16.mxu1 %vm3395_vm3, %v2475_v26  ;;  %v2250_v60 = vrot.slane %v2236_v22, %v7314_v34  ;;  %v2266_v11 = vrot.slane %v2252_v45, %v7314_v34 }
 0x32f   : > { %v2039_v37 = vrot.slane %v2031_v41, %v7314_v34  ;;  %v2046_v54 = vrot.slane %v2032_v16, %v7314_v34  ;;  %v7696_v15 = vrot.slane %v2047_v46, %v7314_v34  ;;  %v7699_v62 = vrot.slane %v2048_v32, %v7314_v34  ;;  %v1630_v44 = vpop.permute.xlu0 %1629  ;;  %v1632_v59 = vpop.permute.xlu1 %1631 }
 0x330   : > { %v1871_v40 = vrot.slane %v1863_v12, %v7277_v9  ;;  %v2132_v42 = vcombine.high %v2107_v7, %v2123_v49  ;;  %v2200_v53 = vcombine.high %v2175_v20, %v2191_v23  ;;  %v1586_v22 = vpack.c.bf16 %v7580_v48, %v7580_v48 }
 0x331   : > { %v2407_v45 = vcombine.low %v2039_v37, %v2046_v54  ;;  %v6304_v30 = vcombine.high %v2039_v37, %v2046_v54  ;;  %v1939_v21 = vrot.slane %v1931_v24, %v7277_v9  ;;  %v1878_v27 = vrot.slane %v1864_v43, %v7277_v9 }
 0x332   : > { %v2477_v46 = vpack.c.bf16 %v2200_v53, %v2132_v42  ;;  %v3403_v41 = vsel %vm3395_vm3, %v2475_v26, 0  ;;  %v2269_v32 = vcombine.low %v2250_v60, %v2266_v11  ;;  %v2270_v16 = vcombine.high %v2250_v60, %v2266_v11 }
 0x333   : > { %v7708_v29 = vrot.slane %v2407_v45, %v7277_v9  ;;  %v2423_v49 = vcombine.low %v7696_v15, %v7699_v62  ;;  %v6305_v7 = vcombine.high %v7696_v15, %v7699_v62  ;;  %v1946_v20 = vrot.slane %v1932_v47, %v7277_v9  ;;  %v7715_v23 = vpop.permute.xlu0 %2507  ;;  %v7720_v60 = vpop.permute.xlu1 %2495 }
 0x334   : > { %6674 = vmatprep.subr.msk.bf16.mxu0 %vm3395_vm3, %v2477_v46  ;;  %6494 = vmatpush3.bf16.xpose.msra.mxu1 %v3403_v41  ;;  %v3463_v12 = vsel %vm3395_vm3, %v2477_v46, 0  ;;  %v2480_v43 = vpack.c.bf16 %v2269_v32, %v2269_v32  ;;  %v2482_v26 = vpack.c.bf16 %v2270_v16, %v2270_v16  ;;  %v1947_v24 = vcombine.low %v7630_v4, %v1632_v59 }
 0x335   : > { %6502 = vmatpush3.bf16.xpose.msra.mxu0 %v3463_v12  ;;  %v1948_v11 = vcombine.high %v7630_v4, %v1632_v59  ;;  %v1879_v37 = vcombine.low %v7644_v0, %v1630_v44  ;;  %v1880_v47 = vcombine.high %v7644_v0, %v1630_v44  ;;  %v2100_v54 = vcombine.high %v7647_v1, %v7650_v55 }
 0x336   : > { %v7728_v15 = vrot.slane %v6304_v30, %v7277_v9  ;;  %6675 = vmatprep.subr.msk.bf16.mxu1 %vm3395_vm3, %v2480_v43  ;;  %6677 = vmatprep.subr.msk.bf16.mxu0 %vm3395_vm3, %v2482_v26  ;;  %v1955_v62 = vrot.slane %v1947_v24, %v7277_v9  ;;  %v2116_v42 = vcombine.high %v7653_v56, %v7656_v13  ;;  %v3526_v1 = vsel %vm3395_vm3, %v2480_v43, 0 }
 0x337   : > { %v1962_v4 = vrot.slane %v1948_v11, %v7277_v9  ;;  %v1887_v53 = vrot.slane %v1879_v37, %v7277_v9  ;;  %v1894_v0 = vrot.slane %v1880_v47, %v7277_v9  ;;  %v7739_v55 = vpop.permute.xlu0 %2493  ;;  %v7742_v45 = vrot.slane %v2100_v54, %v7314_v34  ;;  %v2520_v46 = vpop.permute.xlu1 %2519 }
 0x338   : > { %v1963_v44 = vcombine.low %v1939_v21, %v1955_v62  ;;  %v1964_v59 = vcombine.high %v1939_v21, %v1955_v62  ;;  %v7745_v30 = vrot.slane %v2116_v42, %v7314_v34 }
 0x339   : > { %v1979_v56 = vcombine.low %v1946_v20, %v1962_v4  ;;  %v1980_v13 = vcombine.high %v1946_v20, %v1962_v4  ;;  %v1895_v41 = vcombine.low %v1871_v40, %v1887_v53  ;;  %v1896_v32 = vcombine.high %v1871_v40, %v1887_v53 }
 0x33a   : > { %v1971_v16 = vrot.slane %v1963_v44, %v7314_v34  ;;  %v1978_v12 = vrot.slane %v1964_v59, %v7314_v34  ;;  %v1911_v43 = vcombine.low %v1878_v27, %v1894_v0  ;;  %v1912_v24 = vcombine.high %v1878_v27, %v1894_v0 }
 0x33b   : > { %v1987_v11 = vrot.slane %v1979_v56, %v7314_v34  ;;  %v1994_v21 = vrot.slane %v1980_v13, %v7314_v34  ;;  %v7752_v37 = vrot.slane %v1895_v41, %v7314_v34  ;;  %v7755_v47 = vrot.slane %v1896_v32, %v7314_v34  ;;  %6496 = vmatmul.mubr.msk.bf16.vlgmr.msra.gmra.mxu1 %vm3395_vm3, %v1572_v38  ;;  %v2532_v62 = vpop.permute.xlu1 %2531  ;;  %v7771_v42 = vpop.permute.xlu0 %2505 }
 0x33c   : > { %v2339_v40 = vcombine.low %v1971_v16, %v1978_v12  ;;  %v6302_v20 = vcombine.high %v1971_v16, %v1978_v12  ;;  %v7762_v54 = vrot.slane %v1911_v43, %v7314_v34  ;;  %v7765_v27 = vrot.slane %v1912_v24, %v7314_v34  ;;  %6504 = vmatmul.mubr.msk.bf16.vlgmr.msra.gmra.mxu0 %vm3395_vm3, %v1574_v39 }
 0x33d   : > { %v2355_v4 = vcombine.low %v1987_v11, %v1994_v21  ;;  %v6303_v8 = vcombine.high %v1987_v11, %v1994_v21  ;;  %v2271_v38 = vcombine.low %v7752_v37, %v7755_v47  ;;  %6508 = vmatpush3.bf16.xpose.msra.mxu1 %v3526_v1  ;;  %v2168_v53 = vcombine.high %v7633_v51, %v7636_v58 }
 0x33e   : > { %v7778_v0 = vrot.slane %v2423_v49, %v7277_v9  ;;  %v7781_v44 = vrot.slane %v6305_v7, %v7277_v9  ;;  %v6300_v19 = vcombine.high %v7752_v37, %v7755_v47  ;;  %6511 = vmatprep.mubr.msk.bf16.mxu1 %vm3395_vm3, %v7396_v17  ;;  %v3586_v39 = vsel %vm3395_vm3, %v2482_v26, 0  ;;  %6519 = vmatprep.mubr.msk.bf16.mxu0 %vm3395_vm3, %v7398_v18 }
 0x33f   : > { %v7789_v59 = vrot.slane %v2339_v40, %v7277_v9  ;;  %v7792_v1 = vrot.slane %v6302_v20, %v7277_v9  ;;  %v2287_v51 = vcombine.low %v7762_v54, %v7765_v27  ;;  %v6301_v58 = vcombine.high %v7762_v54, %v7765_v27  ;;  %6516 = vmatpush3.bf16.xpose.msra.mxu0 %v3586_v39  ;;  %v7811_v56 = vpop.permute.xlu1 %2491  ;;  %v2518_v11 = vpop.permute.xlu0 %2517 }
 0x340   : > { %v7799_v49 = vrot.slane %v2355_v4, %v7277_v9  ;;  %v7802_v17 = vrot.slane %v6303_v8, %v7277_v9  ;;  %v7805_v7 = vrot.slane %v2271_v38, %v7277_v9  ;;  %v2133_v26 = vcombine.low %v7742_v45, %v7745_v30 }
 0x341   : > { %v2182_v13 = vrot.slane %v2168_v53, %v7314_v34  ;;  %v2184_v41 = vcombine.high %v7639_v10, %v7642_v52  ;;  %v2699_v32 = vcombine.low %v7720_v60, %v2520_v46  ;;  %v2700_v16 = vcombine.high %v7720_v60, %v2520_v46 }
 0x342   : > { %v2715_v12 = vcombine.low %v7715_v23, %v2532_v62  ;;  %v2716_v43 = vcombine.high %v7715_v23, %v2532_v62  ;;  %v2439_v18 = vcombine.low %v7708_v29, %v7728_v15  ;;  %v2455_v24 = vcombine.low %v7778_v0, %v7781_v44 }
 0x343   : > { %v2198_v21 = vrot.slane %v2184_v41, %v7314_v34  ;;  %v2134_v10 = vcombine.high %v7742_v45, %v7745_v30  ;;  %v2707_v52 = vrot.slane %v2699_v32, %v7277_v9  ;;  %v2714_v60 = vrot.slane %v2700_v16, %v7277_v9  ;;  %v7833_v40 = vpop.permute.xlu1 %2503 }
 0x344   : > { %v2723_v46 = vrot.slane %v2715_v12, %v7277_v9  ;;  %v2730_v23 = vrot.slane %v2716_v43, %v7277_v9  ;;  %v2447_v37 = vrot.slane %v2439_v18, %v7314_v34  ;;  %v2463_v47 = vrot.slane %v2455_v24, %v7314_v34 }
 0x345   : > { %v2201_v20 = vcombine.low %v2182_v13, %v2198_v21  ;;  %v2202_v54 = vcombine.high %v2182_v13, %v2198_v21  ;;  %v2631_v27 = vcombine.low %v7739_v55, %v2518_v11  ;;  %v2632_v45 = vcombine.high %v7739_v55, %v2518_v11  ;;  %v2530_v55 = vpop.permute.xlu0 %2529 }
 0x346   : > { %v2731_v30 = vcombine.low %v2707_v52, %v2723_v46  ;;  %v2732_v62 = vcombine.high %v2707_v52, %v2723_v46  ;;  %v2747_v4 = vcombine.low %v2714_v60, %v2730_v23  ;;  %v2748_v8 = vcombine.high %v2714_v60, %v2730_v23 }
 0x347   : > { %v2479_v38 = vpack.c.bf16 %v2201_v20, %v2133_v26  ;;  %v2481_v53 = vpack.c.bf16 %v2202_v54, %v2134_v10  ;;  %v2471_v39 = vcombine.low %v2447_v37, %v2463_v47  ;;  %v2472_v41 = vcombine.high %v2447_v37, %v2463_v47  ;;  %v7849_v43 = vpop.permute.xlu1 %2515 }
 0x348   : > { %v7838_v32 = vrot.slane %v2731_v30, %v7314_v34  ;;  %v7841_v16 = vrot.slane %v2732_v62, %v7314_v34  ;;  %v7844_v13 = vrot.slane %v2747_v4, %v7314_v34  ;;  %v7847_v12 = vrot.slane %v2748_v8, %v7314_v34 }
 0x349   : > { %v7852_v26 = vrot.slane %v6300_v19, %v7277_v9  ;;  %v7855_v18 = vrot.slane %v2287_v51, %v7277_v9  ;;  %6676 = vmatprep.subr.msk.bf16.mxu1 %vm3395_vm3, %v2479_v38  ;;  %6678 = vmatprep.subr.msk.bf16.mxu0 %vm3395_vm3, %v2481_v53  ;;  %v3523_v24 = vsel %vm3395_vm3, %v2479_v38, 0  ;;  %v2484_v11 = vpack.c.bf16 %v2471_v39, %v2471_v39 }
 0x34a   : > { %v7861_v21 = vrot.slane %v6301_v58, %v7277_v9  ;;  %v3107_v10 = vcombine.low %v7838_v32, %v7841_v16  ;;  %6510 = vmatpush3.bf16.xpose.msra.mxu1 %v3523_v24  ;;  %v3583_v19 = vsel %vm3395_vm3, %v2481_v53, 0  ;;  %v2486_v52 = vpack.c.bf16 %v2472_v41, %v2472_v41 }
 0x34b   : > { %6518 = vmatpush3.bf16.xpose.msra.mxu0 %v3583_v19  ;;  %6679 = vmatprep.subr.msk.bf16.mxu1 %vm3395_vm3, %v2484_v11  ;;  %v2639_v51 = vrot.slane %v2631_v27, %v7277_v9  ;;  %v2647_v60 = vcombine.low %v7771_v42, %v2530_v55  ;;  %v2648_v46 = vcombine.high %v7771_v42, %v2530_v55  ;;  %v2528_v20 = vpop.permute.xlu1 %2527  ;;  %v3646_v42 = vsel %vm3395_vm3, %v2484_v11, 0 }
 0x34c   : > { %v6310_v58 = vcombine.high %v7838_v32, %v7841_v16  ;;  %v3123_v23 = vcombine.low %v7844_v13, %v7847_v12  ;;  %v6311_v37 = vcombine.high %v7844_v13, %v7847_v12  ;;  %6681 = vmatprep.subr.msk.bf16.mxu0 %vm3395_vm3, %v2486_v52  ;;  %v2646_v47 = vrot.slane %v2632_v45, %v7277_v9 }
 0x34d   : > { %v2655_v54 = vrot.slane %v2647_v60, %v7277_v9  ;;  %v2662_v27 = vrot.slane %v2648_v46, %v7277_v9  ;;  %v2303_v30 = vcombine.low %v7805_v7, %v7852_v26  ;;  %v7884_v62 = vrot.slane %v3107_v10, %v7277_v9 }
 0x34e   : > { %v2319_v4 = vcombine.low %v7855_v18, %v7861_v21  ;;  %v2371_v8 = vcombine.low %v7789_v59, %v7792_v1  ;;  %v2387_v45 = vcombine.low %v7799_v49, %v7802_v17  ;;  %v2563_v25 = vcombine.low %v7811_v56, %v7849_v43 }
 0x34f   : > { %v2663_v38 = vcombine.low %v2639_v51, %v2655_v54  ;;  %v2664_v53 = vcombine.high %v2639_v51, %v2655_v54  ;;  %v2679_v39 = vcombine.low %v2646_v47, %v2662_v27  ;;  %v2680_v41 = vcombine.high %v2646_v47, %v2662_v27  ;;  %v7896_v55 = vpop.permute.xlu1 %2499 }
 0x350   : > { %v2311_v32 = vrot.slane %v2303_v30, %v7314_v34  ;;  %v2327_v16 = vrot.slane %v2319_v4, %v7314_v34  ;;  %v2379_v13 = vrot.slane %v2371_v8, %v7314_v34  ;;  %v2395_v12 = vrot.slane %v2387_v45, %v7314_v34 }
 0x351   : > { %v2671_v24 = vrot.slane %v2663_v38, %v7314_v34  ;;  %v2678_v11 = vrot.slane %v2664_v53, %v7314_v34  ;;  %v7901_v10 = vrot.slane %v2679_v39, %v7314_v34  ;;  %v7904_v19 = vrot.slane %v2680_v41, %v7314_v34  ;;  %6512 = vmatmul.mubr.msk.bf16.vlgmr.msra.gmra.mxu1 %vm3395_vm3, %v1576_v57 }
 0x352   : > { %6520 = vmatmul.mubr.msk.bf16.vlgmr.msra.gmra.mxu0 %vm3395_vm3, %v1578_v61  ;;  %6524 = vmatpush3.bf16.xpose.msra.mxu1 %v3646_v42  ;;  %v2335_v51 = vcombine.low %v2311_v32, %v2327_v16  ;;  %v2403_v60 = vcombine.low %v2379_v13, %v2395_v12  ;;  %v2336_v46 = vcombine.high %v2311_v32, %v2327_v16  ;;  %v3706_v27 = vsel %vm3395_vm3, %v2486_v52, 0 }
 0x353   : > { %v3039_v47 = vcombine.low %v2671_v24, %v2678_v11  ;;  %v6308_v54 = vcombine.high %v2671_v24, %v2678_v11  ;;  %6527 = vmatprep.mubr.msk.bf16.mxu1 %vm3395_vm3, %v7558_v6  ;;  %6532 = vmatpush3.bf16.xpose.msra.mxu0 %v3706_v27  ;;  %v2404_v50 = vcombine.high %v2379_v13, %v2395_v12  ;;  %v7923_v42 = vpop.permute.xlu1 %2511 }
 0x354   : > { %6535 = vmatprep.mubr.msk.bf16.mxu0 %vm3395_vm3, %v7560_v63  ;;  %v2483_v57 = vpack.c.bf16 %v2403_v60, %v2335_v51  ;;  %v2564_v61 = vcombine.high %v7811_v56, %v7849_v43  ;;  %v7926_v30 = vrot.slane %v6310_v58, %v7277_v9  ;;  %v7929_v6 = vrot.slane %v3123_v23, %v7277_v9 }
 0x355   : > { %v7932_v52 = vrot.slane %v6311_v37, %v7277_v9  ;;  %v3055_v4 = vcombine.low %v7901_v10, %v7904_v19  ;;  %v7937_v63 = vrot.slane %v3039_v47, %v7277_v9  ;;  %v6309_v56 = vcombine.high %v7901_v10, %v7904_v19 }
 0x356   : > { %6680 = vmatprep.subr.msk.bf16.mxu1 %vm3395_vm3, %v2483_v57  ;;  %v2485_v43 = vpack.c.bf16 %v2404_v50, %v2336_v46  ;;  %v2579_v58 = vcombine.low %v7833_v40, %v2528_v20  ;;  %v7944_v23 = vrot.slane %v6308_v54, %v7277_v9  ;;  %v2580_v37 = vcombine.high %v7833_v40, %v2528_v20 }
 0x357   : > { %v2440_v8 = vcombine.high %v7708_v29, %v7728_v15  ;;  %v2456_v45 = vcombine.high %v7778_v0, %v7781_v44  ;;  %v2571_v38 = vrot.slane %v2563_v25, %v7277_v9  ;;  %v2578_v53 = vrot.slane %v2564_v61, %v7277_v9  ;;  %v7956_v32 = vpop.permute.xlu1 %2513 }
 0x358   : > { %6682 = vmatprep.subr.msk.bf16.mxu0 %vm3395_vm3, %v2485_v43  ;;  %v2587_v39 = vrot.slane %v2579_v58, %v7277_v9  ;;  %v3643_v41 = vsel %vm3395_vm3, %v2483_v57, 0  ;;  %v2594_v40 = vrot.slane %v2580_v37, %v7277_v9  ;;  %v2304_v15 = vcombine.high %v7805_v7, %v7852_v26 }
 0x359   : > { %v2454_v20 = vrot.slane %v2440_v8, %v7314_v34  ;;  %v2470_v29 = vrot.slane %v2456_v45, %v7314_v34  ;;  %v7964_v0 = vrot.slane %v3055_v4, %v7277_v9  ;;  %v3703_v13 = vsel %vm3395_vm3, %v2485_v43, 0 }
 0x35a   : > { %v2595_v44 = vcombine.low %v2571_v38, %v2587_v39  ;;  %v2596_v16 = vcombine.high %v2571_v38, %v2587_v39  ;;  %6526 = vmatpush3.bf16.xpose.msra.mxu1 %v3643_v41  ;;  %v2611_v12 = vcombine.low %v2578_v53, %v2594_v40  ;;  %v2612_v24 = vcombine.high %v2578_v53, %v2594_v40 }
 0x35b   : > { %v2473_v11 = vcombine.low %v2454_v20, %v2470_v29  ;;  %v2474_v10 = vcombine.high %v2454_v20, %v2470_v29  ;;  %6534 = vmatpush3.bf16.xpose.msra.mxu0 %v3703_v13  ;;  %v2318_v60 = vrot.slane %v2304_v15, %v7314_v34  ;;  %v2320_v7 = vcombine.high %v7855_v18, %v7861_v21  ;;  %v2526_v27 = vpop.permute.xlu1 %2525 }
 0x35c   : > { %v2603_v19 = vrot.slane %v2595_v44, %v7314_v34  ;;  %v2610_v51 = vrot.slane %v2596_v16, %v7314_v34  ;;  %v2619_v26 = vrot.slane %v2611_v12, %v7314_v34  ;;  %v2626_v46 = vrot.slane %v2612_v24, %v7314_v34 }
 0x35d   : > { %v2488_v47 = vpack.c.bf16 %v2473_v11, %v2473_v11  ;;  %v2490_v54 = vpack.c.bf16 %v2474_v10, %v2474_v10  ;;  %v2334_v50 = vrot.slane %v2320_v7, %v7314_v34  ;;  %v2372_v61 = vcombine.high %v7789_v59, %v7792_v1  ;;  %v2502_v1 = vpop.permute.xlu0 %2501 }
 0x35e   : > { %v2971_v25 = vcombine.low %v2603_v19, %v2610_v51  ;;  %v6306_v57 = vcombine.high %v2603_v19, %v2610_v51  ;;  %v7978_v4 = vrot.slane %v6309_v56, %v7277_v9  ;;  %v2987_v43 = vcombine.low %v2619_v26, %v2626_v46 }
 0x35f   : > { %v6307_v58 = vcombine.high %v2619_v26, %v2626_v46  ;;  %6683 = vmatprep.subr.msk.bf16.mxu1 %vm3395_vm3, %v2488_v47  ;;  %6685 = vmatprep.subr.msk.bf16.mxu0 %vm3395_vm3, %v2490_v54  ;;  %v3766_v18 = vsel %vm3395_vm3, %v2488_v47, 0  ;;  %v2337_v8 = vcombine.low %v2318_v60, %v2334_v50  ;;  %v2386_v59 = vrot.slane %v2372_v61, %v7314_v34  ;;  %v2538_v44 = vpop.permute.xlu1 %2537 }
 0x360   : > { %v7984_v21 = vrot.slane %v2971_v25, %v7277_v9  ;;  %v7987_v37 = vrot.slane %v6306_v57, %v7277_v9  ;;  %v7991_v56 = vrot.slane %v2987_v43, %v7277_v9  ;;  %v8958_v38 = vpack.c.bf16 %v7552_v5, %v7552_v5 }
 0x361   : > { %v7994_v45 = vrot.slane %v6307_v58, %v7277_v9  ;;  %v2388_v53 = vcombine.high %v7799_v49, %v7802_v17  ;;  %v2338_v39 = vcombine.high %v2318_v60, %v2334_v50  ;;  %v3826_v41 = vsel %vm3395_vm3, %v2490_v54, 0 }
 0x362   : > { %6528 = vmatmul.mubr.msk.bf16.vlgmr.msra.gmra.mxu1 %vm3395_vm3, %v8958_v38  ;;  %v2903_v40 = vcombine.low %v2502_v1, %v2526_v27  ;;  %v2904_v20 = vcombine.high %v2502_v1, %v2526_v27  ;;  %v3139_v29 = vcombine.low %v7884_v62, %v7926_v30  ;;  %v8959_v5 = vpack.c.bf16 %v7554_v14, %v7554_v14 }
 0x363   : > { %6540 = vmatpush3.bf16.xpose.msra.mxu1 %v3766_v18  ;;  %6543 = vmatprep.mubr.msk.bf16.mxu1 %vm3395_vm3, %v7572_v33  ;;  %v2402_v15 = vrot.slane %v2388_v53, %v7314_v34  ;;  %v3155_v49 = vcombine.low %v7929_v6, %v7932_v52  ;;  %v3140_v33 = vcombine.high %v7884_v62, %v7926_v30 }
 0x364   : > { %6536 = vmatmul.mubr.msk.bf16.vlgmr.msra.gmra.mxu0 %vm3395_vm3, %v8959_v5  ;;  %v3156_v17 = vcombine.high %v7929_v6, %v7932_v52  ;;  %v2911_v14 = vrot.slane %v2903_v40, %v7277_v9  ;;  %v2918_v16 = vrot.slane %v2904_v20, %v7277_v9  ;;  %v8023_v13 = vrot.slane %v3139_v29, %v7314_v34 }
 0x365   : > { %6548 = vmatpush3.bf16.xpose.msra.mxu0 %v3826_v41  ;;  %6551 = vmatprep.mubr.msk.bf16.mxu0 %vm3395_vm3, %v7574_v35  ;;  %v2405_v12 = vcombine.low %v2386_v59, %v2402_v15  ;;  %v2406_v24 = vcombine.high %v2386_v59, %v2402_v15  ;;  %v3163_v62 = vrot.slane %v3155_v49, %v7314_v34 }
 0x366   : > { %v8027_v30 = vrot.slane %v3140_v33, %v7314_v34  ;;  %v8030_v6 = vrot.slane %v3156_v17, %v7314_v34  ;;  %v2919_v35 = vcombine.low %v7956_v32, %v2538_v44  ;;  %v2920_v52 = vcombine.high %v7956_v32, %v2538_v44 }
 0x367   : > { %v3003_v11 = vcombine.low %v7984_v21, %v7987_v37  ;;  %v2487_v10 = vpack.c.bf16 %v2405_v12, %v2337_v8  ;;  %v2489_v19 = vpack.c.bf16 %v2406_v24, %v2338_v39  ;;  %v3171_v51 = vcombine.low %v8023_v13, %v3163_v62 }
 0x368   : > { %v3019_v60 = vcombine.low %v7991_v56, %v7994_v45  ;;  %v3173_v7 = vcombine.low %v8027_v30, %v8030_v6  ;;  %v2927_v26 = vrot.slane %v2919_v35, %v7277_v9  ;;  %v2934_v46 = vrot.slane %v2920_v52, %v7277_v9 }
 0x369   : > { %v8044_v47 = vrot.slane %v3003_v11, %v7314_v34  ;;  %6684 = vmatprep.subr.msk.bf16.mxu1 %vm3395_vm3, %v2487_v10  ;;  %6686 = vmatprep.subr.msk.bf16.mxu0 %vm3395_vm3, %v2489_v19  ;;  %v3763_v32 = vsel %vm3395_vm3, %v2487_v10, 0  ;;  %v3823_v54 = vsel %vm3395_vm3, %v2489_v19, 0  ;;  %v3380_v27 = vpack.c.bf16 %v3171_v51, %v3171_v51 }
 0x36a   : > { %v3027_v25 = vrot.slane %v3019_v60, %v7314_v34  ;;  %v3384_v57 = vpack.c.bf16 %v3173_v7, %v3173_v7  ;;  %v2935_v50 = vcombine.low %v2911_v14, %v2927_v26  ;;  %v2936_v61 = vcombine.high %v2911_v14, %v2927_v26 }
 0x36b   : > { %6542 = vmatpush3.bf16.xpose.msra.mxu1 %v3763_v32  ;;  %v2951_v43 = vcombine.low %v2918_v16, %v2934_v46  ;;  %v2952_v58 = vcombine.high %v2918_v16, %v2934_v46  ;;  %v4218_v18 = vsel %vm4216_vm4, %v3380_v27, 0  ;;  %v3071_v59 = vcombine.low %v7937_v63, %v7944_v23 }
 0x36c   : > { %6687 = vmatprep.subr.msk.bf16.mxu1 %vm4216_vm4, %v3380_v27  ;;  %v3035_v8 = vcombine.low %v8044_v47, %v3027_v25  ;;  %v2943_v1 = vrot.slane %v2935_v50, %v7314_v34  ;;  %v2950_v38 = vrot.slane %v2936_v61, %v7314_v34  ;;  %v4332_v39 = vsel %vm4216_vm4, %v3384_v57, 0 }
 0x36d   : > { %6550 = vmatpush3.bf16.xpose.msra.mxu0 %v3823_v54  ;;  %v2959_v53 = vrot.slane %v2951_v43, %v7314_v34  ;;  %v2966_v41 = vrot.slane %v2952_v58, %v7314_v34  ;;  %v3079_v40 = vrot.slane %v3071_v59, %v7314_v34  ;;  %v3087_v20 = vcombine.low %v7964_v0, %v7978_v4 }
 0x36e   : > { %6689 = vmatprep.subr.msk.bf16.mxu0 %vm4216_vm4, %v3384_v57  ;;  %v3004_v29 = vcombine.high %v7984_v21, %v7987_v37  ;;  %v3311_v5 = vcombine.low %v2943_v1, %v2950_v38  ;;  %v6316_v15 = vcombine.high %v2943_v1, %v2950_v38  ;;  %v3020_v49 = vcombine.high %v7991_v56, %v7994_v45 }
 0x36f   : > { %v3072_v33 = vcombine.high %v7937_v63, %v7944_v23  ;;  %v3327_v17 = vcombine.low %v2959_v53, %v2966_v41  ;;  %v6317_v44 = vcombine.high %v2959_v53, %v2966_v41  ;;  %v3095_v14 = vrot.slane %v3087_v20, %v7314_v34 }
 0x370   : > { %v3018_v16 = vrot.slane %v3004_v29, %v7314_v34  ;;  %v3318_v12 = vrot.slane %v3311_v5, %v7277_v9  ;;  %v3326_v24 = vrot.slane %v6316_v15, %v7277_v9  ;;  %v3034_v21 = vrot.slane %v3020_v49, %v7314_v34 }
 0x371   : > { %v3086_v37 = vrot.slane %v3072_v33, %v7314_v34  ;;  %v3334_v35 = vrot.slane %v3327_v17, %v7277_v9  ;;  %v3342_v56 = vrot.slane %v6317_v44, %v7277_v9  ;;  %v8960_v63 = vpack.c.bf16 %v7562_v3, %v7562_v3 }
 0x372   : > { %v3103_v23 = vcombine.low %v3079_v40, %v3095_v14  ;;  %v3088_v45 = vcombine.high %v7964_v0, %v7978_v4  ;;  %v3037_v52 = vcombine.low %v3018_v16, %v3034_v21  ;;  %v3172_v11 = vcombine.high %v8023_v13, %v3163_v62 }
 0x373   : > { %6544 = vmatmul.mubr.msk.bf16.vlgmr.msra.gmra.mxu1 %vm3395_vm3, %v8960_v63  ;;  %v3343_v10 = vcombine.low %v3318_v12, %v3326_v24  ;;  %v3036_v19 = vcombine.high %v8044_v47, %v3027_v25  ;;  %v3359_v60 = vcombine.low %v3334_v35, %v3342_v56  ;;  %v3104_v7 = vcombine.high %v3079_v40, %v3095_v14 }
 0x374   : > { %6556 = vmatpush3.bf16.msra.mxu1 %v4218_v18  ;;  %6552 = vmatmul.mubr.msk.bf16.vlgmr.msra.gmra.mxu0 %vm3395_vm3, %v1586_v22  ;;  %v3379_v51 = vpack.c.bf16 %v3103_v23, %v3035_v8  ;;  %v3102_v3 = vrot.slane %v3088_v45, %v7314_v34  ;;  %v8092_v26 = vpack.c.bf16 %v3172_v11, %v3172_v11  ;;  %v8961_v58 = vlaneseq }
 0x375   : > { %6572 = vmatpush3.bf16.msra.mxu0 %v4332_v39  ;;  %v3351_v0 = vrot.slane %v3343_v10, %v7314_v34  ;;  %v8097_v4 = vcombine.high %v8027_v30, %v8030_v6  ;;  %v3038_v13 = vcombine.high %v3018_v16, %v3034_v21  ;;  %v3367_v48 = vrot.slane %v3359_v60, %v7314_v34 }
 0x376   : > { %6557 = vmatprep.subr.bf16.mxu1 %v3379_v51  ;;  %v3105_v62 = vcombine.low %v3086_v37, %v3102_v3  ;;  %v8100_v22 = vpack.c.bf16 %v3104_v7, %v3036_v19  ;;  %v3106_v46 = vcombine.high %v3086_v37, %v3102_v3  ;;  %v3344_v47 = vcombine.high %v3318_v12, %v3326_v24 }
 0x377   : > { %v3360_v32 = vcombine.high %v3334_v35, %v3342_v56  ;;  %v3375_v27 = vcombine.low %v3351_v0, %v3367_v48  ;;  %v8106_v30 = vcombine.high %v3351_v0, %v3367_v48  ;;  %v8119_v18 = vand.u32 127, %v8961_v58 }
 0x378   : > { %6558 = vmatpush3.bf16.msra.mxu1 %v3379_v51  ;;  %v3383_v54 = vpack.c.bf16 %v3105_v62, %v3037_v52  ;;  %v8104_v25 = vpack.c.bf16 %v3106_v46, %v3038_v13  ;;  %v3358_v6 = vrot.slane %v3344_v47, %v7314_v34 }
 0x379   : > { %6688 = vmatprep.subr.msk.bf16.mxu1 %vm4216_vm4, %v8092_v26  ;;  %v3374_v57 = vrot.slane %v3360_v32, %v7314_v34  ;;  %v8110_v50 = vpack.c.bf16 %v3375_v27, %v3375_v27  ;;  %vm3902_vm5 = vcmp.ge.s32.totalorder %v8119_v18, 17 }
 0x37a   : > { %6573 = vmatprep.subr.bf16.mxu0 %v3383_v54 }
 0x37b   : > { %6574 = vmatpush3.bf16.msra.mxu0 %v3383_v54  ;;  %v8112_v61 = vcombine.low %v3358_v6, %v3374_v57  ;;  %v8114_v43 = vcombine.high %v3358_v6, %v3374_v57 }
 0x37c   : > { %6691 = vmatprep.subr.msk.bf16.mxu0 %vm4216_vm4, %v8110_v50 }
 0x3fb   : > { %v6497_v8 = vpop.f32.mrf.mxu1 }
 0x3fc   : > { %v3878_v59 = vmul.f32 0.35355338, %v6497_v8  ;;  %v6505_v1 = vpop.f32.mrf.mxu0 }
 0x3fd   : > { %v3881_v38 = vmul.f32 0.35355338, %v6505_v1  ;;  %v3442_v53 = vpop.f32.mrf.mxu1 }
 0x3fe   : > { %v3876_v39 = vmul.f32 0.35355338, %v3442_v53  ;;  %v3502_v41 = vpop.f32.mrf.mxu0  ;;  %v8124_v40 = vsel %vm3902_vm5, -1e+30, %v3878_v59 }
 0x3ff   : > { %v6498_v20 = vpop.f32.mrf.mxu1  ;;  %v8128_v29 = vsel %vm3902_vm5, -1e+30, %v3881_v38  ;;  %v3936_v5 = vsel %vm3929_vm6, %v8124_v40, -inf  ;;  %v3879_v15 = vmul.f32 0.35355338, %v3502_v41 }
 0x400   : > { %v6506_v49 = vpop.f32.mrf.mxu0  ;;  %v3945_v33 = vsel %vm3929_vm6, %v8128_v29, -inf  ;;  %3937 = vmax.xlane.f32.xlu0 %v3936_v5  ;;  %v8136_v17 = vsel %vm3902_vm5, -1e+30, %v3876_v39 }
 0x401   : > { %3946 = vmax.xlane.f32.xlu1 %v3945_v33  ;;  %v3445_v44 = vpop.f32.mrf.mxu1  ;;  %v3930_v12 = vsel %vm3929_vm6, %v8136_v17, -inf  ;;  %v8146_v37 = vsel %vm3902_vm5, -1e+30, %v3879_v15 }
 0x402   : > { %v3877_v14 = vmul.f32 0.35355338, %v3445_v44  ;;  %v3505_v16 = vpop.f32.mrf.mxu0  ;;  %v3939_v56 = vsel %vm3929_vm6, %v8146_v37, -inf }
 0x403   : > { %v3880_v24 = vmul.f32 0.35355338, %v3505_v16 }
 0x404   : > { %3931 = vmax.xlane.f32.xlu0 %v3930_v12  ;;  %v8142_v21 = vsel %vm3902_vm5, -1e+30, %v3877_v14 }
 0x405   : > { %v3933_v35 = vsel %vm3929_vm6, %v8142_v21, -inf  ;;  %v8154_v63 = vsel %vm3902_vm5, -1e+30, %v3880_v24 }
 0x406   : > { %3934 = vmax.xlane.f32.xlu1 %v3933_v35  ;;  %v3942_v23 = vsel %vm3929_vm6, %v8154_v63, -inf }
 0x408   : > { %3940 = vmax.xlane.f32.xlu0 %v3939_v56 }
 0x40c   : > { %3943 = vmax.xlane.f32.xlu0 %v3942_v23 }
 0x411   : > { %v6513_v45 = vpop.f32.mrf.mxu1 }
 0x412   : > { %v3884_v52 = vmul.f32 0.35355338, %v6513_v45  ;;  %v6521_v11 = vpop.f32.mrf.mxu0 }
 0x413   : > { %v3887_v10 = vmul.f32 0.35355338, %v6521_v11  ;;  %v3562_v19 = vpop.f32.mrf.mxu1 }
 0x414   : > { %v3882_v51 = vmul.f32 0.35355338, %v3562_v19  ;;  %v3622_v3 = vpop.f32.mrf.mxu0  ;;  %v8160_v60 = vsel %vm3902_vm5, -1e+30, %v3884_v52 }
 0x415   : > { %v6514_v7 = vpop.f32.mrf.mxu1  ;;  %v8164_v0 = vsel %vm3902_vm5, -1e+30, %v3887_v10  ;;  %v3954_v13 = vsel %vm3929_vm6, %v8160_v60, -inf  ;;  %v3885_v62 = vmul.f32 0.35355338, %v3622_v3 }
 0x416   : > { %v6522_v48 = vpop.f32.mrf.mxu0  ;;  %v3963_v46 = vsel %vm3929_vm6, %v8164_v0, -inf  ;;  %3955 = vmax.xlane.f32.xlu0 %v3954_v13  ;;  %v8172_v47 = vsel %vm3902_vm5, -1e+30, %v3882_v51 }
 0x417   : > { %3964 = vmax.xlane.f32.xlu1 %v3963_v46  ;;  %v3565_v32 = vpop.f32.mrf.mxu1  ;;  %v3948_v57 = vsel %vm3929_vm6, %v8172_v47, -inf  ;;  %v8182_v8 = vsel %vm3902_vm5, -1e+30, %v3885_v62 }
 0x418   : > { %v3883_v54 = vmul.f32 0.35355338, %v3565_v32  ;;  %v3625_v27 = vpop.f32.mrf.mxu0  ;;  %v3957_v38 = vsel %vm3929_vm6, %v8182_v8, -inf }
 0x419   : > { %v3886_v6 = vmul.f32 0.35355338, %v3625_v27 }
 0x41a   : > { %3949 = vmax.xlane.f32.xlu0 %v3948_v57  ;;  %v8178_v58 = vsel %vm3902_vm5, -1e+30, %v3883_v54 }
 0x41b   : > { %v3951_v59 = vsel %vm3929_vm6, %v8178_v58, -inf  ;;  %v8188_v1 = vsel %vm3902_vm5, -1e+30, %v3886_v6 }
 0x41c   : > { %3952 = vmax.xlane.f32.xlu1 %v3951_v59  ;;  %v3960_v53 = vsel %vm3929_vm6, %v8188_v1, -inf }
 0x41e   : > { %3958 = vmax.xlane.f32.xlu0 %v3957_v38 }
 0x420   : > { %3961 = vmax.xlane.f32.xlu1 %v3960_v53 }
 0x422   : > { %v6529_v39 = vpop.f32.mrf.mxu1 }
 0x423   : > { %v3890_v41 = vmul.f32 0.35355338, %v6529_v39 }
 0x424   : > { %v6537_v20 = vpop.f32.mrf.mxu0  ;;  %v3682_v5 = vpop.f32.mrf.mxu1 }
 0x425   : > { %v3893_v15 = vmul.f32 0.35355338, %v6537_v20  ;;  %v3888_v49 = vmul.f32 0.35355338, %v3682_v5  ;;  %v8196_v33 = vsel %vm3902_vm5, -1e+30, %v3890_v41 }
 0x426   : > { %v3742_v44 = vpop.f32.mrf.mxu0  ;;  %v6530_v14 = vpop.f32.mrf.mxu1  ;;  %v3972_v16 = vsel %vm3929_vm6, %v8196_v33, -inf }
 0x427   : > { %v3891_v12 = vmul.f32 0.35355338, %v3742_v44  ;;  %v8202_v24 = vsel %vm3902_vm5, -1e+30, %v3893_v15  ;;  %3973 = vmax.xlane.f32.xlu0 %v3972_v16  ;;  %v8206_v35 = vsel %vm3902_vm5, -1e+30, %v3888_v49 }
 0x428   : > { %v6538_v56 = vpop.f32.mrf.mxu0  ;;  %v3981_v23 = vsel %vm3929_vm6, %v8202_v24, -inf  ;;  %v3685_v45 = vpop.f32.mrf.mxu1  ;;  %v3966_v10 = vsel %vm3929_vm6, %v8206_v35, -inf }
 0x429   : > { %3982 = vmax.xlane.f32.xlu1 %v3981_v23  ;;  %v3889_v52 = vmul.f32 0.35355338, %v3685_v45  ;;  %v8218_v3 = vsel %vm3902_vm5, -1e+30, %v3891_v12 }
 0x42a   : > { %v3745_v11 = vpop.f32.mrf.mxu0  ;;  %v3975_v62 = vsel %vm3929_vm6, %v8218_v3, -inf }
 0x42b   : > { %v3892_v19 = vmul.f32 0.35355338, %v3745_v11  ;;  %3967 = vmax.xlane.f32.xlu0 %v3966_v10  ;;  %v8214_v51 = vsel %vm3902_vm5, -1e+30, %v3889_v52 }
 0x42c   : > { %v3969_v7 = vsel %vm3929_vm6, %v8214_v51, -inf }
 0x42d   : > { %3970 = vmax.xlane.f32.xlu1 %v3969_v7  ;;  %v8224_v13 = vsel %vm3902_vm5, -1e+30, %v3892_v19  ;;  %v8270_v7 = vpop.permute.xlu0 %2497 }
 0x42e   : > { %v3978_v48 = vsel %vm3929_vm6, %v8224_v13, -inf }
 0x42f   : > { %3976 = vmax.xlane.f32.xlu0 %v3975_v62 }
 0x431   : > { %3979 = vmax.xlane.f32.xlu1 %v3978_v48  ;;  %v8272_v18 = vpop.permute.xlu0 %2509 }
 0x433   : > { %v6545_v46 = vpop.f32.mrf.mxu1 }
 0x434   : > { %v3896_v32 = vmul.f32 0.35355338, %v6545_v46  ;;  %v6553_v54 = vpop.f32.mrf.mxu0 }
 0x435   : > { %v3802_v27 = vpop.f32.mrf.mxu1  ;;  %v3899_v6 = vmul.f32 0.35355338, %v6553_v54  ;;  %v8274_v62 = vpop.permute.xlu0 %2521 }
 0x436   : > { %v3894_v57 = vmul.f32 0.35355338, %v3802_v27  ;;  %v8232_v59 = vsel %vm3902_vm5, -1e+30, %v3896_v32  ;;  %v3862_v38 = vpop.f32.mrf.mxu0 }
 0x437   : > { %v6546_v53 = vpop.f32.mrf.mxu1  ;;  %v3990_v39 = vsel %vm3929_vm6, %v8232_v59, -inf  ;;  %v3897_v41 = vmul.f32 0.35355338, %v3862_v38  ;;  %v8238_v20 = vsel %vm3902_vm5, -1e+30, %v3899_v6 }
 0x438   : > { %3991 = vmax.xlane.f32.xlu0 %v3990_v39  ;;  %v8242_v5 = vsel %vm3902_vm5, -1e+30, %v3894_v57  ;;  %v6554_v15 = vpop.f32.mrf.mxu0  ;;  %v3999_v49 = vsel %vm3929_vm6, %v8238_v20, -inf }
 0x439   : > { %v3805_v44 = vpop.f32.mrf.mxu1  ;;  %4000 = vmax.xlane.f32.xlu1 %v3999_v49  ;;  %v3984_v12 = vsel %vm3929_vm6, %v8242_v5, -inf  ;;  %v8254_v45 = vsel %vm3902_vm5, -1e+30, %v3897_v41 }
 0x43a   : > { %v3895_v14 = vmul.f32 0.35355338, %v3805_v44  ;;  %v3865_v16 = vpop.f32.mrf.mxu0  ;;  %v3993_v10 = vsel %vm3929_vm6, %v8254_v45, -inf }
 0x43b   : > { %v3898_v23 = vmul.f32 0.35355338, %v3865_v16 }
 0x43c   : > { %v8250_v56 = vsel %vm3902_vm5, -1e+30, %v3895_v14  ;;  %3985 = vmax.xlane.f32.xlu0 %v3984_v12 }
 0x43d   : > { %v3987_v52 = vsel %vm3929_vm6, %v8250_v56, -inf  ;;  %v8260_v11 = vsel %vm3902_vm5, -1e+30, %v3898_v23 }
 0x43e   : > { %3988 = vmax.xlane.f32.xlu1 %v3987_v52  ;;  %v3996_v19 = vsel %vm3929_vm6, %v8260_v11, -inf }
 0x440   : > { %3994 = vmax.xlane.f32.xlu0 %v3993_v10 }
 0x442   : > { %3997 = vmax.xlane.f32.xlu1 %v3996_v19 }
 0x453   : > { %2523 = vrot.lane.b32.xlu1 %v7360_v28, %s6969_s28 }
 0x456   : > { %2533 = vrot.lane.b32.xlu0 %v7366_v31, %s6969_s28 }
 0x489   : > { %v3938_v48 = vpop.xlane.xlu0 %3937 }
 0x48a   : > { %v3947_v46 = vpop.xlane.xlu1 %3946  ;;  %v4004_v32 = vsub.f32 %v8124_v40, %v3938_v48 }
 0x48b   : > { %v4007_v54 = vsub.f32 %v8128_v29, %v3947_v46 }
 0x48c   : > { %v4030_v27 = vmul.f32 1.442695, %v4004_v32 }
 0x48d   : > { %v4036_v6 = vmul.f32 1.442695, %v4007_v54  ;;  %v3932_v57 = vpop.xlane.xlu0 %3931 }
 0x48e   : > { %6798 = vpow2.f32 %v4030_v27  ;;  %v4002_v28 = vsub.f32 %v8136_v17, %v3932_v57 }
 0x48f   : > { %v3935_v38 = vpop.xlane.xlu1 %3934  ;;  %6800 = vpow2.f32 %v4036_v6 }
 0x490   : > { %v4026_v31 = vmul.f32 1.442695, %v4002_v28  ;;  %v4003_v53 = vsub.f32 %v8142_v21, %v3935_v38 }
 0x491   : > { %v3941_v39 = vpop.xlane.xlu0 %3940 }
 0x492   : > { %v4005_v41 = vsub.f32 %v8146_v37, %v3941_v39  ;;  %v4028_v15 = vmul.f32 1.442695, %v4003_v53  ;;  %6802 = vpow2.f32 %v4026_v31 }
 0x494   : > { %v4032_v49 = vmul.f32 1.442695, %v4005_v41 }
 0x495   : > { %v3944_v40 = vpop.xlane.xlu0 %3943 }
 0x496   : > { %6804 = vpow2.f32 %v4032_v49  ;;  %v4006_v29 = vsub.f32 %v8154_v63, %v3944_v40 }
 0x497   : > { %6806 = vpow2.f32 %v4028_v15 }
 0x498   : > { %v4034_v44 = vmul.f32 1.442695, %v4006_v29 }
 0x49a   : > { %6808 = vpow2.f32 %v4034_v44 }
 0x49b   : > { %v8282_v14 = vpop.eup %6798 }
 0x49c   : > { %v4080_v17 = vsel %vm3929_vm6, %v8282_v14, 0.0  ;;  %v8286_v16 = vpop.eup %6800 }
 0x49d   : > { %4081 = vadd.xlane.f32.xlu0 %v4080_v17  ;;  %v4089_v23 = vsel %vm3929_vm6, %v8286_v16, 0.0 }
 0x49f   : > { %v3956_v21 = vpop.xlane.xlu0 %3955  ;;  %v8291_v52 = vpop.eup %6802 }
 0x4a0   : > { %v3965_v37 = vpop.xlane.xlu1 %3964  ;;  %v4010_v12 = vsub.f32 %v8160_v60, %v3956_v21  ;;  %v4074_v60 = vsel %vm3929_vm6, %v8291_v52, 0.0 }
 0x4a1   : > { %v4013_v63 = vsub.f32 %v8164_v0, %v3965_v37  ;;  %4090 = vadd.xlane.f32.xlu0 %v4089_v23 }
 0x4a2   : > { %v4042_v10 = vmul.f32 1.442695, %v4010_v12 }
 0x4a3   : > { %v8294_v19 = vpop.eup %6804  ;;  %v4048_v48 = vmul.f32 1.442695, %v4013_v63  ;;  %v3950_v46 = vpop.xlane.xlu0 %3949 }
 0x4a4   : > { %v8296_v32 = vpop.eup %6806  ;;  %6810 = vpow2.f32 %v4042_v10  ;;  %v4008_v54 = vsub.f32 %v8172_v47, %v3950_v46  ;;  %v4083_v27 = vsel %vm3929_vm6, %v8294_v19, 0.0 }
 0x4a5   : > { %6812 = vpow2.f32 %v4048_v48  ;;  %v3953_v6 = vpop.xlane.xlu1 %3952  ;;  %4075 = vadd.xlane.f32.xlu0 %v4074_v60  ;;  %4084 = vadd.xlane.f32.xlu1 %v4083_v27  ;;  %v4077_v31 = vsel %vm3929_vm6, %v8296_v32, 0.0 }
 0x4a6   : > { %v4038_v0 = vmul.f32 1.442695, %v4008_v54  ;;  %v4009_v57 = vsub.f32 %v8178_v58, %v3953_v6 }
 0x4a7   : > { %v8304_v28 = vpop.eup %6808  ;;  %v3959_v38 = vpop.xlane.xlu0 %3958 }
 0x4a8   : > { %6814 = vpow2.f32 %v4038_v0  ;;  %v4040_v47 = vmul.f32 1.442695, %v4009_v57  ;;  %v4011_v53 = vsub.f32 %v8182_v8, %v3959_v38  ;;  %v4086_v39 = vsel %vm3929_vm6, %v8304_v28, 0.0 }
 0x4a9   : > { %v3962_v41 = vpop.xlane.xlu1 %3961  ;;  %4078 = vadd.xlane.f32.xlu1 %v4077_v31  ;;  %4087 = vadd.xlane.f32.xlu0 %v4086_v39 }
 0x4aa   : > { %6816 = vpow2.f32 %v4040_v47  ;;  %v4044_v15 = vmul.f32 1.442695, %v4011_v53  ;;  %v4012_v58 = vsub.f32 %v8188_v1, %v3962_v41 }
 0x4ac   : > { %6818 = vpow2.f32 %v4044_v15  ;;  %v4046_v49 = vmul.f32 1.442695, %v4012_v58 }
 0x4ae   : > { %6820 = vpow2.f32 %v4046_v49 }
 0x4b0   : > { %v3974_v40 = vpop.xlane.xlu0 %3973 }
 0x4b1   : > { %v4016_v29 = vsub.f32 %v8196_v33, %v3974_v40  ;;  %v8313_v44 = vpop.eup %6810 }
 0x4b2   : > { %v3983_v17 = vpop.xlane.xlu1 %3982  ;;  %v8315_v8 = vpop.eup %6812  ;;  %v4098_v12 = vsel %vm3929_vm6, %v8313_v44, 0.0 }
 0x4b3   : > { %v4019_v21 = vsub.f32 %v8202_v24, %v3983_v17  ;;  %v4054_v37 = vmul.f32 1.442695, %v4016_v29  ;;  %v4107_v1 = vsel %vm3929_vm6, %v8315_v8, 0.0  ;;  %4099 = vadd.xlane.f32.xlu0 %v4098_v12 }
 0x4b4   : > { %v3968_v23 = vpop.xlane.xlu0 %3967  ;;  %4108 = vadd.xlane.f32.xlu1 %v4107_v1 }
 0x4b5   : > { %v4060_v63 = vmul.f32 1.442695, %v4019_v21  ;;  %6822 = vpow2.f32 %v4054_v37  ;;  %v4014_v33 = vsub.f32 %v8206_v35, %v3968_v23  ;;  %v8323_v10 = vpop.eup %6814 }
 0x4b6   : > { %v3971_v48 = vpop.xlane.xlu1 %3970  ;;  %v4092_v54 = vsel %vm3929_vm6, %v8323_v10, 0.0 }
 0x4b7   : > { %6824 = vpow2.f32 %v4060_v63  ;;  %v4050_v46 = vmul.f32 1.442695, %v4014_v33  ;;  %v4015_v24 = vsub.f32 %v8214_v51, %v3971_v48  ;;  %v8328_v60 = vpop.eup %6816  ;;  %4093 = vadd.xlane.f32.xlu0 %v4092_v54 }
 0x4b8   : > { %v3977_v27 = vpop.xlane.xlu0 %3976  ;;  %v4095_v35 = vsel %vm3929_vm6, %v8328_v60, 0.0 }
 0x4b9   : > { %6826 = vpow2.f32 %v4050_v46  ;;  %v4052_v6 = vmul.f32 1.442695, %v4015_v24  ;;  %v4017_v0 = vsub.f32 %v8218_v3, %v3977_v27  ;;  %v8333_v57 = vpop.eup %6818  ;;  %4096 = vadd.xlane.f32.xlu1 %v4095_v35 }
 0x4ba   : > { %v3980_v38 = vpop.xlane.xlu1 %3979  ;;  %v4101_v47 = vsel %vm3929_vm6, %v8333_v57, 0.0 }
 0x4bb   : > { %6828 = vpow2.f32 %v4052_v6  ;;  %v4056_v51 = vmul.f32 1.442695, %v4017_v0  ;;  %v4018_v31 = vsub.f32 %v8224_v13, %v3980_v38  ;;  %v8338_v53 = vpop.eup %6820  ;;  %4102 = vadd.xlane.f32.xlu0 %v4101_v47 }
 0x4bc   : > { %v4104_v3 = vsel %vm3929_vm6, %v8338_v53, 0.0 }
 0x4bd   : > { %6830 = vpow2.f32 %v4056_v51  ;;  %v4058_v39 = vmul.f32 1.442695, %v4018_v31  ;;  %4105 = vadd.xlane.f32.xlu1 %v4104_v3 }
 0x4bf   : > { %6832 = vpow2.f32 %v4058_v39 }
 0x4c1   : > { %v3992_v41 = vpop.xlane.xlu0 %3991 }
 0x4c2   : > { %v8342_v15 = vpop.eup %6822  ;;  %v4001_v58 = vpop.xlane.xlu1 %4000  ;;  %v4022_v0 = vsub.f32 %v8232_v59, %v3992_v41 }
 0x4c3   : > { %v4116_v13 = vsel %vm3929_vm6, %v8342_v15, 0.0 }
 0x4c4   : > { %v8346_v49 = vpop.eup %6824  ;;  %4117 = vadd.xlane.f32.xlu0 %v4116_v13  ;;  %v4066_v38 = vmul.f32 1.442695, %v4022_v0 }
 0x4c5   : > { %v3986_v40 = vpop.xlane.xlu0 %3985  ;;  %v4125_v29 = vsel %vm3929_vm6, %v8346_v49, 0.0 }
 0x4c6   : > { %v4020_v17 = vsub.f32 %v8242_v5, %v3986_v40  ;;  %v8351_v21 = vpop.eup %6826  ;;  %4126 = vadd.xlane.f32.xlu1 %v4125_v29  ;;  %v4025_v40 = vsub.f32 %v8238_v20, %v4001_v58 }
 0x4c7   : > { %v3989_v37 = vpop.xlane.xlu1 %3988  ;;  %v4110_v1 = vsel %vm3929_vm6, %v8351_v21, 0.0 }
 0x4c8   : > { %v4062_v12 = vmul.f32 1.442695, %v4020_v17  ;;  %v8355_v23 = vpop.eup %6828  ;;  %4111 = vadd.xlane.f32.xlu0 %v4110_v1  ;;  %v4021_v13 = vsub.f32 %v8250_v56, %v3989_v37  ;;  %v4072_v17 = vmul.f32 1.442695, %v4025_v40 }
 0x4c9   : > { %v3995_v63 = vpop.xlane.xlu0 %3994  ;;  %v4113_v48 = vsel %vm3929_vm6, %v8355_v23, 0.0 }
 0x4ca   : > { %6834 = vpow2.f32 %v4062_v12  ;;  %v4023_v33 = vsub.f32 %v8254_v45, %v3995_v63  ;;  %v8360_v46 = vpop.eup %6830  ;;  %4114 = vadd.xlane.f32.xlu1 %v4113_v48  ;;  %v4064_v29 = vmul.f32 1.442695, %v4021_v13 }
 0x4cb   : > { %v3998_v5 = vpop.xlane.xlu1 %3997  ;;  %v4119_v27 = vsel %vm3929_vm6, %v8360_v46, 0.0 }
 0x4cc   : > { %v4068_v24 = vmul.f32 1.442695, %v4023_v33  ;;  %v4024_v54 = vsub.f32 %v8260_v11, %v3998_v5  ;;  %v8365_v6 = vpop.eup %6832  ;;  %4120 = vadd.xlane.f32.xlu0 %v4119_v27 }
 0x4cd   : > { %v4122_v35 = vsel %vm3929_vm6, %v8365_v6, 0.0  ;;  %v8398_v33 = vpop.permute.xlu0 %2533 }
 0x4ce   : > { %6836 = vpow2.f32 %v4068_v24  ;;  %v4070_v45 = vmul.f32 1.442695, %v4024_v54  ;;  %4123 = vadd.xlane.f32.xlu1 %v4122_v35 }
 0x4cf   : > { %v8400_v20 = vpop.permute.xlu1 %2523 }
 0x4d0   : > { %6838 = vpow2.f32 %v4070_v45 }
 0x4d1   : > { %6840 = vpow2.f32 %v4066_v38 }
 0x4d2   : > { %6842 = vpow2.f32 %v4064_v29 }
 0x4d3   : > { %6844 = vpow2.f32 %v4072_v17 }
 0x4d7   : > { %v8370_v51 = vpop.eup %6834 }
 0x4d8   : > { %v4128_v11 = vsel %vm3929_vm6, %v8370_v51, 0.0 }
 0x4d9   : > { %4129 = vadd.xlane.f32.xlu0 %v4128_v11 }
 0x4db   : > { %v8374_v31 = vpop.eup %6836 }
 0x4dc   : > { %v4137_v59 = vsel %vm3929_vm6, %v8374_v31, 0.0 }
 0x4dd   : > { %v8378_v47 = vpop.eup %6838  ;;  %4138 = vadd.xlane.f32.xlu0 %v4137_v59 }
 0x4de   : > { %v4140_v39 = vsel %vm3929_vm6, %v8378_v47, 0.0  ;;  %v8384_v3 = vpop.eup %6840 }
 0x4df   : > { %2535 = vrot.lane.b32.xlu1 %v7368_v36, %s6969_s28  ;;  %v4134_v41 = vsel %vm3929_vm6, %v8384_v3, 0.0  ;;  %v8390_v12 = vpop.eup %6842 }
 0x4e0   : > { %v4131_v36 = vsel %vm3929_vm6, %v8390_v12, 0.0  ;;  %v8394_v1 = vpop.eup %6844 }
 0x4e1   : > { %4141 = vadd.xlane.f32.xlu0 %v4140_v39  ;;  %v4143_v63 = vsel %vm3929_vm6, %v8394_v1, 0.0 }
 0x4e5   : > { %4135 = vadd.xlane.f32.xlu0 %v4134_v41 }
 0x503   : > { %4132 = vadd.xlane.f32.xlu1 %v4131_v36 }
 0x507   : > { %4144 = vadd.xlane.f32.xlu1 %v4143_v63 }
 0x526   : > { %v4082_v56 = vpop.xlane.xlu0 %4081 }
 0x527   : > { %6846 = vrcp.f32 %v4082_v56 }
 0x52a   : > { %v4091_v58 = vpop.xlane.xlu0 %4090 }
 0x52e   : > { %v4085_v37 = vpop.xlane.xlu1 %4084  ;;  %v4076_v48 = vpop.xlane.xlu0 %4075 }
 0x52f   : > { %6848 = vrcp.f32 %v4076_v48  ;;  %v3386_v48 = vpack.c.bf16 %v8097_v4, %v8097_v4 }
 0x530   : > { %6850 = vrcp.f32 %v4085_v37 }
 0x532   : > { %v4079_v5 = vpop.xlane.xlu1 %4078  ;;  %v4088_v24 = vpop.xlane.xlu0 %4087 }
 0x533   : > { %6852 = vrcp.f32 %v4079_v5  ;;  %v2768_v5 = vcombine.high %v8270_v7, %v8274_v62 }
 0x534   : > { %6854 = vrcp.f32 %v4088_v24  ;;  %v6847_v27 = vpop.eup %6846 }
 0x535   : > { %6856 = vrcp.f32 %v4091_v58  ;;  %v4172_v59 = vmul.f32 %v6847_v27, %v8282_v14 }
 0x537   : > { %v4195_v56 = vpack.c.bf16 %v4172_v59, %v4172_v59 }
 0x53c   : > { %v4100_v54 = vpop.xlane.xlu0 %4099  ;;  %v6849_v0 = vpop.eup %6848 }
 0x53d   : > { %v4109_v45 = vpop.xlane.xlu1 %4108  ;;  %v6851_v35 = vpop.eup %6850  ;;  %6858 = vrcp.f32 %v4100_v54  ;;  %v4170_v41 = vmul.f32 %v6849_v0, %v8291_v52  ;;  %v4275_v52 = vsel %vm4216_vm4, %v8092_v26, 0  ;;  %v2784_v26 = vcombine.high %v8272_v18, %v8398_v33 }
 0x53e   : > { %v4173_v36 = vmul.f32 %v6851_v35, %v8294_v19  ;;  %v2783_v19 = vcombine.low %v8272_v18, %v8398_v33 }
 0x53f   : > { %v2798_v18 = vrot.slane %v2784_v26, %v7277_v9 }
 0x540   : > { %v6853_v38 = vpop.eup %6852  ;;  %v4094_v11 = vpop.xlane.xlu0 %4093  ;;  %v2791_v24 = vrot.slane %v2783_v19, %v7277_v9 }
 0x541   : > { %v6855_v39 = vpop.eup %6854  ;;  %6860 = vrcp.f32 %v4094_v11  ;;  %v4171_v13 = vmul.f32 %v6853_v38, %v8296_v32 }
 0x542   : > { %v4097_v40 = vpop.xlane.xlu1 %4096  ;;  %v4174_v29 = vmul.f32 %v6855_v39, %v8304_v28  ;;  %v6857_v58 = vpop.eup %6856  ;;  %v2767_v28 = vcombine.low %v8270_v7, %v8274_v62  ;;  %v2782_v62 = vrot.slane %v2768_v5, %v7277_v9 }
 0x543   : > { %6862 = vrcp.f32 %v4097_v40  ;;  %v4194_v17 = vpack.c.bf16 %v4171_v13, %v4170_v41  ;;  %v4175_v32 = vmul.f32 %v6857_v58, %v8286_v16 }
 0x544   : > { %6864 = vrcp.f32 %v4109_v45  ;;  %v4103_v63 = vpop.xlane.xlu0 %4102  ;;  %v4196_v14 = vpack.c.bf16 %v4174_v29, %v4173_v36  ;;  %v2775_v45 = vrot.slane %v2767_v28, %v7277_v9  ;;  %v3390_v29 = vpack.c.bf16 %v8106_v30, %v8106_v30 }
 0x545   : > { %6866 = vrcp.f32 %v4103_v63  ;;  %6559 = vmatprep.mubr.msk.bf16.mxu1 %vm3929_vm6, %v4194_v17  ;;  %v4197_v16 = vpack.c.bf16 %v4175_v32, %v4175_v32  ;;  %v2815_v17 = vcombine.low %v2782_v62, %v2798_v18  ;;  %v2816_v36 = vcombine.high %v2782_v62, %v2798_v18 }
 0x546   : > { %v4106_v37 = vpop.xlane.xlu1 %4105  ;;  %6560 = vmatmul.mubr.msk.bf16.vlgmr.msra.gmra.mxu1 %vm3929_vm6, %v4195_v56  ;;  %v2799_v33 = vcombine.low %v2775_v45, %v2791_v24  ;;  %v2800_v59 = vcombine.high %v2775_v45, %v2791_v24 }
 0x547   : > { %6868 = vrcp.f32 %v4106_v37  ;;  %6564 = vmatpush3.bf16.msra.mxu1 %v4275_v52  ;;  %6567 = vmatprep.mubr.msk.bf16.mxu1 %vm3929_vm6, %v4196_v14  ;;  %v2823_v52 = vrot.slane %v2815_v17, %v7314_v34  ;;  %v2830_v19 = vrot.slane %v2816_v36, %v7314_v34 }
 0x548   : > { %6565 = vmatprep.subr.bf16.mxu1 %v8100_v22  ;;  %v2814_v14 = vrot.slane %v2800_v59, %v7314_v34 }
 0x549   : > { %v3191_v5 = vcombine.low %v2823_v52, %v2830_v19  ;;  %v6313_v24 = vcombine.high %v2823_v52, %v2830_v19 }
 0x54a   : > { %v6859_v27 = vpop.eup %6858 }
 0x54b   : > { %6566 = vmatpush3.bf16.msra.mxu1 %v8100_v22  ;;  %v4389_v22 = vsel %vm4216_vm4, %v3386_v48, 0  ;;  %v4178_v38 = vmul.f32 %v6859_v27, %v8313_v44 }
 0x54c   : > { %6690 = vmatprep.subr.msk.bf16.mxu1 %vm4216_vm4, %v3386_v48 }
 0x54d   : > { %v8426_v54 = vpop.xlane.xlu0 %4117  ;;  %v4199_v58 = vpack.c.bf16 %v4178_v38, %v4178_v38 }
 0x54e   : > { %v6861_v0 = vpop.eup %6860  ;;  %6568 = vmatmul.mubr.msk.bf16.vlgmr.msra.gmra.mxu1 %vm3929_vm6, %v4197_v16 }
 0x54f   : > { %v8430_v4 = vpop.xlane.xlu1 %4126  ;;  %6580 = vmatpush3.bf16.msra.mxu1 %v4389_v22  ;;  %v4176_v39 = vmul.f32 %v6861_v0, %v8323_v10 }
 0x550   : > { %v6863_v7 = vpop.eup %6862  ;;  %6581 = vmatprep.subr.bf16.mxu1 %v8104_v25 }
 0x551   : > { %v4112_v35 = vpop.xlane.xlu0 %4111  ;;  %v6865_v11 = vpop.eup %6864  ;;  %v4177_v41 = vmul.f32 %v6863_v7, %v8328_v60  ;;  %v2807_v60 = vrot.slane %v2799_v33, %v7314_v34  ;;  %v3206_v33 = vrot.slane %v6313_v24, %v7277_v9 }
 0x552   : > { %6870 = vrcp.f32 %v4112_v35  ;;  %v6867_v13 = vpop.eup %6866  ;;  %v4181_v10 = vmul.f32 %v6865_v11, %v8315_v8 }
 0x553   : > { %v4115_v40 = vpop.xlane.xlu1 %4114  ;;  %v4198_v63 = vpack.c.bf16 %v4177_v41, %v4176_v39  ;;  %6582 = vmatpush3.bf16.msra.mxu1 %v8104_v25  ;;  %v4179_v30 = vmul.f32 %v6867_v13, %v8333_v57  ;;  %v4446_v25 = vsel %vm4216_vm4, %v8110_v50, 0  ;;  %v3175_v48 = vcombine.low %v2807_v60, %v2814_v14 }
 0x554   : > { %6872 = vrcp.f32 %v4115_v40  ;;  %v6869_v56 = vpop.eup %6868  ;;  %6692 = vmatprep.subr.msk.bf16.mxu1 %vm4216_vm4, %v3390_v29  ;;  %v4201_v28 = vpack.c.bf16 %v4181_v10, %v4181_v10  ;;  %v6312_v26 = vcombine.high %v2807_v60, %v2814_v14  ;;  %v2835_v57 = vcombine.low %v7896_v55, %v8400_v20 }
 0x555   : > { %v4121_v44 = vpop.xlane.xlu0 %4120  ;;  %6575 = vmatprep.mubr.msk.bf16.mxu0 %vm3929_vm6, %v4198_v63  ;;  %v4180_v37 = vmul.f32 %v6869_v56, %v8338_v53  ;;  %v2836_v50 = vcombine.high %v7896_v55, %v8400_v20  ;;  %v4503_v53 = vsel %vm4216_vm4, %v3390_v29, 0  ;;  %v8465_v45 = vrot.slane %v3175_v48, %v7277_v9 }
 0x556   : > { %6576 = vmatmul.mubr.msk.bf16.vlgmr.msra.gmra.mxu0 %vm3929_vm6, %v4199_v58  ;;  %6874 = vrcp.f32 %v4121_v44  ;;  %v8468_v22 = vrot.slane %v6312_v26, %v7277_v9  ;;  %v2843_v55 = vrot.slane %v2835_v57, %v7277_v9 }
 0x557   : > { %v4124_v8 = vpop.xlane.xlu1 %4123  ;;  %6588 = vmatpush3.bf16.msra.mxu0 %v4446_v25  ;;  %v4200_v32 = vpack.c.bf16 %v4180_v37, %v4179_v30  ;;  %v2850_v18 = vrot.slane %v2836_v50, %v7277_v9 }
 0x558   : > { %6876 = vrcp.f32 %v4124_v8  ;;  %v3208_v24 = vcombine.high %v8465_v45, %v8468_v22 }
 0x559   : > { %6583 = vmatprep.mubr.msk.bf16.mxu1 %vm3929_vm6, %v4200_v32  ;;  %6878 = vrcp.f32 %v8426_v54 }
 0x55a   : > { %6584 = vmatmul.mubr.msk.bf16.vlgmr.msra.gmra.mxu1 %vm3929_vm6, %v4201_v28  ;;  %6880 = vrcp.f32 %v8430_v4  ;;  %v3207_v4 = vcombine.low %v8465_v45, %v8468_v22  ;;  %v3222_v45 = vrot.slane %v3208_v24, %v7314_v34 }
 0x55b   : > { %v2536_v16 = vpop.permute.xlu1 %2535  ;;  %6596 = vmatpush3.bf16.msra.mxu1 %v4503_v53 }
 0x55c   : > { %v2851_v27 = vcombine.low %v7923_v42, %v2536_v16  ;;  %v2852_v0 = vcombine.high %v7923_v42, %v2536_v16  ;;  %v3198_v42 = vrot.slane %v3191_v5, %v7277_v9  ;;  %v3215_v30 = vrot.slane %v3207_v4, %v7314_v34 }
 0x55e   : > { %v2859_v7 = vrot.slane %v2851_v27, %v7277_v9  ;;  %v2866_v62 = vrot.slane %v2852_v0, %v7277_v9  ;;  %v3223_v56 = vcombine.low %v3198_v42, %v3206_v33  ;;  %v3224_v16 = vcombine.high %v3198_v42, %v3206_v33 }
 0x55f   : > { %v6871_v20 = vpop.eup %6870 }
 0x560   : > { %v2867_v38 = vcombine.low %v2843_v55, %v2859_v7  ;;  %v2868_v11 = vcombine.high %v2843_v55, %v2859_v7  ;;  %v2883_v59 = vcombine.low %v2850_v18, %v2866_v62  ;;  %v2884_v39 = vcombine.high %v2850_v18, %v2866_v62 }
 0x561   : > { %v6873_v35 = vpop.eup %6872  ;;  %v4182_v54 = vmul.f32 %v6871_v20, %v8351_v21  ;;  %v3231_v28 = vrot.slane %v3223_v56, %v7314_v34  ;;  %v3238_v22 = vrot.slane %v3224_v16, %v7314_v34 }
 0x562   : > { %v8478_v41 = vpop.xlane.xlu0 %4129  ;;  %v4183_v13 = vmul.f32 %v6873_v35, %v8355_v23  ;;  %v2875_v40 = vrot.slane %v2867_v38, %v7314_v34  ;;  %v2882_v29 = vrot.slane %v2868_v11, %v7314_v34  ;;  %v2891_v17 = vrot.slane %v2883_v59, %v7314_v34 }
 0x563   : > { %v2898_v36 = vrot.slane %v2884_v39, %v7314_v34  ;;  %v6875_v44 = vpop.eup %6874  ;;  %v3240_v20 = vcombine.high %v3215_v30, %v3231_v28  ;;  %v3392_v59 = vpack.c.bf16 %v8112_v61, %v8112_v61  ;;  %v3394_v39 = vpack.c.bf16 %v8114_v43, %v8114_v43 }
 0x564   : > { %v4202_v63 = vpack.c.bf16 %v4183_v13, %v4182_v54  ;;  %v3243_v58 = vcombine.low %v2875_v40, %v2882_v29  ;;  %v6314_v10 = vcombine.high %v2875_v40, %v2882_v29  ;;  %v4185_v8 = vmul.f32 %v6875_v44, %v8360_v46 }
 0x565   : > { %v3259_v60 = vcombine.low %v2891_v17, %v2898_v36  ;;  %v6315_v21 = vcombine.high %v2891_v17, %v2898_v36  ;;  %v6877_v14 = vpop.eup %6876  ;;  %v3241_v4 = vcombine.low %v3222_v45, %v3238_v22  ;;  %v4560_v61 = vsel %vm4216_vm4, %v3392_v59, 0 }
 0x566   : > { %v4139_v23 = vpop.xlane.xlu0 %4138  ;;  %6591 = vmatprep.mubr.msk.bf16.mxu0 %vm3929_vm6, %v4202_v63  ;;  %v3250_v37 = vrot.slane %v3243_v58, %v7277_v9  ;;  %v3258_v25 = vrot.slane %v6314_v10, %v7277_v9  ;;  %v4186_v32 = vmul.f32 %v6877_v14, %v8365_v6  ;;  %v6879_v27 = vpop.eup %6878  ;;  %v3239_v6 = vcombine.low %v3215_v30, %v3231_v28 }
 0x567   : > { %v3266_v52 = vrot.slane %v3259_v60, %v7277_v9  ;;  %v3274_v19 = vrot.slane %v6315_v21, %v7277_v9  ;;  %6882 = vrcp.f32 %v4139_v23  ;;  %v6881_v55 = vpop.eup %6880  ;;  %v4184_v38 = vmul.f32 %v6879_v27, %v8342_v15 }
 0x568   : > { %v3275_v48 = vcombine.low %v3250_v37, %v3258_v25  ;;  %v3276_v57 = vcombine.high %v3250_v37, %v3258_v25  ;;  %v4204_v5 = vpack.c.bf16 %v4186_v32, %v4185_v8  ;;  %v4187_v11 = vmul.f32 %v6881_v55, %v8346_v49 }
 0x569   : > { %v3291_v26 = vcombine.low %v3266_v52, %v3274_v19  ;;  %v3292_v50 = vcombine.high %v3266_v52, %v3274_v19  ;;  %v4203_v15 = vpack.c.bf16 %v4184_v38, %v4184_v38  ;;  %v3242_v49 = vcombine.high %v3222_v45, %v3238_v22 }
 0x56a   : > { %v4142_v53 = vpop.xlane.xlu0 %4141  ;;  %v3283_v0 = vrot.slane %v3275_v48, %v7314_v34  ;;  %6599 = vmatprep.mubr.msk.bf16.mxu1 %vm3929_vm6, %v4204_v5  ;;  %v3290_v62 = vrot.slane %v3276_v57, %v7314_v34  ;;  %v4205_v40 = vpack.c.bf16 %v4187_v11, %v4187_v11  ;;  %v4617_v43 = vsel %vm4216_vm4, %v3394_v39, 0 }
 0x56b   : > { %6884 = vrcp.f32 %v4142_v53  ;;  %v3299_v46 = vrot.slane %v3291_v26, %v7314_v34  ;;  %v3306_v35 = vrot.slane %v3292_v50, %v7314_v34  ;;  %v8962_v10 = vmov 0.0  }
 0x56d   : > { %v3307_v18 = vcombine.low %v3283_v0, %v3299_v46  ;;  %v3308_v7 = vcombine.high %v3283_v0, %v3299_v46  ;;  %v3309_v54 = vcombine.low %v3290_v62, %v3306_v35  ;;  %v3310_v13 = vcombine.high %v3290_v62, %v3306_v35 }
 0x56e   : > { %v4136_v60 = vpop.xlane.xlu0 %4135 }
 0x56f   : > { %v3387_v42 = vpack.c.bf16 %v3307_v18, %v3239_v6  ;;  %v3389_v33 = vpack.c.bf16 %v3308_v7, %v3240_v20  ;;  %v3391_v17 = vpack.c.bf16 %v3309_v54, %v3241_v4  ;;  %v3393_v36 = vpack.c.bf16 %v3310_v13, %v3242_v49 }
 0x570   : > { %6886 = vrcp.f32 %v4136_v60 }
 0x571   : > { %6589 = vmatprep.subr.bf16.mxu0 %v3387_v42  ;;  %6597 = vmatprep.subr.bf16.mxu1 %v3389_v33  ;;  %6888 = vrcp.f32 %v8478_v41 }
 0x572   : > { %6590 = vmatpush3.bf16.msra.mxu0 %v3387_v42  ;;  %6598 = vmatpush3.bf16.msra.mxu1 %v3389_v33 }
 0x573   : > { %6693 = vmatprep.subr.msk.bf16.mxu0 %vm4216_vm4, %v3392_v59  ;;  %6694 = vmatprep.subr.msk.bf16.mxu1 %vm4216_vm4, %v3394_v39 }
 0x574   : > { %v6883_v29 = vpop.eup %6882 }
 0x575   : > { %6592 = vmatmul.mubr.msk.bf16.vlgmr.msra.gmra.mxu0 %vm3929_vm6, %v4203_v15  ;;  %6600 = vmatmul.mubr.msk.bf16.vlgmr.msra.gmra.mxu1 %vm3929_vm6, %v4205_v40  ;;  %v4191_v56 = vmul.f32 %v6883_v29, %v8374_v31 }
 0x576   : > { %6604 = vmatpush3.bf16.msra.mxu0 %v4560_v61  ;;  %6612 = vmatpush3.bf16.msra.mxu1 %v4617_v43 }
 0x577   : > { %6605 = vmatprep.subr.bf16.mxu0 %v3391_v17  ;;  %6613 = vmatprep.subr.bf16.mxu1 %v3393_v36 }
 0x578   : > { %v6885_v63 = vpop.eup %6884 }
 0x579   : > { %v4192_v44 = vmul.f32 %v6885_v63, %v8378_v47 }
 0x57a   : > { %6606 = vmatpush3.bf16.msra.mxu0 %v3391_v17  ;;  %6614 = vmatpush3.bf16.msra.mxu1 %v3393_v36 }
 0x57b   : > { %v4208_v58 = vpack.c.bf16 %v4192_v44, %v4191_v56  ;;  %6619 = vmatprep.subr.bf16.mxu0 %v8962_v10  ;;  %6635 = vmatprep.subr.bf16.mxu1 %v8962_v10 }
 0x57d   : > { %6615 = vmatprep.mubr.msk.bf16.mxu1 %vm3929_vm6, %v4208_v58  ;;  %v6887_v31 = vpop.eup %6886 }
 0x57e   : > { %v6889_v23 = vpop.eup %6888  ;;  %v4190_v30 = vmul.f32 %v6887_v31, %v8384_v3 }
 0x57f   : > { %v4188_v37 = vmul.f32 %v6889_v23, %v8370_v51 }
 0x580   : > { %v4207_v8 = vpack.c.bf16 %v4190_v30, %v4190_v30 }
 0x58c   : > { %v4133_v21 = vpop.xlane.xlu1 %4132 }
 0x58d   : > { %6890 = vrcp.f32 %v4133_v21 }
 0x590   : > { %v4145_v14 = vpop.xlane.xlu1 %4144 }
 0x591   : > { %6892 = vrcp.f32 %v4145_v14 }
 0x59a   : > { %v6891_v47 = vpop.eup %6890 }
 0x59b   : > { %v4189_v25 = vmul.f32 %v6891_v47, %v8390_v12 }
 0x59d   : > { %v4206_v52 = vpack.c.bf16 %v4189_v25, %v4188_v37 }
 0x59e   : > { %v6893_v19 = vpop.eup %6892 }
 0x59f   : > { %6607 = vmatprep.mubr.msk.bf16.mxu0 %vm3929_vm6, %v4206_v52  ;;  %v4193_v41 = vmul.f32 %v6893_v19, %v8394_v1 }
 0x5a0   : > { %6608 = vmatmul.mubr.msk.bf16.vlgmr.msra.gmra.mxu0 %vm3929_vm6, %v4207_v8 }
 0x5a1   : > { %v4209_v32 = vpack.c.bf16 %v4193_v41, %v4193_v41  ;;  %6623 = vmatprep.mubr.msk.bf16.mxu0 %vm6962_vm2, %v8962_v10 }
 0x5a3   : > { %6616 = vmatmul.mubr.msk.bf16.vlgmr.msra.gmra.mxu1 %vm3929_vm6, %v4209_v32 }
 0x5a4   : > { %6639 = vmatprep.mubr.msk.bf16.mxu1 %vm6962_vm2, %v8962_v10 }
 0x606   : > { %v6561_v51 = vpop.f32.mrf.mxu1 }
 0x608   : > { %v4254_v3 = vpop.f32.mrf.mxu1 }
 0x60a   : > { %v6562_v12 = vpop.f32.mrf.mxu1 }
 0x60c   : > { %v4257_v28 = vpop.f32.mrf.mxu1 }
 0x60e   : > { %v6569_v48 = vpop.f32.mrf.mxu1 }
 0x610   : > { %v4311_v26 = vpop.f32.mrf.mxu1 }
 0x612   : > { %v6570_v57 = vpop.f32.mrf.mxu1 }
 0x614   : > { %v4314_v1 = vpop.f32.mrf.mxu1 }
 0x616   : > { %v6577_v50 = vpop.f32.mrf.mxu0 }
 0x617   : > { %v4803_v53 = vcombine.low %v6561_v51, %v6577_v50  ;;  %v4804_v5 = vcombine.high %v6561_v51, %v6577_v50 }
 0x618   : > { %v4368_v24 = vpop.f32.mrf.mxu0 }
 0x619   : > { %v4667_v16 = vcombine.low %v4254_v3, %v4368_v24  ;;  %v4668_v27 = vcombine.high %v4254_v3, %v4368_v24  ;;  %v4811_v20 = vrot.slane %v4803_v53, %v7277_v9  ;;  %v4818_v18 = vrot.slane %v4804_v5, %v7277_v9 }
 0x61a   : > { %v6578_v0 = vpop.f32.mrf.mxu0  ;;  %v6585_v46 = vpop.f32.mrf.mxu1 }
 0x61b   : > { %v4819_v55 = vcombine.low %v6569_v48, %v6585_v46  ;;  %v4820_v6 = vcombine.high %v6569_v48, %v6585_v46  ;;  %v4675_v33 = vrot.slane %v4667_v16, %v7277_v9  ;;  %v4682_v38 = vrot.slane %v4668_v27, %v7277_v9 }
 0x61c   : > { %v4371_v7 = vpop.f32.mrf.mxu0  ;;  %v4425_v62 = vpop.f32.mrf.mxu1 }
 0x61d   : > { %v4735_v35 = vcombine.low %v4257_v28, %v4371_v7  ;;  %v4736_v45 = vcombine.high %v4257_v28, %v4371_v7  ;;  %v4827_v22 = vrot.slane %v4819_v55, %v7277_v9  ;;  %v4834_v42 = vrot.slane %v4820_v6, %v7277_v9 }
 0x61e   : > { %v4683_v11 = vcombine.low %v4311_v26, %v4425_v62  ;;  %v4684_v59 = vcombine.high %v4311_v26, %v4425_v62  ;;  %v6586_v39 = vpop.f32.mrf.mxu1 }
 0x61f   : > { %v4743_v54 = vrot.slane %v4735_v35, %v7277_v9  ;;  %v4750_v13 = vrot.slane %v4736_v45, %v7277_v9  ;;  %v4835_v4 = vcombine.low %v4811_v20, %v4827_v22  ;;  %v4836_v15 = vcombine.high %v4811_v20, %v4827_v22 }
 0x620   : > { %v4851_v40 = vcombine.low %v4818_v18, %v4834_v42  ;;  %v4852_v49 = vcombine.high %v4818_v18, %v4834_v42  ;;  %v4691_v29 = vrot.slane %v4683_v11, %v7277_v9  ;;  %v4698_v61 = vrot.slane %v4684_v59, %v7277_v9  ;;  %v4428_v43 = vpop.f32.mrf.mxu1 }
 0x621   : > { %v4843_v17 = vrot.slane %v4835_v4, %v7314_v34  ;;  %v4850_v36 = vrot.slane %v4836_v15, %v7314_v34  ;;  %v4751_v63 = vcombine.low %v4314_v1, %v4428_v43  ;;  %v4752_v56 = vcombine.high %v4314_v1, %v4428_v43 }
 0x622   : > { %v4859_v44 = vrot.slane %v4851_v40, %v7314_v34  ;;  %v4866_v58 = vrot.slane %v4852_v49, %v7314_v34  ;;  %v4699_v60 = vcombine.low %v4675_v33, %v4691_v29  ;;  %v4700_v21 = vcombine.high %v4675_v33, %v4691_v29  ;;  %v6778_v29 = vld [vmem:[%s7066_s27 + $0x8] sm:$0xff]  }
 0x623   : > { %v5211_v14 = vcombine.low %v4843_v17, %v4850_v36  ;;  %v6354_v31 = vcombine.high %v4843_v17, %v4850_v36  ;;  %v4715_v23 = vcombine.low %v4682_v38, %v4698_v61  ;;  %v4716_v47 = vcombine.high %v4682_v38, %v4698_v61  ;;  %6620 = vmatpush3.bf16.msra.mxu0 %v6778_v29 }
 0x624   : > { %v5227_v30 = vcombine.low %v4859_v44, %v4866_v58  ;;  %v6355_v37 = vcombine.high %v4859_v44, %v4866_v58  ;;  %v4707_v25 = vrot.slane %v4699_v60, %v7314_v34  ;;  %v4714_v52 = vrot.slane %v4700_v21, %v7314_v34  ;;  %6621 = vmatprep.subr.bf16.mxu0 %v8962_v10 }
 0x625   : > { %v5218_v19 = vrot.slane %v5211_v14, %v7277_v9  ;;  %v5226_v8 = vrot.slane %v6354_v31, %v7277_v9  ;;  %v4723_v41 = vrot.slane %v4715_v23, %v7314_v34  ;;  %v4730_v32 = vrot.slane %v4716_v47, %v7314_v34 }
 0x626   : > { %v5234_v51 = vrot.slane %v5227_v30, %v7277_v9  ;;  %v5242_v3 = vrot.slane %v6355_v37, %v7277_v9  ;;  %v5075_v12 = vcombine.low %v4707_v25, %v4714_v52  ;;  %v6350_v28 = vcombine.high %v4707_v25, %v4714_v52 }
 0x627   : > { %v5091_v48 = vcombine.low %v4723_v41, %v4730_v32  ;;  %v6351_v26 = vcombine.high %v4723_v41, %v4730_v32  ;;  %v4759_v57 = vrot.slane %v4751_v63, %v7277_v9  ;;  %v4766_v50 = vrot.slane %v4752_v56, %v7277_v9  ;;  %v6779_v41 = vld [vmem:[%s7066_s27] sm:$0xff]   ;;  %s6970_s27 = smov 16  }
 0x628   : > { %v5082_v1 = vrot.slane %v5075_v12, %v7277_v9  ;;  %v5090_v53 = vrot.slane %v6350_v28, %v7277_v9  ;;  %v5244_v5 = vcombine.high %v5218_v19, %v5226_v8  ;;  %v5260_v24 = vcombine.high %v5234_v51, %v5242_v3  ;;  %6622 = vmatpush3.bf16.msra.mxu0 %v6779_v41 }
 0x629   : > { %v5098_v16 = vrot.slane %v5091_v48, %v7277_v9  ;;  %v5106_v27 = vrot.slane %v6351_v26, %v7277_v9  ;;  %v4767_v0 = vcombine.low %v4743_v54, %v4759_v57  ;;  %v4768_v46 = vcombine.high %v4743_v54, %v4759_v57  ;;  %6651 = vmatprep.subr.bf16.mxu0 %v8962_v10 }
 0x62a   : > { %v4783_v55 = vcombine.low %v4750_v13, %v4766_v50  ;;  %v4784_v6 = vcombine.high %v4750_v13, %v4766_v50  ;;  %v5107_v20 = vcombine.low %v5082_v1, %v5090_v53  ;;  %v5108_v62 = vcombine.high %v5082_v1, %v5090_v53 }
 0x62b   : > { %v4775_v18 = vrot.slane %v4767_v0, %v7314_v34  ;;  %v4782_v7 = vrot.slane %v4768_v46, %v7314_v34  ;;  %v5123_v35 = vcombine.low %v5098_v16, %v5106_v27  ;;  %v5124_v42 = vcombine.high %v5098_v16, %v5106_v27 }
 0x62c   : > { %v4791_v45 = vrot.slane %v4783_v55, %v7314_v34  ;;  %v4798_v22 = vrot.slane %v4784_v6, %v7314_v34  ;;  %v8568_v11 = vrot.slane %v5107_v20, %v7314_v34  ;;  %v8574_v13 = vrot.slane %v5244_v5, %v7314_v34 }
 0x62d   : > { %v5143_v33 = vcombine.low %v4775_v18, %v4782_v7  ;;  %v6352_v38 = vcombine.high %v4775_v18, %v4782_v7  ;;  %v8571_v59 = vrot.slane %v5123_v35, %v7314_v34  ;;  %v8577_v4 = vrot.slane %v5260_v24, %v7314_v34 }
 0x62e   : > { %v5159_v39 = vcombine.low %v4791_v45, %v4798_v22  ;;  %v6353_v54 = vcombine.high %v4791_v45, %v4798_v22  ;;  %v5122_v49 = vrot.slane %v5108_v62, %v7314_v34  ;;  %v5138_v17 = vrot.slane %v5124_v42, %v7314_v34 }
 0x62f   : > { %v5150_v15 = vrot.slane %v5143_v33, %v7277_v9  ;;  %v5158_v40 = vrot.slane %v6352_v38, %v7277_v9  ;;  %v5277_v36 = vcombine.low %v8574_v13, %v8577_v4  ;;  %v5243_v44 = vcombine.low %v5218_v19, %v5226_v8 }
 0x630   : > { %v5166_v61 = vrot.slane %v5159_v39, %v7277_v9  ;;  %v5174_v43 = vrot.slane %v6353_v54, %v7277_v9  ;;  %v5259_v58 = vcombine.low %v5234_v51, %v5242_v3  ;;  %v5278_v14 = vcombine.high %v8574_v13, %v8577_v4 }
 0x631   : > { %v5176_v63 = vcombine.high %v5150_v15, %v5158_v40  ;;  %v5175_v56 = vcombine.low %v5150_v15, %v5158_v40  ;;  %v5139_v31 = vcombine.low %v8568_v11, %v8571_v59  ;;  %v8598_v30 = vrot.slane %v5243_v44, %v7314_v34 }
 0x632   : > { %v5192_v60 = vcombine.high %v5166_v61, %v5174_v43  ;;  %v5191_v21 = vcombine.low %v5166_v61, %v5174_v43  ;;  %v8601_v37 = vrot.slane %v5259_v58, %v7314_v34  ;;  %v5141_v32 = vcombine.low %v5122_v49, %v5138_v17 }
 0x633   : > { %v5190_v23 = vrot.slane %v5176_v63, %v7314_v34  ;;  %v8595_v47 = vrot.slane %v5175_v56, %v7314_v34  ;;  %v5140_v26 = vcombine.high %v8568_v11, %v8571_v59  ;;  %v5142_v27 = vcombine.high %v5122_v49, %v5138_v17 }
 0x634   : > { %v5206_v19 = vrot.slane %v5192_v60, %v7314_v34  ;;  %v8605_v8 = vrot.slane %v5191_v21, %v7314_v34  ;;  %v5276_v51 = vcombine.high %v8598_v30, %v8601_v37  ;;  %v5275_v3 = vcombine.low %v8598_v30, %v8601_v37 }
 0x635   : > { %v6593_v25 = vpop.f32.mrf.mxu0  ;;  %v6601_v52 = vpop.f32.mrf.mxu1 }
 0x636   : > { %v5209_v48 = vcombine.low %v5190_v23, %v5206_v19  ;;  %v5208_v57 = vcombine.high %v8595_v47, %v8605_v8  ;;  %v5207_v50 = vcombine.low %v8595_v47, %v8605_v8  ;;  %v5210_v16 = vcombine.high %v5190_v23, %v5206_v19 }
 0x637   : > { %v4482_v12 = vpop.f32.mrf.mxu0  ;;  %v4539_v28 = vpop.f32.mrf.mxu1 }
 0x638   : > { %v6736_v1 = vpack.i.bf16 %v5209_v48, %v5141_v32  ;;  %v6731_v53 = vpack.i.bf16 %v5208_v57, %v5140_v26  ;;  %v6741_v0 = vpack.i.bf16 %v5210_v16, %v5142_v27 }
 0x639   : > { %v6594_v5 = vpop.f32.mrf.mxu0  ;;  %v6602_v24 = vpop.f32.mrf.mxu1 }
 0x63a   : > { %6737 = vrot.lane.b32.xlu1 %v6736_v1, %s6970_s27  ;;  %6732 = vrot.lane.b32.xlu0 %v6731_v53, %s6971_s29 }
 0x63b   : > { %v4485_v46 = vpop.f32.mrf.mxu0  ;;  %v8622_v6 = vpop.f32.mrf.mxu1 }
 0x63e   : > { %6742 = vrot.lane.b32.xlu1 %v6741_v0, %s6972_s14 }
 0x660   : > { %v6609_v55 = vpop.f32.mrf.mxu0 }
 0x661   : > { %v5007_v20 = vcombine.low %v6593_v25, %v6609_v55  ;;  %v5008_v18 = vcombine.high %v6593_v25, %v6609_v55 }
 0x662   : > { %v4596_v7 = vpop.f32.mrf.mxu0 }
 0x663   : > { %v4871_v62 = vcombine.low %v4482_v12, %v4596_v7  ;;  %v4872_v35 = vcombine.high %v4482_v12, %v4596_v7  ;;  %v6617_v45 = vpop.f32.mrf.mxu1  ;;  %v5015_v38 = vrot.slane %v5007_v20, %v7277_v9  ;;  %v5022_v39 = vrot.slane %v5008_v18, %v7277_v9 }
 0x664   : > { %v5023_v22 = vcombine.low %v6601_v52, %v6617_v45  ;;  %v5024_v42 = vcombine.high %v6601_v52, %v6617_v45  ;;  %v6610_v33 = vpop.f32.mrf.mxu0 }
 0x665   : > { %v4653_v54 = vpop.f32.mrf.mxu1  ;;  %v4879_v43 = vrot.slane %v4871_v62, %v7277_v9  ;;  %v4886_v17 = vrot.slane %v4872_v35, %v7277_v9 }
 0x666   : > { %v5031_v15 = vrot.slane %v5023_v22, %v7277_v9  ;;  %v5038_v40 = vrot.slane %v5024_v42, %v7277_v9  ;;  %v4887_v49 = vcombine.low %v4539_v28, %v4653_v54  ;;  %v4888_v29 = vcombine.high %v4539_v28, %v4653_v54  ;;  %v4599_v61 = vpop.f32.mrf.mxu0 }
 0x667   : > { %v6618_v63 = vpop.f32.mrf.mxu1  ;;  %v4939_v25 = vcombine.low %v4485_v46, %v4599_v61  ;;  %v4940_v52 = vcombine.high %v4485_v46, %v4599_v61 }
 0x668   : > { %v5039_v56 = vcombine.low %v5015_v38, %v5031_v15  ;;  %v5040_v44 = vcombine.high %v5015_v38, %v5031_v15  ;;  %v5055_v58 = vcombine.low %v5022_v39, %v5038_v40  ;;  %v5056_v60 = vcombine.high %v5022_v39, %v5038_v40 }
 0x669   : > { %v4895_v21 = vrot.slane %v4887_v49, %v7277_v9  ;;  %v4902_v23 = vrot.slane %v4888_v29, %v7277_v9  ;;  %v4656_v55 = vpop.f32.mrf.mxu1  ;;  %v4947_v33 = vrot.slane %v4939_v25, %v7277_v9  ;;  %v4954_v38 = vrot.slane %v4940_v52, %v7277_v9 }
 0x66a   : > { %v5047_v19 = vrot.slane %v5039_v56, %v7314_v34  ;;  %v5054_v41 = vrot.slane %v5040_v44, %v7314_v34  ;;  %v5063_v32 = vrot.slane %v5055_v58, %v7314_v34  ;;  %v5070_v12 = vrot.slane %v5056_v60, %v7314_v34 }
 0x66b   : > { %v4903_v28 = vcombine.low %v4879_v43, %v4895_v21  ;;  %v4904_v48 = vcombine.high %v4879_v43, %v4895_v21  ;;  %v4919_v26 = vcombine.low %v4886_v17, %v4902_v23  ;;  %v4920_v57 = vcombine.high %v4886_v17, %v4902_v23 }
 0x66c   : > { %v5415_v1 = vcombine.low %v5047_v19, %v5054_v41  ;;  %v6360_v53 = vcombine.high %v5047_v19, %v5054_v41  ;;  %v5431_v5 = vcombine.low %v5063_v32, %v5070_v12  ;;  %v6361_v24 = vcombine.high %v5063_v32, %v5070_v12 }
 0x66d   : > { %v4911_v16 = vrot.slane %v4903_v28, %v7314_v34  ;;  %v4918_v27 = vrot.slane %v4904_v48, %v7314_v34  ;;  %v4927_v0 = vrot.slane %v4919_v26, %v7314_v34  ;;  %v4934_v46 = vrot.slane %v4920_v57, %v7314_v34 }
 0x66e   : > { %v5422_v20 = vrot.slane %v5415_v1, %v7277_v9  ;;  %v5430_v18 = vrot.slane %v6360_v53, %v7277_v9  ;;  %v5438_v7 = vrot.slane %v5431_v5, %v7277_v9  ;;  %v5446_v62 = vrot.slane %v6361_v24, %v7277_v9 }
 0x66f   : > { %v5279_v35 = vcombine.low %v4911_v16, %v4918_v27  ;;  %v6356_v45 = vcombine.high %v4911_v16, %v4918_v27  ;;  %v5295_v22 = vcombine.low %v4927_v0, %v4934_v46  ;;  %v6357_v42 = vcombine.high %v4927_v0, %v4934_v46 }
 0x670   : > { %v4955_v39 = vcombine.low %v8622_v6, %v4656_v55  ;;  %v4956_v54 = vcombine.high %v8622_v6, %v4656_v55  ;;  %v5447_v17 = vcombine.low %v5422_v20, %v5430_v18  ;;  %v5463_v63 = vcombine.low %v5438_v7, %v5446_v62 }
 0x671   : > { %v5286_v15 = vrot.slane %v5279_v35, %v7277_v9  ;;  %v5294_v40 = vrot.slane %v6356_v45, %v7277_v9  ;;  %v5302_v49 = vrot.slane %v5295_v22, %v7277_v9  ;;  %v5310_v29 = vrot.slane %v6357_v42, %v7277_v9 }
 0x672   : > { %v4963_v61 = vrot.slane %v4955_v39, %v7277_v9  ;;  %v4970_v43 = vrot.slane %v4956_v54, %v7277_v9  ;;  %v8669_v53 = vrot.slane %v5447_v17, %v7314_v34  ;;  %v8672_v5 = vrot.slane %v5463_v63, %v7314_v34 }
 0x673   : > { %v5312_v56 = vcombine.high %v5286_v15, %v5294_v40  ;;  %v5328_v44 = vcombine.high %v5302_v49, %v5310_v29  ;;  %v5311_v58 = vcombine.low %v5286_v15, %v5294_v40  ;;  %v5327_v60 = vcombine.low %v5302_v49, %v5310_v29 }
 0x674   : > { %v4971_v21 = vcombine.low %v4947_v33, %v4963_v61  ;;  %v4972_v6 = vcombine.high %v4947_v33, %v4963_v61  ;;  %v4987_v23 = vcombine.low %v4954_v38, %v4970_v43  ;;  %v4988_v25 = vcombine.high %v4954_v38, %v4970_v43 }
 0x675   : > { %v5326_v52 = vrot.slane %v5312_v56, %v7314_v34  ;;  %v5342_v19 = vrot.slane %v5328_v44, %v7314_v34  ;;  %v8657_v41 = vrot.slane %v5311_v58, %v7314_v34  ;;  %v8660_v32 = vrot.slane %v5327_v60, %v7314_v34 }
 0x676   : > { %v4979_v12 = vrot.slane %v4971_v21, %v7314_v34  ;;  %v4986_v28 = vrot.slane %v4972_v6, %v7314_v34  ;;  %v4995_v48 = vrot.slane %v4987_v23, %v7314_v34  ;;  %v5002_v26 = vrot.slane %v4988_v25, %v7314_v34 }
 0x677   : > { %v5345_v57 = vcombine.low %v5326_v52, %v5342_v19  ;;  %v5344_v1 = vcombine.high %v8657_v41, %v8660_v32  ;;  %v5346_v35 = vcombine.high %v5326_v52, %v5342_v19  ;;  %v5448_v45 = vcombine.high %v5422_v20, %v5430_v18 }
 0x678   : > { %v5347_v24 = vcombine.low %v4979_v12, %v4986_v28  ;;  %v6358_v16 = vcombine.high %v4979_v12, %v4986_v28  ;;  %v5363_v27 = vcombine.low %v4995_v48, %v5002_v26  ;;  %v6359_v0 = vcombine.high %v4995_v48, %v5002_v26 }
 0x679   : > { %v6751_v46 = vpack.i.bf16 %v5345_v57, %v5277_v36  ;;  %v6746_v55 = vpack.i.bf16 %v5344_v1, %v5276_v51  ;;  %v5462_v36 = vrot.slane %v5448_v45, %v7314_v34  ;;  %v5464_v39 = vcombine.high %v5438_v7, %v5446_v62 }
 0x67a   : > { %v5354_v22 = vrot.slane %v5347_v24, %v7277_v9  ;;  %v5362_v42 = vrot.slane %v6358_v16, %v7277_v9  ;;  %v5370_v33 = vrot.slane %v5363_v27, %v7277_v9  ;;  %v5378_v38 = vrot.slane %v6359_v0, %v7277_v9 }
 0x67b   : > { %6752 = vrot.lane.b32.xlu0 %v6751_v46, %s6970_s27  ;;  %6747 = vrot.lane.b32.xlu1 %v6746_v55, %s6971_s29  ;;  %v5343_v51 = vcombine.low %v8657_v41, %v8660_v32  ;;  %v6756_v40 = vpack.i.bf16 %v5346_v35, %v5278_v14  ;;  %v5478_v9 = vrot.slane %v5464_v39, %v7314_v34 }
 0x67c   : > { %v5379_v54 = vcombine.low %v5354_v22, %v5362_v42  ;;  %v5395_v20 = vcombine.low %v5370_v33, %v5378_v38  ;;  %v5380_v18 = vcombine.high %v5354_v22, %v5362_v42  ;;  %v5396_v15 = vcombine.high %v5370_v33, %v5378_v38 }
 0x67d   : > { %v5479_v49 = vcombine.low %v8669_v53, %v8672_v5  ;;  %v5480_v13 = vcombine.high %v8669_v53, %v8672_v5  ;;  %v5481_v43 = vcombine.low %v5462_v36, %v5478_v9  ;;  %v5583_v53 = vsub.s32 4, %v7181_v2  ;;  %v8754_v5 = vld [vmem:[%s7052_s18] sm:$0x3f] }
 0x67e   : > { %v8696_v29 = vrot.slane %v5379_v54, %v7314_v34  ;;  %v8699_v7 = vrot.slane %v5395_v20, %v7314_v34  ;;  %v5394_v62 = vrot.slane %v5380_v18, %v7314_v34  ;;  %v5410_v61 = vrot.slane %v5396_v15, %v7314_v34 }
 0x67f   : > { %6757 = vrot.lane.b32.xlu1 %v6756_v40, %s6972_s14  ;;  %v5482_v34 = vcombine.high %v5462_v36, %v5478_v9 }
 0x680   : > { %v5412_v4 = vcombine.high %v8696_v29, %v8699_v7  ;;  %v5413_v14 = vcombine.low %v5394_v62, %v5410_v61  ;;  %v5411_v17 = vcombine.low %v8696_v29, %v8699_v7  ;;  %v5414_v44 = vcombine.high %v5394_v62, %v5410_v61 }
 0x682   : > { %v6761_v63 = vpack.i.bf16 %v5480_v13, %v5412_v4  ;;  %v6766_v56 = vpack.i.bf16 %v5481_v43, %v5413_v14  ;;  %v6771_v58 = vpack.i.bf16 %v5482_v34, %v5414_v44  ;;  %v6919_v14 = vld [vmem:[%s8948_s9] sm:$0xff]  ;;  %v6920_v34 = vld [vmem:[%s8948_s9 + $0x8] sm:$0xff] }
 0x684   : > { %6762 = vrot.lane.b32.xlu0 %v6761_v63, %s6971_s29  ;;  %6767 = vrot.lane.b32.xlu1 %v6766_v56, %s6970_s27  ;;  %s8963_s27 = scalar_lea.vmem %s8945_s6, %s7045_s13 }
 0x688   : > { %6772 = vrot.lane.b32.xlu0 %v6771_v58, %s6972_s14 }
 0x6ac   : > { %v6738_v60 = vpop.permute.xlu1 %6737  ;;  %v6733_v21 = vpop.permute.xlu0 %6732 }
 0x6ad   : > { %v6735_v6 = vunpack.i.h.bf16 %v6733_v21  ;;  %v6734_v23 = vunpack.i.l.bf16 %v6733_v21  ;;  %v6740_v25 = vunpack.i.h.bf16 %v6738_v60  ;;  %v6739_v52 = vunpack.i.l.bf16 %v6738_v60 }
 0x6af   : > { %v5556_v19 = vsel %vm3395_vm3, %v5207_v50, %v6735_v6  ;;  %v5555_v41 = vsel %vm3395_vm3, %v5139_v31, %v6734_v23 }
 0x6b0   : > { %v6743_v32 = vpop.permute.xlu1 %6742  ;;  %v5562_v48 = vsel %vm5561_vm7, %v5555_v41, %v6739_v52  ;;  %v5563_v26 = vsel %vm5561_vm7, %v5556_v19, %v6740_v25  ;;  %v6921_v25 = vld [vmem:[%s8948_s9 + $0x10] sm:$0xff] }
 0x6b1   : > { %v6745_v12 = vunpack.i.h.bf16 %v6743_v32  ;;  %v6744_v28 = vunpack.i.l.bf16 %v6743_v32 }
 0x6b3   : > { %v5568_v57 = vsel %vm3929_vm6, %v5562_v48, %v6744_v28  ;;  %v5569_v1 = vsel %vm3929_vm6, %v5563_v26, %v6745_v12  ;;  %v6922_v28 = vld [vmem:[%s8948_s9 + $0x18] sm:$0xff] }
 0x6b4   : > { %v5574_v47 = vpack.c.bf16 %v5569_v1, %v5568_v57 }
 0x6b6   : > { %6624 = vmatmul.mubr.msk.bf16.vlgmr.msra.gmra.mxu0 %vm503_vm1, %v5574_v47 }
 0x6b7   : > { %6627 = vmatprep.mubr.msk.bf16.mxu0 %vm6962_vm2, %v8962_v10 }
 0x6ed   : > { %v6748_v11 = vpop.permute.xlu1 %6747  ;;  %v6753_v59 = vpop.permute.xlu0 %6752 }
 0x6ee   : > { %v6750_v31 = vunpack.i.h.bf16 %v6748_v11  ;;  %v6749_v8 = vunpack.i.l.bf16 %v6748_v11  ;;  %v6755_v50 = vunpack.i.h.bf16 %v6753_v59  ;;  %v6754_v24 = vunpack.i.l.bf16 %v6753_v59  ;;  %v6923_v11 = vld [vmem:[%s8948_s9 + $0x20] sm:$0xff] }
 0x6f0   : > { %v5557_v16 = vsel %vm3395_vm3, %v5275_v3, %v6749_v8  ;;  %v5558_v27 = vsel %vm3395_vm3, %v5343_v51, %v6750_v31 }
 0x6f1   : > { %v6758_v0 = vpop.permute.xlu1 %6757  ;;  %v5565_v35 = vsel %vm5561_vm7, %v5558_v27, %v6755_v50  ;;  %v5564_v45 = vsel %vm5561_vm7, %v5557_v16, %v6754_v24  ;;  %v6924_v16 = vld [vmem:[%s8948_s9 + $0x28] sm:$0xff] }
 0x6f2   : > { %v6760_v46 = vunpack.i.h.bf16 %v6758_v0  ;;  %v6759_v55 = vunpack.i.l.bf16 %v6758_v0 }
 0x6f4   : > { %v5570_v22 = vsel %vm3929_vm6, %v5564_v45, %v6759_v55  ;;  %v5571_v42 = vsel %vm3929_vm6, %v5565_v35, %v6760_v46 }
 0x6f5   : > { %v5575_v33 = vpack.c.bf16 %v5571_v42, %v5570_v22 }
 0x6f6   : > { %v6763_v38 = vpop.permute.xlu0 %6762  ;;  %v6768_v36 = vpop.permute.xlu1 %6767 }
 0x6f7   : > { %v6765_v39 = vunpack.i.h.bf16 %v6763_v38  ;;  %v6764_v30 = vunpack.i.l.bf16 %v6763_v38  ;;  %v6770_v37 = vunpack.i.h.bf16 %v6768_v36  ;;  %v6769_v3 = vunpack.i.l.bf16 %v6768_v36  ;;  %6628 = vmatmul.mubr.msk.bf16.gmra.mxu0 %vm503_vm1, %v5575_v33 }
 0x6f8   : > { %6631 = vmatprep.mubr.msk.bf16.mxu0 %vm6962_vm2, %v8962_v10 }
 0x6f9   : > { %v5560_v51 = vsel %vm3395_vm3, %v5479_v49, %v6765_v39  ;;  %v5559_v54 = vsel %vm3395_vm3, %v5411_v17, %v6764_v30  ;;  %v5584_v49 = vrot.slane %v8754_v5, %v5583_v53  ;;  %v6780_v30 = vld [vmem:[%s7071_s16 + $0x8] sm:$0xff]  }
 0x6fa   : > { %v5566_v20 = vsel %vm5561_vm7, %v5559_v54, %v6769_v3  ;;  %v5567_v18 = vsel %vm5561_vm7, %v5560_v51, %v6770_v37  ;;  %v6773_v15 = vpop.permute.xlu0 %6772  ;;  %6636 = vmatpush3.bf16.msra.mxu1 %v6780_v30  ;;  %v6781_v37 = vld [vmem:[%s7071_s16] sm:$0xff]  }
 0x6fb   : > { %v6775_v40 = vunpack.i.h.bf16 %v6773_v15  ;;  %v6774_v9 = vunpack.i.l.bf16 %v6773_v15  ;;  %6637 = vmatprep.subr.bf16.mxu1 %v8962_v10 }
 0x6fd   : > { %v5572_v29 = vsel %vm3929_vm6, %v5566_v20, %v6774_v9  ;;  %v5573_v7 = vsel %vm3929_vm6, %v5567_v18, %v6775_v40 }
 0x6fe   : > { %v5576_v62 = vpack.c.bf16 %v5573_v7, %v5572_v29  ;;  %6638 = vmatpush3.bf16.msra.mxu1 %v6781_v37 }
 0x700   : > { %6632 = vmatmul.mubr.msk.bf16.gmra.mxu0 %vm503_vm1, %v5576_v62 }
 0x701   : > { %6659 = vmatprep.mubr.msk.bf16.mxu0 %vm6962_vm2, %v8962_v10 }
 0x776   : > { %v5640_v61 = vpop.f32.mrf.mxu0 }
 0x777   : > { %v5641_v13 = vadd.f32 %v5640_v61, %v5584_v49 }
 0x778   : > { %v6625_v4 = vpop.f32.mrf.mxu0 }
 0x779   : > { %v8760_v43 = vadd.f32 %v6919_v14, %v5641_v13 }
 0x77a   : > { %v5643_v17 = vpop.f32.mrf.mxu0 }
 0x77b   : > { %v5644_v63 = vadd.f32 %v5643_v17, %v5584_v49  ;;  %v5669_v56 = vsel %vm503_vm1, %v8760_v43, 0.0 }
 0x77c   : > { %5670 = vadd.xlane.f32.xlu1 %v5669_v56  ;;  %v6626_v44 = vpop.f32.mrf.mxu0 }
 0x77d   : > { %v8767_v58 = vadd.f32 %v6920_v34, %v5644_v63 }
 0x77f   : > { %v5672_v60 = vsel %vm503_vm1, %v8767_v58, 0.0 }
 0x780   : > { %5673 = vadd.xlane.f32.xlu0 %v5672_v60 }
 0x7b7   : > { %v5648_v21 = vpop.f32.mrf.mxu0 }
 0x7b8   : > { %v5649_v6 = vadd.f32 %v5648_v21, %v5584_v49 }
 0x7b9   : > { %v6629_v23 = vpop.f32.mrf.mxu0 }
 0x7ba   : > { %v8774_v52 = vadd.f32 %v6921_v25, %v5649_v6  ;;  %v5749_v25 = vsub.s32 2, %v7181_v2 }
 0x7bb   : > { %v5651_v19 = vpop.f32.mrf.mxu0 }
 0x7bc   : > { %v5652_v41 = vadd.f32 %v5651_v19, %v5584_v49  ;;  %v5675_v32 = vsel %vm503_vm1, %v8774_v52, 0.0 }
 0x7bd   : > { %5676 = vadd.xlane.f32.xlu0 %v5675_v32  ;;  %v6630_v12 = vpop.f32.mrf.mxu0  ;;  %v5750_v32 = vrot.slane %v8754_v5, %v5749_v25 }
 0x7be   : > { %v8781_v48 = vadd.f32 %v6922_v28, %v5652_v41  ;;  %v5759_v12 = vsub.s32 3, %v7181_v2 }
 0x7c0   : > { %v5656_v26 = vpop.f32.mrf.mxu0  ;;  %v5678_v57 = vsel %vm503_vm1, %v8781_v48, 0.0 }
 0x7c1   : > { %v5657_v1 = vadd.f32 %v5656_v26, %v5584_v49  ;;  %5679 = vadd.xlane.f32.xlu0 %v5678_v57 }
 0x7c2   : > { %v6633_v47 = vpop.f32.mrf.mxu0 }
 0x7c3   : > { %v8788_v59 = vadd.f32 %v6923_v11, %v5657_v1  ;;  %v5760_v1 = vrot.slane %v8754_v5, %v5759_v12 }
 0x7c4   : > { %v5659_v31 = vpop.f32.mrf.mxu0 }
 0x7c5   : > { %v5660_v8 = vadd.f32 %v5659_v31, %v5584_v49  ;;  %v5681_v50 = vsel %vm503_vm1, %v8788_v59, 0.0 }
 0x7c6   : > { %5682 = vadd.xlane.f32.xlu1 %v5681_v50  ;;  %v6634_v24 = vpop.f32.mrf.mxu0 }
 0x7c7   : > { %v8795_v27 = vadd.f32 %v6924_v16, %v5660_v8 }
 0x7c9   : > { %v5684_v0 = vsel %vm503_vm1, %v8795_v27, 0.0 }
 0x7ca   : > { %5685 = vadd.xlane.f32.xlu0 %v5684_v0 }
 0x805   : > { %v5671_v46 = vpop.xlane.xlu1 %5670 }
 0x806   : > { %v5687_v55 = vmul.f32 0.03125, %v5671_v46 }
 0x808   : > { %v5693_v35 = vsub.f32 %v8760_v43, %v5687_v55 }
 0x809   : > { %v5674_v45 = vpop.xlane.xlu0 %5673 }
 0x80a   : > { %v5688_v22 = vmul.f32 0.03125, %v5674_v45  ;;  %v5699_v42 = vmul.f32 %v5693_v35, %v5693_v35 }
 0x80c   : > { %v5694_v33 = vsub.f32 %v8767_v58, %v5688_v22  ;;  %v5705_v38 = vsel %vm503_vm1, %v5699_v42, 0.0 }
 0x80d   : > { %5706 = vadd.xlane.f32.xlu1 %v5705_v38 }
 0x80e   : > { %v5700_v36 = vmul.f32 %v5694_v33, %v5694_v33 }
 0x810   : > { %v5708_v39 = vsel %vm503_vm1, %v5700_v36, 0.0 }
 0x811   : > { %5709 = vadd.xlane.f32.xlu0 %v5708_v39 }
 0x846   : > { %v5677_v3 = vpop.xlane.xlu0 %5676 }
 0x847   : > { %v5689_v51 = vmul.f32 0.03125, %v5677_v3 }
 0x849   : > { %v5695_v54 = vsub.f32 %v8774_v52, %v5689_v51 }
 0x84a   : > { %v5680_v20 = vpop.xlane.xlu0 %5679 }
 0x84b   : > { %v5690_v18 = vmul.f32 0.03125, %v5680_v20  ;;  %v5701_v15 = vmul.f32 %v5695_v54, %v5695_v54 }
 0x84d   : > { %v5696_v40 = vsub.f32 %v8781_v48, %v5690_v18  ;;  %v5711_v9 = vsel %vm503_vm1, %v5701_v15, 0.0 }
 0x84e   : > { %5712 = vadd.xlane.f32.xlu1 %v5711_v9 }
 0x84f   : > { %v5683_v29 = vpop.xlane.xlu1 %5682  ;;  %v5702_v7 = vmul.f32 %v5696_v40, %v5696_v40 }
 0x850   : > { %v5691_v62 = vmul.f32 0.03125, %v5683_v29 }
 0x851   : > { %v5714_v53 = vsel %vm503_vm1, %v5702_v7, 0.0 }
 0x852   : > { %v5697_v49 = vsub.f32 %v8788_v59, %v5691_v62  ;;  %5715 = vadd.xlane.f32.xlu0 %v5714_v53 }
 0x853   : > { %v5686_v61 = vpop.xlane.xlu0 %5685 }
 0x854   : > { %v5692_v13 = vmul.f32 0.03125, %v5686_v61  ;;  %v5703_v4 = vmul.f32 %v5697_v49, %v5697_v49 }
 0x856   : > { %v5698_v14 = vsub.f32 %v8795_v27, %v5692_v13  ;;  %v5717_v17 = vsel %vm503_vm1, %v5703_v4, 0.0  ;;  %v6782_v4 = vld [vmem:[%s7081_s22 + $0x18] sm:$0xff]  }
 0x857   : > { %5718 = vadd.xlane.f32.xlu1 %v5717_v17  ;;  %6652 = vmatpush3.bf16.msra.mxu0 %v6782_v4  ;;  %v6784_v17 = vld [vmem:[%s7081_s22 + $0x8] sm:$0xff]  }
 0x858   : > { %v5704_v63 = vmul.f32 %v5698_v14, %v5698_v14  ;;  %6653 = vmatprep.subr.bf16.mxu0 %v8962_v10 }
 0x85a   : > { %v5720_v56 = vsel %vm503_vm1, %v5704_v63, 0.0  ;;  %v6785_v63 = vld [vmem:[%s7081_s22] sm:$0xff]  }
 0x85b   : > { %5721 = vadd.xlane.f32.xlu0 %v5720_v56 }
 0x896   : > { %v5707_v44 = vpop.xlane.xlu1 %5706 }
 0x897   : > { %v5723_v34 = vmul.f32 0.03125, %v5707_v44 }
 0x899   : > { %v5729_v60 = vadd.f32 1e-06, %v5723_v34 }
 0x89a   : > { %v5710_v21 = vpop.xlane.xlu0 %5709 }
 0x89b   : > { %6894 = vrsqrt.f32 %v5729_v60  ;;  %v5724_v6 = vmul.f32 0.03125, %v5710_v21 }
 0x89d   : > { %v5730_v23 = vadd.f32 1e-06, %v5724_v6 }
 0x89f   : > { %6896 = vrsqrt.f32 %v5730_v23 }
 0x8a8   : > { %v6895_v19 = vpop.eup %6894 }
 0x8a9   : > { %v5741_v41 = vmul.f32 %v6895_v19, %v5693_v35 }
 0x8ab   : > { %v5751_v57 = vmul.f32 %v5750_v32, %v5741_v41 }
 0x8ac   : > { %v6897_v28 = vpop.eup %6896 }
 0x8ad   : > { %v5742_v26 = vmul.f32 %v6897_v28, %v5694_v33  ;;  %v5761_v11 = vadd.f32 %v5760_v1, %v5751_v57 }
 0x8af   : > { %v5752_v47 = vmul.f32 %v5750_v32, %v5742_v26 }
 0x8b1   : > { %v5762_v31 = vadd.f32 %v5760_v1, %v5752_v47 }
 0x8b3   : > { %v5767_v8 = vpack.c.bf16 %v5762_v31, %v5761_v11 }
 0x8b5   : > { %6640 = vmatmul.mubr.msk.bf16.vlgmr.msra.gmra.mxu1 %vm503_vm1, %v5767_v8 }
 0x8b6   : > { %6643 = vmatprep.mubr.msk.bf16.mxu1 %vm6962_vm2, %v8962_v10 }
 0x8d7   : > { %v5713_v50 = vpop.xlane.xlu1 %5712 }
 0x8d8   : > { %v5725_v24 = vmul.f32 0.03125, %v5713_v50 }
 0x8da   : > { %v5731_v16 = vadd.f32 1e-06, %v5725_v24 }
 0x8db   : > { %v5716_v0 = vpop.xlane.xlu0 %5715 }
 0x8dc   : > { %6898 = vrsqrt.f32 %v5731_v16  ;;  %v5726_v46 = vmul.f32 0.03125, %v5716_v0 }
 0x8de   : > { %v5732_v55 = vadd.f32 1e-06, %v5726_v46 }
 0x8e0   : > { %6900 = vrsqrt.f32 %v5732_v55  ;;  %v5719_v35 = vpop.xlane.xlu1 %5718 }
 0x8e1   : > { %v5727_v45 = vmul.f32 0.03125, %v5719_v35 }
 0x8e3   : > { %v5733_v22 = vadd.f32 1e-06, %v5727_v45 }
 0x8e4   : > { %v5722_v42 = vpop.xlane.xlu0 %5721 }
 0x8e5   : > { %6902 = vrsqrt.f32 %v5733_v22  ;;  %v5728_v33 = vmul.f32 0.03125, %v5722_v42 }
 0x8e7   : > { %v5734_v38 = vadd.f32 1e-06, %v5728_v33 }
 0x8e9   : > { %v6899_v36 = vpop.eup %6898  ;;  %6904 = vrsqrt.f32 %v5734_v38 }
 0x8ea   : > { %v5743_v39 = vmul.f32 %v6899_v36, %v5695_v54 }
 0x8ec   : > { %v5753_v3 = vmul.f32 %v5750_v32, %v5743_v39 }
 0x8ed   : > { %v6901_v30 = vpop.eup %6900 }
 0x8ee   : > { %v5744_v37 = vmul.f32 %v6901_v30, %v5696_v40  ;;  %v5763_v18 = vadd.f32 %v5760_v1, %v5753_v3 }
 0x8f0   : > { %v5754_v51 = vmul.f32 %v5750_v32, %v5744_v37 }
 0x8f2   : > { %v6903_v20 = vpop.eup %6902  ;;  %v5764_v15 = vadd.f32 %v5760_v1, %v5754_v51 }
 0x8f3   : > { %v5745_v9 = vmul.f32 %v6903_v20, %v5697_v49  ;;  %v6783_v49 = vld [vmem:[%s7081_s22 + $0x10] sm:$0xff]  }
 0x8f4   : > { %v5768_v29 = vpack.c.bf16 %v5764_v15, %v5763_v18  ;;  %6654 = vmatpush3.bf16.msra.mxu0 %v6783_v49  ;;  %v5902_v49 = vsub.s32 5, %v7181_v2 }
 0x8f5   : > { %v5755_v62 = vmul.f32 %v5750_v32, %v5745_v9  ;;  %6655 = vmatprep.subr.bf16.mxu0 %v8962_v10 }
 0x8f6   : > { %v6905_v7 = vpop.eup %6904  ;;  %6644 = vmatmul.mubr.msk.bf16.gmra.mxu1 %vm503_vm1, %v5768_v29 }
 0x8f7   : > { %6647 = vmatprep.mubr.msk.bf16.mxu1 %vm6962_vm2, %v8962_v10  ;;  %v5746_v54 = vmul.f32 %v6905_v7, %v5698_v14  ;;  %v5765_v53 = vadd.f32 %v5760_v1, %v5755_v62  ;;  %v6367_v14 = vld [vmem:[%s8963_s27] ss:$0 sm:$0xff] }
 0x8f8   : > { %6656 = vmatpush3.bf16.msra.mxu0 %v6784_v17  ;;  %v5903_v17 = vrot.slane %v8754_v5, %v5902_v49 }
 0x8f9   : > { %v5756_v40 = vmul.f32 %v5750_v32, %v5746_v54  ;;  %6657 = vmatprep.subr.bf16.mxu0 %v8962_v10 }
 0x8fb   : > { %v5766_v61 = vadd.f32 %v5760_v1, %v5756_v40 }
 0x8fc   : > { %6658 = vmatpush3.bf16.msra.mxu0 %v6785_v63 }
 0x8fd   : > { %v5769_v13 = vpack.c.bf16 %v5766_v61, %v5765_v53 }
 0x8ff   : > { %6648 = vmatmul.mubr.msk.bf16.gmra.mxu1 %vm503_vm1, %v5769_v13 }
 0x975   : > { %v5836_v56 = vpop.f32.mrf.mxu1 }
 0x976   : > { %v5837_v44 = vadd.f32 %v6367_v14, %v5836_v56 }
 0x977   : > { %v6641_v34 = vpop.f32.mrf.mxu1 }
 0x978   : > { %v5865_v60 = vmul.f32 0.70710677, %v5837_v44  ;;  %v5859_v12 = vmul.f32 0.5, %v5837_v44 }
 0x979   : > { %v5839_v21 = vpop.f32.mrf.mxu1 }
 0x97a   : > { %6906 = verf.f32 %v5865_v60  ;;  %v5840_v6 = vadd.f32 %v6367_v14, %v5839_v21 }
 0x97b   : > { %v6642_v23 = vpop.f32.mrf.mxu1 }
 0x97c   : > { %v5866_v25 = vmul.f32 0.70710677, %v5840_v6  ;;  %v5860_v28 = vmul.f32 0.5, %v5840_v6 }
 0x97e   : > { %6908 = verf.f32 %v5866_v25 }
 0x987   : > { %v6907_v19 = vpop.eup %6906 }
 0x988   : > { %v5877_v41 = vadd.f32 1.0, %v6907_v19 }
 0x98a   : > { %v5883_v57 = vmul.f32 %v5877_v41, %v5859_v12 }
 0x98b   : > { %v6909_v32 = vpop.eup %6908 }
 0x98c   : > { %v5878_v26 = vadd.f32 1.0, %v6909_v32 }
 0x98e   : > { %v5884_v1 = vmul.f32 %v5878_v26, %v5860_v28 }
 0x990   : > { %v5889_v47 = vpack.c.bf16 %v5884_v1, %v5883_v57 }
 0x992   : > { %6660 = vmatmul.mubr.msk.bf16.vlgmr.msra.gmra.mxu0 %vm5928_vm8, %v5889_v47 }
 0x993   : > { %6663 = vmatprep.mubr.msk.bf16.mxu0 %vm6962_vm2, %v8962_v10 }
 0x9b6   : > { %v5844_v11 = vpop.f32.mrf.mxu1 }
 0x9b7   : > { %v5845_v31 = vadd.f32 %v6367_v14, %v5844_v11 }
 0x9b8   : > { %v6645_v8 = vpop.f32.mrf.mxu1 }
 0x9b9   : > { %v5867_v50 = vmul.f32 0.70710677, %v5845_v31  ;;  %v5861_v3 = vmul.f32 0.5, %v5845_v31 }
 0x9ba   : > { %v5847_v24 = vpop.f32.mrf.mxu1 }
 0x9bb   : > { %6910 = verf.f32 %v5867_v50  ;;  %v5848_v16 = vadd.f32 %v6367_v14, %v5847_v24 }
 0x9bc   : > { %v6646_v0 = vpop.f32.mrf.mxu1 }
 0x9bd   : > { %v5868_v46 = vmul.f32 0.70710677, %v5848_v16  ;;  %v5862_v51 = vmul.f32 0.5, %v5848_v16 }
 0x9bf   : > { %6912 = verf.f32 %v5868_v46  ;;  %v5852_v55 = vpop.f32.mrf.mxu1 }
 0x9c0   : > { %v5853_v35 = vadd.f32 %v6367_v14, %v5852_v55 }
 0x9c1   : > { %v6649_v45 = vpop.f32.mrf.mxu1 }
 0x9c2   : > { %v5869_v22 = vmul.f32 0.70710677, %v5853_v35  ;;  %v5863_v62 = vmul.f32 0.5, %v5853_v35 }
 0x9c3   : > { %v5855_v42 = vpop.f32.mrf.mxu1 }
 0x9c4   : > { %6914 = verf.f32 %v5869_v22  ;;  %v5856_v33 = vadd.f32 %v6367_v14, %v5855_v42 }
 0x9c5   : > { %v6650_v38 = vpop.f32.mrf.mxu1 }
 0x9c6   : > { %v5870_v36 = vmul.f32 0.70710677, %v5856_v33  ;;  %v5864_v40 = vmul.f32 0.5, %v5856_v33 }
 0x9c8   : > { %v6911_v39 = vpop.eup %6910  ;;  %6916 = verf.f32 %v5870_v36 }
 0x9c9   : > { %v5879_v30 = vadd.f32 1.0, %v6911_v39 }
 0x9cb   : > { %v5885_v18 = vmul.f32 %v5879_v30, %v5861_v3 }
 0x9cc   : > { %v6913_v37 = vpop.eup %6912 }
 0x9cd   : > { %v5880_v20 = vadd.f32 1.0, %v6913_v37 }
 0x9cf   : > { %v5886_v15 = vmul.f32 %v5880_v20, %v5862_v51 }
 0x9d1   : > { %v6915_v9 = vpop.eup %6914  ;;  %v5890_v29 = vpack.c.bf16 %v5886_v15, %v5885_v18 }
 0x9d2   : > { %v5881_v7 = vadd.f32 1.0, %v6915_v9 }
 0x9d3   : > { %6664 = vmatmul.mubr.msk.bf16.gmra.mxu0 %vm5928_vm8, %v5890_v29 }
 0x9d4   : > { %6667 = vmatprep.mubr.msk.bf16.mxu0 %vm6962_vm2, %v8962_v10  ;;  %v5887_v61 = vmul.f32 %v5881_v7, %v5863_v62 }
 0x9d5   : > { %v6917_v54 = vpop.eup %6916 }
 0x9d6   : > { %v5882_v53 = vadd.f32 1.0, %v6917_v54 }
 0x9d8   : > { %v5888_v13 = vmul.f32 %v5882_v53, %v5864_v40 }
 0x9da   : > { %v5891_v4 = vpack.c.bf16 %v5888_v13, %v5887_v61 }
 0x9dc   : > { %6668 = vmatmul.mubr.msk.bf16.gmra.mxu0 %vm5928_vm8, %v5891_v4 }
 0xa52   : > { %v5972_v63 = vpop.f32.mrf.mxu0 }
 0xa53   : > { %v5973_v14 = vadd.f32 %v5972_v63, %v5903_v17 }
 0xa54   : > { %v6661_v56 = vpop.f32.mrf.mxu0 }
 0xa55   : > { %v5995_v44 = vadd.f32 %v5973_v14, %v8760_v43 }
 0xa56   : > { %v5975_v34 = vpop.f32.mrf.mxu0 }
 0xa57   : > { %6001 = vst.msk [vmem:[%s8948_s9] sm:$0xff] %vm503_vm1, %v5995_v44  ;;  %v5976_v10 = vadd.f32 %v5975_v34, %v5903_v17 }
 0xa58   : > { %v6662_v60 = vpop.f32.mrf.mxu0 }
 0xa59   : > { %v5996_v21 = vadd.f32 %v5976_v10, %v8767_v58 }
 0xa5b   : > { %6002 = vst.msk [vmem:[%s8948_s9 + $0x8] sm:$0xff] %vm503_vm1, %v5996_v21 }
 0xa93   : > { %v5980_v5 = vpop.f32.mrf.mxu0 }
 0xa94   : > { %v5981_v6 = vadd.f32 %v5980_v5, %v5903_v17 }
 0xa95   : > { %v6665_v23 = vpop.f32.mrf.mxu0 }
 0xa96   : > { %v5997_v43 = vadd.f32 %v5981_v6, %v8774_v52 }
 0xa97   : > { %v5983_v25 = vpop.f32.mrf.mxu0 }
 0xa98   : > { %6003 = vst.msk [vmem:[%s8948_s9 + $0x10] sm:$0xff] %vm503_vm1, %v5997_v43  ;;  %v5984_v19 = vadd.f32 %v5983_v25, %v5903_v17 }
 0xa99   : > { %v6666_v41 = vpop.f32.mrf.mxu0 }
 0xa9a   : > { %v5998_v58 = vadd.f32 %v5984_v19, %v8781_v48 }
 0xa9c   : > { %6004 = vst.msk [vmem:[%s8948_s9 + $0x18] sm:$0xff] %vm503_vm1, %v5998_v58  ;;  %v5988_v32 = vpop.f32.mrf.mxu0 }
 0xa9d   : > { %v5989_v12 = vadd.f32 %v5988_v32, %v5903_v17 }
 0xa9e   : > { %v6669_v28 = vpop.f32.mrf.mxu0 }
 0xa9f   : > { %v5999_v52 = vadd.f32 %v5989_v12, %v8788_v59 }
 0xaa0   : > { %v5991_v26 = vpop.f32.mrf.mxu0 }
 0xaa1   : > { %6005 = vst.msk [vmem:[%s8948_s9 + $0x20] sm:$0xff] %vm503_vm1, %v5999_v52  ;;  %v5992_v57 = vadd.f32 %v5991_v26, %v5903_v17  ;;  %6010 = sbr.rel (%p6380_p6) target bundleno = 3047 (0xbe7), region = 64 }
 0xaa2   : > { %v6670_v1 = vpop.f32.mrf.mxu0 }
 0xaa3   : > { %v6000_v48 = vadd.f32 %v5992_v57, %v8795_v27 }
 0xaa5   : > { %6006 = vst.msk [vmem:[%s8948_s9 + $0x28] sm:$0xff] %vm503_vm1, %v6000_v48 }
 0xaa6   : > { %v6012_v59 = vsel %vm503_vm1, %v5995_v44, 0.0  ;;  %v6018_v47 = vsel %vm503_vm1, %v5997_v43, 0.0  ;;  %v6015_v11 = vsel %vm503_vm1, %v5996_v21, 0.0  ;;  %v6021_v31 = vsel %vm503_vm1, %v5998_v58, 0.0  ;;  %v6011_v41 = vld [vmem:[%s8947_s8] sm:$0x3] }
 0xaa7   : > { %6013 = vadd.xlane.f32.xlu0 %v6012_v59  ;;  %6019 = vadd.xlane.f32.xlu1 %v6018_v47  ;;  %v6024_v27 = vsel %vm503_vm1, %v5999_v52, 0.0  ;;  %v6027_v8 = vsel %vm503_vm1, %v6000_v48, 0.0  ;;  %v8964_v32 = vsub.s32 0, %v7181_v2  ;;  %v8965_v26 = vsub.s32 1, %v7181_v2 }
 0xaa9   : > { %v6093_v12 = vrot.slane %v6011_v41, %v8964_v32  ;;  %v6103_v57 = vrot.slane %v6011_v41, %v8965_v26 }
 0xaab   : > { %6016 = vadd.xlane.f32.xlu0 %v6015_v11  ;;  %6022 = vadd.xlane.f32.xlu1 %v6021_v31 }
 0xaaf   : > { %6025 = vadd.xlane.f32.xlu0 %v6024_v27  ;;  %6028 = vadd.xlane.f32.xlu1 %v6027_v8 }
 0xb30   : > { %v6014_v50 = vpop.xlane.xlu0 %6013  ;;  %v6020_v24 = vpop.xlane.xlu1 %6019 }
 0xb31   : > { %v6030_v16 = vmul.f32 0.03125, %v6014_v50  ;;  %v6032_v0 = vmul.f32 0.03125, %v6020_v24 }
 0xb33   : > { %v6036_v46 = vsub.f32 %v5995_v44, %v6030_v16  ;;  %v8883_v55 = vsub.f32 %v5997_v43, %v6032_v0 }
 0xb34   : > { %v6017_v35 = vpop.xlane.xlu0 %6016  ;;  %v6023_v45 = vpop.xlane.xlu1 %6022 }
 0xb35   : > { %v6031_v22 = vmul.f32 0.03125, %v6017_v35  ;;  %v6033_v42 = vmul.f32 0.03125, %v6023_v45  ;;  %v6042_v33 = vmul.f32 %v6036_v46, %v6036_v46  ;;  %v6044_v38 = vmul.f32 %v8883_v55, %v8883_v55 }
 0xb37   : > { %v6037_v36 = vsub.f32 %v5996_v21, %v6031_v22  ;;  %v8887_v39 = vsub.f32 %v5998_v58, %v6033_v42  ;;  %v6048_v30 = vsel %vm503_vm1, %v6042_v33, 0.0  ;;  %v6054_v51 = vsel %vm503_vm1, %v6044_v38, 0.0 }
 0xb38   : > { %6049 = vadd.xlane.f32.xlu0 %v6048_v30  ;;  %v6026_v37 = vpop.xlane.xlu0 %6025  ;;  %v6029_v3 = vpop.xlane.xlu1 %6028 }
 0xb39   : > { %v6034_v20 = vmul.f32 0.03125, %v6026_v37  ;;  %v6035_v18 = vmul.f32 0.03125, %v6029_v3  ;;  %v6043_v15 = vmul.f32 %v6037_v36, %v6037_v36  ;;  %v6045_v9 = vmul.f32 %v8887_v39, %v8887_v39 }
 0xb3b   : > { %v6040_v29 = vsub.f32 %v5999_v52, %v6034_v20  ;;  %v6041_v7 = vsub.f32 %v6000_v48, %v6035_v18  ;;  %v6051_v54 = vsel %vm503_vm1, %v6043_v15, 0.0  ;;  %v6057_v62 = vsel %vm503_vm1, %v6045_v9, 0.0 }
 0xb3c   : > { %6055 = vadd.xlane.f32.xlu0 %v6054_v51  ;;  %6052 = vadd.xlane.f32.xlu1 %v6051_v54 }
 0xb3d   : > { %v6046_v40 = vmul.f32 %v6040_v29, %v6040_v29  ;;  %v6047_v53 = vmul.f32 %v6041_v7, %v6041_v7 }
 0xb3f   : > { %v6060_v61 = vsel %vm503_vm1, %v6046_v40, 0.0  ;;  %v6063_v13 = vsel %vm503_vm1, %v6047_v53, 0.0 }
 0xb40   : > { %6058 = vadd.xlane.f32.xlu1 %v6057_v62  ;;  %6061 = vadd.xlane.f32.xlu0 %v6060_v61 }
 0xb44   : > { %6064 = vadd.xlane.f32.xlu1 %v6063_v13 }
 0xbc1   : > { %v6050_v4 = vpop.xlane.xlu0 %6049 }
 0xbc2   : > { %v6066_v49 = vmul.f32 0.03125, %v6050_v4 }
 0xbc4   : > { %v6072_v17 = vadd.f32 1e-06, %v6066_v49 }
 0xbc5   : > { %v6053_v63 = vpop.xlane.xlu1 %6052  ;;  %v6056_v14 = vpop.xlane.xlu0 %6055 }
 0xbc6   : > { %6925 = vrsqrt.f32 %v6072_v17  ;;  %v6067_v56 = vmul.f32 0.03125, %v6053_v63  ;;  %v6068_v44 = vmul.f32 0.03125, %v6056_v14 }
 0xbc8   : > { %v6073_v34 = vadd.f32 1e-06, %v6067_v56  ;;  %v6074_v10 = vadd.f32 1e-06, %v6068_v44 }
 0xbc9   : > { %v6059_v60 = vpop.xlane.xlu1 %6058  ;;  %v6062_v21 = vpop.xlane.xlu0 %6061 }
 0xbca   : > { %6927 = vrsqrt.f32 %v6073_v34  ;;  %v6069_v5 = vmul.f32 0.03125, %v6059_v60  ;;  %v6070_v6 = vmul.f32 0.03125, %v6062_v21 }
 0xbcb   : > { %6929 = vrsqrt.f32 %v6074_v10 }
 0xbcc   : > { %v6075_v23 = vadd.f32 1e-06, %v6069_v5  ;;  %v6076_v43 = vadd.f32 1e-06, %v6070_v6 }
 0xbcd   : > { %v6065_v25 = vpop.xlane.xlu1 %6064 }
 0xbce   : > { %6931 = vrsqrt.f32 %v6075_v23  ;;  %v6071_v19 = vmul.f32 0.03125, %v6065_v25 }
 0xbcf   : > { %6933 = vrsqrt.f32 %v6076_v43 }
 0xbd0   : > { %v6077_v58 = vadd.f32 1e-06, %v6071_v19 }
 0xbd2   : > { %6935 = vrsqrt.f32 %v6077_v58 }
 0xbd3   : > { %v6926_v28 = vpop.eup %6925 }
 0xbd4   : > { %v6084_v52 = vmul.f32 %v6926_v28, %v6036_v46 }
 0xbd6   : > { %v6094_v1 = vmul.f32 %v6093_v12, %v6084_v52 }
 0xbd7   : > { %v6928_v48 = vpop.eup %6927 }
 0xbd8   : > { %v6930_v59 = vpop.eup %6929  ;;  %v6104_v47 = vadd.f32 %v6103_v57, %v6094_v1  ;;  %v6085_v11 = vmul.f32 %v6928_v48, %v6037_v36 }
 0xbd9   : > { %v6086_v31 = vmul.f32 %v6930_v59, %v8883_v55 }
 0xbda   : > { %6110 = vst.msk [vmem:[%s8948_s9] sm:$0xff] %vm503_vm1, %v6104_v47  ;;  %v6095_v27 = vmul.f32 %v6093_v12, %v6085_v11 }
 0xbdb   : > { %v6932_v8 = vpop.eup %6931  ;;  %v6096_v50 = vmul.f32 %v6093_v12, %v6086_v31 }
 0xbdc   : > { %v6934_v24 = vpop.eup %6933  ;;  %v6105_v16 = vadd.f32 %v6103_v57, %v6095_v27  ;;  %v6087_v2 = vmul.f32 %v6932_v8, %v8887_v39 }
 0xbdd   : > { %v6106_v0 = vadd.f32 %v6103_v57, %v6096_v50  ;;  %v6088_v46 = vmul.f32 %v6934_v24, %v6040_v29 }
 0xbde   : > { %6111 = vst.msk [vmem:[%s8948_s9 + $0x8] sm:$0xff] %vm503_vm1, %v6105_v16  ;;  %v6097_v55 = vmul.f32 %v6093_v12, %v6087_v2 }
 0xbdf   : > { %v6936_v35 = vpop.eup %6935  ;;  %6112 = vst.msk [vmem:[%s8948_s9 + $0x10] sm:$0xff] %vm503_vm1, %v6106_v0  ;;  %v6098_v45 = vmul.f32 %v6093_v12, %v6088_v46 }
 0xbe0   : > { %v6107_v22 = vadd.f32 %v6103_v57, %v6097_v55  ;;  %v6089_v42 = vmul.f32 %v6936_v35, %v6041_v7 }
 0xbe1   : > { %v6108_v33 = vadd.f32 %v6103_v57, %v6098_v45 }
 0xbe2   : > { %6113 = vst.msk [vmem:[%s8948_s9 + $0x18] sm:$0xff] %vm503_vm1, %v6107_v22  ;;  %v6099_v38 = vmul.f32 %v6093_v12, %v6089_v42 }
 0xbe3   : > { %6114 = vst.msk [vmem:[%s8948_s9 + $0x20] sm:$0xff] %vm503_vm1, %v6108_v33 }
 0xbe4   : > { %v6109_v36 = vadd.f32 %v6103_v57, %v6099_v38 }
 0xbe6   : > { %6115 = vst.msk [vmem:[%s8948_s9 + $0x28] sm:$0xff] %vm503_vm1, %v6109_v36 }
 0xbe7 PF: > { %s19_s11 = sadd.s32 1, %s6959_s11   ;;  %s8966_s30 = smov %s6955_s10 }
 0xbe8   : > { %p16_p7 = scmp.ge.s32.totalorder %s19_s11, 4   ;;  %s8967_s10 = smov %s8969_s12 }
 0xbea   :  { %18 = sbr.rel (!%p16_p7) target bundleno = 3 (0x3), region = 115 }

</bundles_post_ra>
